<compile_context>
chip_gen: v7x
topology: tpu7x:2x2x1
jax: 0.10.0
libtpu: 0.0.40
codegen_flags: <defaults>
</compile_context>

<pallas_src>
import functools
import math

import jax
import jax.numpy as jnp
from jax.experimental import pallas as pl
from jax.experimental.pallas import tpu as pltpu  # noqa: F401  (TPU backend assumed)

# ---------------- scaled-down configuration (original values in comments) ----------------
BATCH        = 2
MAX_LEN      = 32                      # original 768  (== XLNet hidden size == pooler dim)
OUT_CHANNELS = MAX_LEN                 # GAT out_channels (== max_length in the module)
HEADS_FIRST  = 4
HEADS_SECOND = 1
GNN_IN_DIM   = 16                      # original 300 (word-embedding dim)
LDI_DIM      = 64                      # original 2048 (logits_difference_input_dim)
ATTN_HEADS   = 8
LDI_RED      = LDI_DIM // ATTN_HEADS   # original 256
LDI_SEQ      = 4                       # sequence length of logits_difference_input (>= 3)
NUM_LABELS   = 2
N_ENT, N_MSG, N_FATHER = 6, 5, BATCH
MLP_HIDDEN   = (MAX_LEN + OUT_CHANNELS + LDI_RED) // 2   # == 36


def _full_spec(shape):
    """Whole-array block (grid = ()), so block_shape == array shape."""
    return pl.BlockSpec(shape, lambda *_: (0,) * len(shape))


# ---------------------------------------------------------------------------
# In-kernel GATConv (PyG semantics) for one relation src -> dst with a dense adjacency mask.
# Pure function on arrays that already live in VMEM/registers inside the fused kernel.
#   * shared linear for src/dst (int in_channels case) -> ONE concatenated matmul
#   * per-head edge attention, LeakyReLU(0.2), masked softmax over incoming edges
#   * heads concatenated, bias added, returned as a single (n_dst, heads*out_ch) array
# ---------------------------------------------------------------------------
def _gat(xs, xd, w, att_src, att_dst, bias, adj, heads, out_ch, neg_slope=0.2):
    ns = xs.shape[0]
    h_all = jnp.dot(jnp.concatenate([xs, xd], axis=0), w,
                    preferred_element_type=jnp.float32)           # (Ns+Nd, H*C)
    hs, hd = h_all[:ns], h_all[ns:]
    edge_mask = adj > 0                                           # (Nd, Ns)
    outs = []
    for h in range(heads):                                        # static, heads <= 4
        lo, hi = h * out_ch, (h + 1) * out_ch
        hs_h = hs[:, lo:hi]                                       # (Ns, C)
        hd_h = hd[:, lo:hi]                                       # (Nd, C)
        a_s = jnp.sum(hs_h * att_src[h:h + 1, :], axis=-1)        # (Ns,)
        a_d = jnp.sum(hd_h * att_dst[h:h + 1, :], axis=-1)        # (Nd,)
        e = a_d[:, None] + a_s[None, :]                           # (Nd, Ns)
        e = jnp.where(e > 0, e, neg_slope * e)                    # LeakyReLU(0.2), PyG default
        e = jnp.where(edge_mask, e, jnp.float32(-1e30))
        m = jnp.max(e, axis=-1, keepdims=True)
        p = jnp.where(edge_mask, jnp.exp(e - m), 0.0)
        denom = jnp.maximum(jnp.sum(p, axis=-1, keepdims=True), 1e-16)
        p = p * pl.reciprocal(denom, approx=True)                 # dst w/o edges -> zeros
        outs.append(jnp.dot(p, hs_h, preferred_element_type=jnp.float32))   # (Nd, C)
    out = outs[0] if heads == 1 else jnp.concatenate(outs, axis=-1)
    return out + bias


# ---------------------------------------------------------------------------
# The single fused kernel: GNN (both hetero layers) + pooler + LDI branch + MLP head.
# ---------------------------------------------------------------------------
def _fused_kernel(
        # ---- GNN inputs -----------------------------------------------------------------
        xe_ref, xm_ref, xf_ref,                     # node features: entities / message / father
        adj_bel_ref, adj_coo_ref, adj_ref_ref,      # dense adjacency masks (dst, src)
        w0b_ref, as0b_ref, ad0b_ref, b0b_ref,       # layer-0 'belong'        (message -> entities)
        w0c_ref, as0c_ref, ad0c_ref, b0c_ref,       # layer-0 'co_occurrence' (entities -> entities)
        w0r_ref, as0r_ref, ad0r_ref, b0r_ref,       # layer-0 'refer'         (entities -> father)
        w1r_ref, as1r_ref, ad1r_ref, b1r_ref,       # layer-1 'refer'         (entities -> father)
        # ---- pooler ---------------------------------------------------------------------
        cls_ref, pw_ref, pb_ref,
        # ---- logits-difference branch (weights already algebraically folded) -------------
        x2_ref, wqkv_ref, bqkv_ref, wo_ref, bo_ref,
        wrl0_ref, wrl1_ref, wrl2_ref, brl_ref,
        # ---- classification head ----------------------------------------------------------
        w1a_ref, w1b_ref, w1c_ref, b1_ref, w2_ref, b2_ref,
        # ---- outputs ----------------------------------------------------------------------
        logits_ref, father_ref, lm_ref,
        *, num_heads, batch, seq):

    # ============ hetero GNN: two HeteroConv(GATConv, aggr='sum') layers ==================
    # Only the relations on the dataflow path to the returned 'father' tensor are computed;
    # the others ('has', and layer-1 belong/co_occurrence) do not affect any returned output.
    xe, xm, xf = xe_ref[...], xm_ref[...], xf_ref[...]
    ent0 = (_gat(xm, xe, w0b_ref[...], as0b_ref[...], ad0b_ref[...], b0b_ref[...],
                 adj_bel_ref[...], HEADS_FIRST, OUT_CHANNELS)
            + _gat(xe, xe, w0c_ref[...], as0c_ref[...], ad0c_ref[...], b0c_ref[...],
                   adj_coo_ref[...], HEADS_FIRST, OUT_CHANNELS))      # HeteroConv aggr='sum'
    fat0 = _gat(xe, xf, w0r_ref[...], as0r_ref[...], ad0r_ref[...], b0r_ref[...],
                adj_ref_ref[...], HEADS_FIRST, OUT_CHANNELS)
    father = _gat(ent0, fat0, w1r_ref[...], as1r_ref[...], ad1r_ref[...], b1r_ref[...],
                  adj_ref_ref[...], HEADS_SECOND, OUT_CHANNELS)       # (B, OUT_CHANNELS)
    father_ref[...] = father

    # ============ pooled_output = pooler(bert [CLS] hidden state) =========================
    pooled = jnp.dot(cls_ref[...], pw_ref[...], preferred_element_type=jnp.float32) + pb_ref[...]
    lm_ref[...] = pooled

    # ============ logits-difference branch =================================================
    D = x2_ref.shape[1]
    dh = D // num_heads
    scale = 1.0 / math.sqrt(dh)

    # folded q/k/v linears + MHA in_proj: one (B*L, D) @ (D, 3D) matmul
    qkv = jnp.dot(x2_ref[...], wqkv_ref[...], preferred_element_type=jnp.float32) + bqkv_ref[...]
    q2, k2, v2 = qkv[:, :D], qkv[:, D:2 * D], qkv[:, 2 * D:]

    # scaled-dot-product attention (dropout = eval mode); static loops over batch and heads,
    # per-batch head outputs concatenated so the only "store" is a register concat.
    attn_rows = []
    for b in range(batch):
        r0 = b * seq
        qb, kb, vb = q2[r0:r0 + seq, :], k2[r0:r0 + seq, :], v2[r0:r0 + seq, :]
        head_outs = []
        for h in range(num_heads):
            lo, hi = h * dh, (h + 1) * dh
            qh, kh, vh = qb[:, lo:hi], kb[:, lo:hi], vb[:, lo:hi]
            s = jnp.einsum("ld,md->lm", qh, kh, preferred_element_type=jnp.float32) * scale
            s = s - jnp.max(s, axis=-1, keepdims=True)
            p = jnp.exp(s)
            p = p * pl.reciprocal(jnp.sum(p, axis=-1, keepdims=True), approx=True)
            head_outs.append(jnp.dot(p, vh, preferred_element_type=jnp.float32))
        attn_rows.append(jnp.concatenate(head_outs, axis=-1))        # (seq, D)
    attn2 = jnp.concatenate(attn_rows, axis=0)                       # (B*L, D)
    attn2 = jnp.dot(attn2, wo_ref[...], preferred_element_type=jnp.float32) + bo_ref[...]

    # reds + logits_difference_mlp (algebraically folded):
    #   ldi_out[b] = sum_i attn[b, i, :] @ W_rl_i + b_rl
    wrl = (wrl0_ref[...], wrl1_ref[...], wrl2_ref[...])
    ldi_rows = []
    for b in range(batch):
        acc = brl_ref[...]
        for i in range(3):
            row = attn2[b * seq + i:b * seq + i + 1, :]              # (1, D)
            acc = acc + jnp.dot(row, wrl[i], preferred_element_type=jnp.float32)
        ldi_rows.append(acc)
    ldi_out = jnp.concatenate(ldi_rows, axis=0)                      # (B, LDI_RED)

    # ============ classification head: cat([ldi, pooled, father]) -> MLP1 -> LeakyReLU -> MLP2
    h1 = (jnp.dot(ldi_out, w1a_ref[...], preferred_element_type=jnp.float32)
          + jnp.dot(pooled, w1b_ref[...], preferred_element_type=jnp.float32)
          + jnp.dot(father, w1c_ref[...], preferred_element_type=jnp.float32)
          + b1_ref[...])
    h1 = jnp.where(h1 > 0, h1, 0.01 * h1)                            # nn.LeakyReLU() default slope
    logits_ref[...] = jnp.dot(h1, w2_ref[...], preferred_element_type=jnp.float32) + b2_ref[...]


# ---------------------------------------------------------------------------
# Parameters (deterministic synthetic init; torch layout (out, in) kept, transposed at call)
# ---------------------------------------------------------------------------
def init_params(key):
    keys = iter(jax.random.split(key, 128))

    def nrm(shape, std=0.05):
        return std * jax.random.normal(next(keys), shape, jnp.float32)

    p = {}
    p["pooler_w"] = nrm((MAX_LEN, MAX_LEN)); p["pooler_b"] = nrm((MAX_LEN,))
    for name in ("query", "key", "value"):
        p[f"{name}_w"] = nrm((LDI_DIM, LDI_DIM)); p[f"{name}_b"] = nrm((LDI_DIM,))
    p["mha_in_w"] = nrm((3 * LDI_DIM, LDI_DIM)); p["mha_in_b"] = nrm((3 * LDI_DIM,))
    p["mha_out_w"] = nrm((LDI_DIM, LDI_DIM));    p["mha_out_b"] = nrm((LDI_DIM,))
    for i in range(3):
        p[f"red{i}_w"] = nrm((LDI_RED, LDI_DIM)); p[f"red{i}_b"] = nrm((LDI_RED,))
    p["ldm_w"] = nrm((LDI_RED, 3 * LDI_RED)); p["ldm_b"] = nrm((LDI_RED,))
    p["mlp1_w"] = nrm((MLP_HIDDEN, MAX_LEN + OUT_CHANNELS + LDI_RED), std=0.01)
    p["mlp1_b"] = nrm((MLP_HIDDEN,), std=0.01)
    p["mlp2_w"] = nrm((NUM_LABELS, MLP_HIDDEN), std=0.01)
    p["mlp2_b"] = nrm((NUM_LABELS,), std=0.01)
    # hetero GAT conv stacks: layer 0 (in=GNN_IN_DIM, heads=4), layer 1 (in=4*OUT, heads=1)
    rels = ["has", "belong", "co_occurrence", "refer"]
    layer_cfg = [(GNN_IN_DIM, HEADS_FIRST), (HEADS_FIRST * OUT_CHANNELS, HEADS_SECOND)]
    for layer, (in_dim, heads) in enumerate(layer_cfg):
        for r in rels:
            p[f"gat{layer}_{r}_w"] = nrm((heads * OUT_CHANNELS, in_dim))
            p[f"gat{layer}_{r}_att_src"] = nrm((heads, OUT_CHANNELS))
            p[f"gat{layer}_{r}_att_dst"] = nrm((heads, OUT_CHANNELS))
            p[f"gat{layer}_{r}_b"] = nrm((heads * OUT_CHANNELS,))
    return p


def _gat_args(params, layer, rel):
    """[W^T (in, heads*C), att_src (H,C), att_dst (H,C), bias (1, heads*C)] for one relation."""
    return [params[f"gat{layer}_{rel}_w"].T,
            params[f"gat{layer}_{rel}_att_src"],
            params[f"gat{layer}_{rel}_att_dst"],
            params[f"gat{layer}_{rel}_b"].reshape(1, -1)]


# ---------------------------------------------------------------------------
# Forward pass: fold weights in plain JAX, then a SINGLE fused pallas_call.
# ---------------------------------------------------------------------------
def forward(params, bert_cls, ldi, gnn_feats, adjs):
    B, L, D = ldi.shape

    # ---- algebraic weight folding (tiny, trace-time / one-shot XLA ops) -------------------
    # q/k/v linear followed by MHA in_proj:  y = (x W_l^T + b_l) W_i^T + b_i
    Wq_in, Wk_in, Wv_in = jnp.split(params["mha_in_w"], 3, axis=0)
    bq_in, bk_in, bv_in = jnp.split(params["mha_in_b"], 3, axis=0)

    def fold(lin_w, lin_b, in_w, in_b):
        return lin_w.T @ in_w.T, lin_b @ in_w.T + in_b

    Wq_c, bq_c = fold(params["query_w"], params["query_b"], Wq_in, bq_in)
    Wk_c, bk_c = fold(params["key_w"],   params["key_b"],   Wk_in, bk_in)
    Wv_c, bv_c = fold(params["value_w"], params["value_b"], Wv_in, bv_in)
    W_qkv = jnp.concatenate([Wq_c, Wk_c, Wv_c], axis=1)          # (D, 3D)
    b_qkv = jnp.concatenate([bq_c, bk_c, bv_c], axis=0)          # (3D,)

    # red_i followed by logits_difference_mlp (split by block of its input)
    W_ldm_t = params["ldm_w"].T                                   # (3*LDI_RED, LDI_RED)
    w_rl, b_rl = [], params["ldm_b"]
    for i in range(3):
        blk = W_ldm_t[i * LDI_RED:(i + 1) * LDI_RED, :]           # (LDI_RED, LDI_RED)
        w_rl.append(params[f"red{i}_w"].T @ blk)                  # (D, LDI_RED)
        b_rl = b_rl + params[f"red{i}_b"] @ blk

    # classification head: split MLP_1 weight over the concat [ldi | pooled | father]
    W1 = params["mlp1_w"].T                                       # (LDI_RED+MAX_LEN+OUT, hidden)
    W1a = W1[:LDI_RED]
    W1b = W1[LDI_RED:LDI_RED + MAX_LEN]
    W1c = W1[LDI_RED + MAX_LEN:]

    # ---- assemble the single fused kernel call --------------------------------------------
    inputs = [
        # GNN node features + adjacency masks
        gnn_feats["entities"], gnn_feats["message"], gnn_feats["father"],
        adjs["belong"], adjs["co_occurrence"], adjs["refer"],
        # GAT params (layer-0 belong / co_occurrence / refer, layer-1 refer)
        *_gat_args(params, 0, "belong"),
        *_gat_args(params, 0, "co_occurrence"),
        *_gat_args(params, 0, "refer"),
        *_gat_args(params, 1, "refer"),
        # pooler
        bert_cls, params["pooler_w"].T, params["pooler_b"].reshape(1, -1),
        # logits-difference branch
        ldi.reshape(B * L, D), W_qkv, b_qkv.reshape(1, -1),
        params["mha_out_w"].T, params["mha_out_b"].reshape(1, -1),
        w_rl[0], w_rl[1], w_rl[2], b_rl.reshape(1, -1),
        # head
        W1a, W1b, W1c, params["mlp1_b"].reshape(1, -1),
        params["mlp2_w"].T, params["mlp2_b"].reshape(1, -1),
    ]

    kern = functools.partial(_fused_kernel, num_heads=ATTN_HEADS, batch=B, seq=L)
    logits, father, pooled = pl.pallas_call(
        kern,
        out_shape=(jax.ShapeDtypeStruct((B, NUM_LABELS), jnp.float32),
                   jax.ShapeDtypeStruct((N_FATHER, HEADS_SECOND * OUT_CHANNELS), jnp.float32),
                   jax.ShapeDtypeStruct((B, MAX_LEN), jnp.float32)),
        in_specs=[_full_spec(a.shape) for a in inputs],
        out_specs=(_full_spec((B, NUM_LABELS)),
                   _full_spec((N_FATHER, HEADS_SECOND * OUT_CHANNELS)),
                   _full_spec((B, MAX_LEN))),
    )(*inputs)
    return {"logits": logits, "gnn": father, "lm": pooled}


# ---------------------------------------------------------------------------
if __name__ == "__main__":
    key = jax.random.PRNGKey(0)
    k_param, k_bert, k_ldi, k_ent, k_msg, k_adj = jax.random.split(key, 6)
    params = init_params(k_param)

    # TODO(synk): the XLNet backbone (hfl/chinese-xlnet-base) and the pkuseg segmentation +
    #             word-embedding lookup have no Pallas equivalent; their outputs are modelled
    #             as synthetic inputs (bert_cls and the GNN node features below).
    bert_cls = jax.random.normal(k_bert, (BATCH, MAX_LEN), jnp.float32)       # XLNet [CLS] state
    ldi = jax.random.normal(k_ldi, (BATCH, LDI_SEQ, LDI_DIM), jnp.float32)    # logits_difference_input
    gnn_feats = {
        "entities": jax.random.normal(k_ent, (N_ENT, GNN_IN_DIM), jnp.float32),
        "message":  jax.random.normal(k_msg, (N_MSG, GNN_IN_DIM), jnp.float32),
        "father":   jnp.zeros((N_FATHER, GNN_IN_DIM), jnp.float32),           # zeros, as in the module
    }
    ks = jax.random.split(k_adj, 4)
    adjs = {
        "has":           (jax.random.uniform(ks[0], (N_MSG, N_ENT)) < 0.6).astype(jnp.float32),
        "belong":        (jax.random.uniform(ks[1], (N_ENT, N_MSG)) < 0.6).astype(jnp.float32),
        "co_occurrence": (jax.random.uniform(ks[2], (N_ENT, N_ENT)) < 0.6).astype(jnp.float32),
        "refer":         (jax.random.uniform(ks[3], (N_FATHER, N_ENT)) < 0.6).astype(jnp.float32),
    }
    # ensure every destination node has at least one incoming edge
    adjs = {r: a.at[:, 0].set(1.0) for r, a in adjs.items()}

    fwd = jax.jit(forward)
    out = fwd(params, bert_cls, ldi, gnn_feats, adjs)
    out = jax.tree_util.tree_map(jax.block_until_ready, out)

    assert out["logits"].shape == (BATCH, NUM_LABELS)
    assert out["gnn"].shape == (BATCH, OUT_CHANNELS)
    assert out["lm"].shape == (BATCH, MAX_LEN)
    assert bool(jnp.isfinite(out["logits"]).all())
    assert bool(jnp.isfinite(out["gnn"]).all())
    assert bool(jnp.isfinite(out["lm"]).all())
    print("KERNEL_OK")
</pallas_src>

<mosaic_0001>
module attributes {stable_mosaic.version = 11 : i64} {
  func.func @_fused_kernel(%arg0: memref<6x16xf32, #tpu.memory_space<vmem>>, %arg1: memref<5x16xf32, #tpu.memory_space<vmem>>, %arg2: memref<2x16xf32, #tpu.memory_space<vmem>>, %arg3: memref<6x5xf32, #tpu.memory_space<vmem>>, %arg4: memref<6x6xf32, #tpu.memory_space<vmem>>, %arg5: memref<2x6xf32, #tpu.memory_space<vmem>>, %arg6: memref<16x128xf32, #tpu.memory_space<vmem>>, %arg7: memref<4x32xf32, #tpu.memory_space<vmem>>, %arg8: memref<4x32xf32, #tpu.memory_space<vmem>>, %arg9: memref<1x128xf32, #tpu.memory_space<vmem>>, %arg10: memref<16x128xf32, #tpu.memory_space<vmem>>, %arg11: memref<4x32xf32, #tpu.memory_space<vmem>>, %arg12: memref<4x32xf32, #tpu.memory_space<vmem>>, %arg13: memref<1x128xf32, #tpu.memory_space<vmem>>, %arg14: memref<16x128xf32, #tpu.memory_space<vmem>>, %arg15: memref<4x32xf32, #tpu.memory_space<vmem>>, %arg16: memref<4x32xf32, #tpu.memory_space<vmem>>, %arg17: memref<1x128xf32, #tpu.memory_space<vmem>>, %arg18: memref<128x32xf32, #tpu.memory_space<vmem>>, %arg19: memref<1x32xf32, #tpu.memory_space<vmem>>, %arg20: memref<1x32xf32, #tpu.memory_space<vmem>>, %arg21: memref<1x32xf32, #tpu.memory_space<vmem>>, %arg22: memref<2x32xf32, #tpu.memory_space<vmem>>, %arg23: memref<32x32xf32, #tpu.memory_space<vmem>>, %arg24: memref<1x32xf32, #tpu.memory_space<vmem>>, %arg25: memref<8x64xf32, #tpu.memory_space<vmem>>, %arg26: memref<64x192xf32, #tpu.memory_space<vmem>>, %arg27: memref<1x192xf32, #tpu.memory_space<vmem>>, %arg28: memref<64x64xf32, #tpu.memory_space<vmem>>, %arg29: memref<1x64xf32, #tpu.memory_space<vmem>>, %arg30: memref<64x8xf32, #tpu.memory_space<vmem>>, %arg31: memref<64x8xf32, #tpu.memory_space<vmem>>, %arg32: memref<64x8xf32, #tpu.memory_space<vmem>>, %arg33: memref<1x8xf32, #tpu.memory_space<vmem>>, %arg34: memref<8x36xf32, #tpu.memory_space<vmem>>, %arg35: memref<32x36xf32, #tpu.memory_space<vmem>>, %arg36: memref<32x36xf32, #tpu.memory_space<vmem>>, %arg37: memref<1x36xf32, #tpu.memory_space<vmem>>, %arg38: memref<36x2xf32, #tpu.memory_space<vmem>>, %arg39: memref<1x2xf32, #tpu.memory_space<vmem>>, %arg40: memref<2x2xf32, #tpu.memory_space<vmem>>, %arg41: memref<2x32xf32, #tpu.memory_space<vmem>>, %arg42: memref<2x32xf32, #tpu.memory_space<vmem>>) attributes {dimension_semantics = [], scalar_prefetch = 0 : i64, scratch_operands = 0 : i64, tpu.core_type = #tpu.core_type<tc>} {
    %c0 = arith.constant 0 : index
    %c0_0 = arith.constant 0 : index
    %0 = vector.load %arg0[%c0, %c0_0] : memref<6x16xf32, #tpu.memory_space<vmem>>, vector<6x16xf32>
    %c0_1 = arith.constant 0 : index
    %c0_2 = arith.constant 0 : index
    %1 = vector.load %arg1[%c0_1, %c0_2] : memref<5x16xf32, #tpu.memory_space<vmem>>, vector<5x16xf32>
    %c0_3 = arith.constant 0 : index
    %c0_4 = arith.constant 0 : index
    %2 = vector.load %arg2[%c0_3, %c0_4] : memref<2x16xf32, #tpu.memory_space<vmem>>, vector<2x16xf32>
    %c0_5 = arith.constant 0 : index
    %c0_6 = arith.constant 0 : index
    %3 = vector.load %arg6[%c0_5, %c0_6] : memref<16x128xf32, #tpu.memory_space<vmem>>, vector<16x128xf32>
    %c0_7 = arith.constant 0 : index
    %c0_8 = arith.constant 0 : index
    %4 = vector.load %arg7[%c0_7, %c0_8] : memref<4x32xf32, #tpu.memory_space<vmem>>, vector<4x32xf32>
    %c0_9 = arith.constant 0 : index
    %c0_10 = arith.constant 0 : index
    %5 = vector.load %arg8[%c0_9, %c0_10] : memref<4x32xf32, #tpu.memory_space<vmem>>, vector<4x32xf32>
    %c0_11 = arith.constant 0 : index
    %c0_12 = arith.constant 0 : index
    %6 = vector.load %arg9[%c0_11, %c0_12] : memref<1x128xf32, #tpu.memory_space<vmem>>, vector<1x128xf32>
    %c0_13 = arith.constant 0 : index
    %c0_14 = arith.constant 0 : index
    %7 = vector.load %arg3[%c0_13, %c0_14] : memref<6x5xf32, #tpu.memory_space<vmem>>, vector<6x5xf32>
    %8 = tpu.concatenate %1, %0 in 0 : vector<5x16xf32>, vector<6x16xf32> -> vector<11x16xf32>
    %cst = arith.constant dense<0.000000e+00> : vector<11x128xf32>
    %9 = tpu.matmul %8, %3, %cst {dimension_numbers = #tpu.dot_dimension_numbers<[1], [0], [0], [1], [0, 0, 1, 1], [], []>} : vector<11x16xf32>, vector<16x128xf32>, vector<11x128xf32> -> vector<11x128xf32>
    %10 = vector.extract_strided_slice %9 {offsets = [0, 0], sizes = [5, 128], strides = [1, 1]} : vector<11x128xf32> to vector<5x128xf32>
    %11 = vector.extract_strided_slice %9 {offsets = [5, 0], sizes = [6, 128], strides = [1, 1]} : vector<11x128xf32> to vector<6x128xf32>
    %cst_15 = arith.constant 0.000000e+00 : f32
    %12 = vector.broadcast %cst_15 : f32 to vector<6x5xf32>
    %13 = arith.cmpf ogt, %7, %12 : vector<6x5xf32>
    %14 = vector.extract_strided_slice %10 {offsets = [0, 0], sizes = [5, 32], strides = [1, 1]} : vector<5x128xf32> to vector<5x32xf32>
    %15 = vector.extract_strided_slice %11 {offsets = [0, 0], sizes = [6, 32], strides = [1, 1]} : vector<6x128xf32> to vector<6x32xf32>
    %16 = vector.extract_strided_slice %4 {offsets = [0, 0], sizes = [1, 32], strides = [1, 1]} : vector<4x32xf32> to vector<1x32xf32>
    %17 = vector.broadcast %16 : vector<1x32xf32> to vector<5x32xf32>
    %18 = arith.mulf %14, %17 : vector<5x32xf32>
    %cst_16 = arith.constant dense<0.000000e+00> : vector<5xf32>
    %19 = vector.multi_reduction <add>, %18, %cst_16 [1] : vector<5x32xf32> to vector<5xf32>
    %20 = vector.extract_strided_slice %5 {offsets = [0, 0], sizes = [1, 32], strides = [1, 1]} : vector<4x32xf32> to vector<1x32xf32>
    %21 = vector.broadcast %20 : vector<1x32xf32> to vector<6x32xf32>
    %22 = arith.mulf %15, %21 : vector<6x32xf32>
    %cst_17 = arith.constant dense<0.000000e+00> : vector<6xf32>
    %23 = vector.multi_reduction <add>, %22, %cst_17 [1] : vector<6x32xf32> to vector<6xf32>
    %24 = vector.shape_cast %23 : vector<6xf32> to vector<6x1xf32>
    %25 = vector.shape_cast %19 : vector<5xf32> to vector<1x5xf32>
    %26 = vector.broadcast %24 : vector<6x1xf32> to vector<6x5xf32>
    %27 = vector.broadcast %25 : vector<1x5xf32> to vector<6x5xf32>
    %28 = arith.addf %26, %27 : vector<6x5xf32>
    %cst_18 = arith.constant 0.000000e+00 : f32
    %29 = vector.broadcast %cst_18 : f32 to vector<6x5xf32>
    %30 = arith.cmpf ogt, %28, %29 : vector<6x5xf32>
    %cst_19 = arith.constant 2.000000e-01 : f32
    %31 = vector.broadcast %cst_19 : f32 to vector<6x5xf32>
    %32 = arith.mulf %31, %28 : vector<6x5xf32>
    %33 = arith.select %30, %28, %32 : vector<6x5xi1>, vector<6x5xf32>
    %cst_20 = arith.constant -1.000000e+30 : f32
    %34 = vector.broadcast %cst_20 : f32 to vector<6x5xf32>
    %35 = arith.select %13, %33, %34 : vector<6x5xi1>, vector<6x5xf32>
    %cst_21 = arith.constant dense<0xFF800000> : vector<6xf32>
    %36 = vector.multi_reduction <maximumf>, %35, %cst_21 [1] : vector<6x5xf32> to vector<6xf32>
    %37 = vector.shape_cast %36 : vector<6xf32> to vector<6x1xf32>
    %38 = vector.broadcast %37 : vector<6x1xf32> to vector<6x5xf32>
    %39 = arith.subf %35, %38 : vector<6x5xf32>
    %40 = math.exp %39 : vector<6x5xf32>
    %cst_22 = arith.constant 0.000000e+00 : f32
    %41 = vector.broadcast %cst_22 : f32 to vector<6x5xf32>
    %42 = arith.select %13, %40, %41 : vector<6x5xi1>, vector<6x5xf32>
    %cst_23 = arith.constant dense<0.000000e+00> : vector<6xf32>
    %43 = vector.multi_reduction <add>, %42, %cst_23 [1] : vector<6x5xf32> to vector<6xf32>
    %44 = vector.shape_cast %43 : vector<6xf32> to vector<6x1xf32>
    %cst_24 = arith.constant 1.000000e-16 : f32
    %45 = vector.broadcast %cst_24 : f32 to vector<6x1xf32>
    %46 = arith.maximumf %44, %45 : vector<6x1xf32>
    %47 = tpu.reciprocal %46 {approx = true} : vector<6x1xf32> -> vector<6x1xf32>
    %48 = vector.broadcast %47 : vector<6x1xf32> to vector<6x5xf32>
    %49 = arith.mulf %42, %48 : vector<6x5xf32>
    %cst_25 = arith.constant dense<0.000000e+00> : vector<6x32xf32>
    %50 = tpu.matmul %49, %14, %cst_25 {dimension_numbers = #tpu.dot_dimension_numbers<[1], [0], [0], [1], [0, 0, 1, 1], [], []>} : vector<6x5xf32>, vector<5x32xf32>, vector<6x32xf32> -> vector<6x32xf32>
    %51 = vector.extract_strided_slice %10 {offsets = [0, 32], sizes = [5, 32], strides = [1, 1]} : vector<5x128xf32> to vector<5x32xf32>
    %52 = vector.extract_strided_slice %11 {offsets = [0, 32], sizes = [6, 32], strides = [1, 1]} : vector<6x128xf32> to vector<6x32xf32>
    %53 = vector.extract_strided_slice %4 {offsets = [1, 0], sizes = [1, 32], strides = [1, 1]} : vector<4x32xf32> to vector<1x32xf32>
    %54 = vector.broadcast %53 : vector<1x32xf32> to vector<5x32xf32>
    %55 = arith.mulf %51, %54 : vector<5x32xf32>
    %cst_26 = arith.constant dense<0.000000e+00> : vector<5xf32>
    %56 = vector.multi_reduction <add>, %55, %cst_26 [1] : vector<5x32xf32> to vector<5xf32>
    %57 = vector.extract_strided_slice %5 {offsets = [1, 0], sizes = [1, 32], strides = [1, 1]} : vector<4x32xf32> to vector<1x32xf32>
    %58 = vector.broadcast %57 : vector<1x32xf32> to vector<6x32xf32>
    %59 = arith.mulf %52, %58 : vector<6x32xf32>
    %cst_27 = arith.constant dense<0.000000e+00> : vector<6xf32>
    %60 = vector.multi_reduction <add>, %59, %cst_27 [1] : vector<6x32xf32> to vector<6xf32>
    %61 = vector.shape_cast %60 : vector<6xf32> to vector<6x1xf32>
    %62 = vector.shape_cast %56 : vector<5xf32> to vector<1x5xf32>
    %63 = vector.broadcast %61 : vector<6x1xf32> to vector<6x5xf32>
    %64 = vector.broadcast %62 : vector<1x5xf32> to vector<6x5xf32>
    %65 = arith.addf %63, %64 : vector<6x5xf32>
    %cst_28 = arith.constant 0.000000e+00 : f32
    %66 = vector.broadcast %cst_28 : f32 to vector<6x5xf32>
    %67 = arith.cmpf ogt, %65, %66 : vector<6x5xf32>
    %cst_29 = arith.constant 2.000000e-01 : f32
    %68 = vector.broadcast %cst_29 : f32 to vector<6x5xf32>
    %69 = arith.mulf %68, %65 : vector<6x5xf32>
    %70 = arith.select %67, %65, %69 : vector<6x5xi1>, vector<6x5xf32>
    %cst_30 = arith.constant -1.000000e+30 : f32
    %71 = vector.broadcast %cst_30 : f32 to vector<6x5xf32>
    %72 = arith.select %13, %70, %71 : vector<6x5xi1>, vector<6x5xf32>
    %cst_31 = arith.constant dense<0xFF800000> : vector<6xf32>
    %73 = vector.multi_reduction <maximumf>, %72, %cst_31 [1] : vector<6x5xf32> to vector<6xf32>
    %74 = vector.shape_cast %73 : vector<6xf32> to vector<6x1xf32>
    %75 = vector.broadcast %74 : vector<6x1xf32> to vector<6x5xf32>
    %76 = arith.subf %72, %75 : vector<6x5xf32>
    %77 = math.exp %76 : vector<6x5xf32>
    %cst_32 = arith.constant 0.000000e+00 : f32
    %78 = vector.broadcast %cst_32 : f32 to vector<6x5xf32>
    %79 = arith.select %13, %77, %78 : vector<6x5xi1>, vector<6x5xf32>
    %cst_33 = arith.constant dense<0.000000e+00> : vector<6xf32>
    %80 = vector.multi_reduction <add>, %79, %cst_33 [1] : vector<6x5xf32> to vector<6xf32>
    %81 = vector.shape_cast %80 : vector<6xf32> to vector<6x1xf32>
    %cst_34 = arith.constant 1.000000e-16 : f32
    %82 = vector.broadcast %cst_34 : f32 to vector<6x1xf32>
    %83 = arith.maximumf %81, %82 : vector<6x1xf32>
    %84 = tpu.reciprocal %83 {approx = true} : vector<6x1xf32> -> vector<6x1xf32>
    %85 = vector.broadcast %84 : vector<6x1xf32> to vector<6x5xf32>
    %86 = arith.mulf %79, %85 : vector<6x5xf32>
    %cst_35 = arith.constant dense<0.000000e+00> : vector<6x32xf32>
    %87 = tpu.matmul %86, %51, %cst_35 {dimension_numbers = #tpu.dot_dimension_numbers<[1], [0], [0], [1], [0, 0, 1, 1], [], []>} : vector<6x5xf32>, vector<5x32xf32>, vector<6x32xf32> -> vector<6x32xf32>
    %88 = vector.extract_strided_slice %10 {offsets = [0, 64], sizes = [5, 32], strides = [1, 1]} : vector<5x128xf32> to vector<5x32xf32>
    %89 = vector.extract_strided_slice %11 {offsets = [0, 64], sizes = [6, 32], strides = [1, 1]} : vector<6x128xf32> to vector<6x32xf32>
    %90 = vector.extract_strided_slice %4 {offsets = [2, 0], sizes = [1, 32], strides = [1, 1]} : vector<4x32xf32> to vector<1x32xf32>
    %91 = vector.broadcast %90 : vector<1x32xf32> to vector<5x32xf32>
    %92 = arith.mulf %88, %91 : vector<5x32xf32>
    %cst_36 = arith.constant dense<0.000000e+00> : vector<5xf32>
    %93 = vector.multi_reduction <add>, %92, %cst_36 [1] : vector<5x32xf32> to vector<5xf32>
    %94 = vector.extract_strided_slice %5 {offsets = [2, 0], sizes = [1, 32], strides = [1, 1]} : vector<4x32xf32> to vector<1x32xf32>
    %95 = vector.broadcast %94 : vector<1x32xf32> to vector<6x32xf32>
    %96 = arith.mulf %89, %95 : vector<6x32xf32>
    %cst_37 = arith.constant dense<0.000000e+00> : vector<6xf32>
    %97 = vector.multi_reduction <add>, %96, %cst_37 [1] : vector<6x32xf32> to vector<6xf32>
    %98 = vector.shape_cast %97 : vector<6xf32> to vector<6x1xf32>
    %99 = vector.shape_cast %93 : vector<5xf32> to vector<1x5xf32>
    %100 = vector.broadcast %98 : vector<6x1xf32> to vector<6x5xf32>
    %101 = vector.broadcast %99 : vector<1x5xf32> to vector<6x5xf32>
    %102 = arith.addf %100, %101 : vector<6x5xf32>
    %cst_38 = arith.constant 0.000000e+00 : f32
    %103 = vector.broadcast %cst_38 : f32 to vector<6x5xf32>
    %104 = arith.cmpf ogt, %102, %103 : vector<6x5xf32>
    %cst_39 = arith.constant 2.000000e-01 : f32
    %105 = vector.broadcast %cst_39 : f32 to vector<6x5xf32>
    %106 = arith.mulf %105, %102 : vector<6x5xf32>
    %107 = arith.select %104, %102, %106 : vector<6x5xi1>, vector<6x5xf32>
    %cst_40 = arith.constant -1.000000e+30 : f32
    %108 = vector.broadcast %cst_40 : f32 to vector<6x5xf32>
    %109 = arith.select %13, %107, %108 : vector<6x5xi1>, vector<6x5xf32>
    %cst_41 = arith.constant dense<0xFF800000> : vector<6xf32>
    %110 = vector.multi_reduction <maximumf>, %109, %cst_41 [1] : vector<6x5xf32> to vector<6xf32>
    %111 = vector.shape_cast %110 : vector<6xf32> to vector<6x1xf32>
    %112 = vector.broadcast %111 : vector<6x1xf32> to vector<6x5xf32>
    %113 = arith.subf %109, %112 : vector<6x5xf32>
    %114 = math.exp %113 : vector<6x5xf32>
    %cst_42 = arith.constant 0.000000e+00 : f32
    %115 = vector.broadcast %cst_42 : f32 to vector<6x5xf32>
    %116 = arith.select %13, %114, %115 : vector<6x5xi1>, vector<6x5xf32>
    %cst_43 = arith.constant dense<0.000000e+00> : vector<6xf32>
    %117 = vector.multi_reduction <add>, %116, %cst_43 [1] : vector<6x5xf32> to vector<6xf32>
    %118 = vector.shape_cast %117 : vector<6xf32> to vector<6x1xf32>
    %cst_44 = arith.constant 1.000000e-16 : f32
    %119 = vector.broadcast %cst_44 : f32 to vector<6x1xf32>
    %120 = arith.maximumf %118, %119 : vector<6x1xf32>
    %121 = tpu.reciprocal %120 {approx = true} : vector<6x1xf32> -> vector<6x1xf32>
    %122 = vector.broadcast %121 : vector<6x1xf32> to vector<6x5xf32>
    %123 = arith.mulf %116, %122 : vector<6x5xf32>
    %cst_45 = arith.constant dense<0.000000e+00> : vector<6x32xf32>
    %124 = tpu.matmul %123, %88, %cst_45 {dimension_numbers = #tpu.dot_dimension_numbers<[1], [0], [0], [1], [0, 0, 1, 1], [], []>} : vector<6x5xf32>, vector<5x32xf32>, vector<6x32xf32> -> vector<6x32xf32>
    %125 = vector.extract_strided_slice %10 {offsets = [0, 96], sizes = [5, 32], strides = [1, 1]} : vector<5x128xf32> to vector<5x32xf32>
    %126 = vector.extract_strided_slice %11 {offsets = [0, 96], sizes = [6, 32], strides = [1, 1]} : vector<6x128xf32> to vector<6x32xf32>
    %127 = vector.extract_strided_slice %4 {offsets = [3, 0], sizes = [1, 32], strides = [1, 1]} : vector<4x32xf32> to vector<1x32xf32>
    %128 = vector.broadcast %127 : vector<1x32xf32> to vector<5x32xf32>
    %129 = arith.mulf %125, %128 : vector<5x32xf32>
    %cst_46 = arith.constant dense<0.000000e+00> : vector<5xf32>
    %130 = vector.multi_reduction <add>, %129, %cst_46 [1] : vector<5x32xf32> to vector<5xf32>
    %131 = vector.extract_strided_slice %5 {offsets = [3, 0], sizes = [1, 32], strides = [1, 1]} : vector<4x32xf32> to vector<1x32xf32>
    %132 = vector.broadcast %131 : vector<1x32xf32> to vector<6x32xf32>
    %133 = arith.mulf %126, %132 : vector<6x32xf32>
    %cst_47 = arith.constant dense<0.000000e+00> : vector<6xf32>
    %134 = vector.multi_reduction <add>, %133, %cst_47 [1] : vector<6x32xf32> to vector<6xf32>
    %135 = vector.shape_cast %134 : vector<6xf32> to vector<6x1xf32>
    %136 = vector.shape_cast %130 : vector<5xf32> to vector<1x5xf32>
    %137 = vector.broadcast %135 : vector<6x1xf32> to vector<6x5xf32>
    %138 = vector.broadcast %136 : vector<1x5xf32> to vector<6x5xf32>
    %139 = arith.addf %137, %138 : vector<6x5xf32>
    %cst_48 = arith.constant 0.000000e+00 : f32
    %140 = vector.broadcast %cst_48 : f32 to vector<6x5xf32>
    %141 = arith.cmpf ogt, %139, %140 : vector<6x5xf32>
    %cst_49 = arith.constant 2.000000e-01 : f32
    %142 = vector.broadcast %cst_49 : f32 to vector<6x5xf32>
    %143 = arith.mulf %142, %139 : vector<6x5xf32>
    %144 = arith.select %141, %139, %143 : vector<6x5xi1>, vector<6x5xf32>
    %cst_50 = arith.constant -1.000000e+30 : f32
    %145 = vector.broadcast %cst_50 : f32 to vector<6x5xf32>
    %146 = arith.select %13, %144, %145 : vector<6x5xi1>, vector<6x5xf32>
    %cst_51 = arith.constant dense<0xFF800000> : vector<6xf32>
    %147 = vector.multi_reduction <maximumf>, %146, %cst_51 [1] : vector<6x5xf32> to vector<6xf32>
    %148 = vector.shape_cast %147 : vector<6xf32> to vector<6x1xf32>
    %149 = vector.broadcast %148 : vector<6x1xf32> to vector<6x5xf32>
    %150 = arith.subf %146, %149 : vector<6x5xf32>
    %151 = math.exp %150 : vector<6x5xf32>
    %cst_52 = arith.constant 0.000000e+00 : f32
    %152 = vector.broadcast %cst_52 : f32 to vector<6x5xf32>
    %153 = arith.select %13, %151, %152 : vector<6x5xi1>, vector<6x5xf32>
    %cst_53 = arith.constant dense<0.000000e+00> : vector<6xf32>
    %154 = vector.multi_reduction <add>, %153, %cst_53 [1] : vector<6x5xf32> to vector<6xf32>
    %155 = vector.shape_cast %154 : vector<6xf32> to vector<6x1xf32>
    %cst_54 = arith.constant 1.000000e-16 : f32
    %156 = vector.broadcast %cst_54 : f32 to vector<6x1xf32>
    %157 = arith.maximumf %155, %156 : vector<6x1xf32>
    %158 = tpu.reciprocal %157 {approx = true} : vector<6x1xf32> -> vector<6x1xf32>
    %159 = vector.broadcast %158 : vector<6x1xf32> to vector<6x5xf32>
    %160 = arith.mulf %153, %159 : vector<6x5xf32>
    %cst_55 = arith.constant dense<0.000000e+00> : vector<6x32xf32>
    %161 = tpu.matmul %160, %125, %cst_55 {dimension_numbers = #tpu.dot_dimension_numbers<[1], [0], [0], [1], [0, 0, 1, 1], [], []>} : vector<6x5xf32>, vector<5x32xf32>, vector<6x32xf32> -> vector<6x32xf32>
    %162 = tpu.concatenate %50, %87, %124, %161 in 1 : vector<6x32xf32>, vector<6x32xf32>, vector<6x32xf32>, vector<6x32xf32> -> vector<6x128xf32>
    %163 = vector.broadcast %6 : vector<1x128xf32> to vector<6x128xf32>
    %164 = arith.addf %162, %163 : vector<6x128xf32>
    %c0_56 = arith.constant 0 : index
    %c0_57 = arith.constant 0 : index
    %165 = vector.load %arg10[%c0_56, %c0_57] : memref<16x128xf32, #tpu.memory_space<vmem>>, vector<16x128xf32>
    %c0_58 = arith.constant 0 : index
    %c0_59 = arith.constant 0 : index
    %166 = vector.load %arg11[%c0_58, %c0_59] : memref<4x32xf32, #tpu.memory_space<vmem>>, vector<4x32xf32>
    %c0_60 = arith.constant 0 : index
    %c0_61 = arith.constant 0 : index
    %167 = vector.load %arg12[%c0_60, %c0_61] : memref<4x32xf32, #tpu.memory_space<vmem>>, vector<4x32xf32>
    %c0_62 = arith.constant 0 : index
    %c0_63 = arith.constant 0 : index
    %168 = vector.load %arg13[%c0_62, %c0_63] : memref<1x128xf32, #tpu.memory_space<vmem>>, vector<1x128xf32>
    %c0_64 = arith.constant 0 : index
    %c0_65 = arith.constant 0 : index
    %169 = vector.load %arg4[%c0_64, %c0_65] : memref<6x6xf32, #tpu.memory_space<vmem>>, vector<6x6xf32>
    %170 = tpu.concatenate %0, %0 in 0 : vector<6x16xf32>, vector<6x16xf32> -> vector<12x16xf32>
    %cst_66 = arith.constant dense<0.000000e+00> : vector<12x128xf32>
    %171 = tpu.matmul %170, %165, %cst_66 {dimension_numbers = #tpu.dot_dimension_numbers<[1], [0], [0], [1], [0, 0, 1, 1], [], []>} : vector<12x16xf32>, vector<16x128xf32>, vector<12x128xf32> -> vector<12x128xf32>
    %172 = vector.extract_strided_slice %171 {offsets = [0, 0], sizes = [6, 128], strides = [1, 1]} : vector<12x128xf32> to vector<6x128xf32>
    %173 = vector.extract_strided_slice %171 {offsets = [6, 0], sizes = [6, 128], strides = [1, 1]} : vector<12x128xf32> to vector<6x128xf32>
    %cst_67 = arith.constant 0.000000e+00 : f32
    %174 = vector.broadcast %cst_67 : f32 to vector<6x6xf32>
    %175 = arith.cmpf ogt, %169, %174 : vector<6x6xf32>
    %176 = vector.extract_strided_slice %172 {offsets = [0, 0], sizes = [6, 32], strides = [1, 1]} : vector<6x128xf32> to vector<6x32xf32>
    %177 = vector.extract_strided_slice %173 {offsets = [0, 0], sizes = [6, 32], strides = [1, 1]} : vector<6x128xf32> to vector<6x32xf32>
    %178 = vector.extract_strided_slice %166 {offsets = [0, 0], sizes = [1, 32], strides = [1, 1]} : vector<4x32xf32> to vector<1x32xf32>
    %179 = vector.broadcast %178 : vector<1x32xf32> to vector<6x32xf32>
    %180 = arith.mulf %176, %179 : vector<6x32xf32>
    %cst_68 = arith.constant dense<0.000000e+00> : vector<6xf32>
    %181 = vector.multi_reduction <add>, %180, %cst_68 [1] : vector<6x32xf32> to vector<6xf32>
    %182 = vector.extract_strided_slice %167 {offsets = [0, 0], sizes = [1, 32], strides = [1, 1]} : vector<4x32xf32> to vector<1x32xf32>
    %183 = vector.broadcast %182 : vector<1x32xf32> to vector<6x32xf32>
    %184 = arith.mulf %177, %183 : vector<6x32xf32>
    %cst_69 = arith.constant dense<0.000000e+00> : vector<6xf32>
    %185 = vector.multi_reduction <add>, %184, %cst_69 [1] : vector<6x32xf32> to vector<6xf32>
    %186 = vector.shape_cast %185 : vector<6xf32> to vector<6x1xf32>
    %187 = vector.shape_cast %181 : vector<6xf32> to vector<1x6xf32>
    %188 = vector.broadcast %186 : vector<6x1xf32> to vector<6x6xf32>
    %189 = vector.broadcast %187 : vector<1x6xf32> to vector<6x6xf32>
    %190 = arith.addf %188, %189 : vector<6x6xf32>
    %cst_70 = arith.constant 0.000000e+00 : f32
    %191 = vector.broadcast %cst_70 : f32 to vector<6x6xf32>
    %192 = arith.cmpf ogt, %190, %191 : vector<6x6xf32>
    %cst_71 = arith.constant 2.000000e-01 : f32
    %193 = vector.broadcast %cst_71 : f32 to vector<6x6xf32>
    %194 = arith.mulf %193, %190 : vector<6x6xf32>
    %195 = arith.select %192, %190, %194 : vector<6x6xi1>, vector<6x6xf32>
    %cst_72 = arith.constant -1.000000e+30 : f32
    %196 = vector.broadcast %cst_72 : f32 to vector<6x6xf32>
    %197 = arith.select %175, %195, %196 : vector<6x6xi1>, vector<6x6xf32>
    %cst_73 = arith.constant dense<0xFF800000> : vector<6xf32>
    %198 = vector.multi_reduction <maximumf>, %197, %cst_73 [1] : vector<6x6xf32> to vector<6xf32>
    %199 = vector.shape_cast %198 : vector<6xf32> to vector<6x1xf32>
    %200 = vector.broadcast %199 : vector<6x1xf32> to vector<6x6xf32>
    %201 = arith.subf %197, %200 : vector<6x6xf32>
    %202 = math.exp %201 : vector<6x6xf32>
    %cst_74 = arith.constant 0.000000e+00 : f32
    %203 = vector.broadcast %cst_74 : f32 to vector<6x6xf32>
    %204 = arith.select %175, %202, %203 : vector<6x6xi1>, vector<6x6xf32>
    %cst_75 = arith.constant dense<0.000000e+00> : vector<6xf32>
    %205 = vector.multi_reduction <add>, %204, %cst_75 [1] : vector<6x6xf32> to vector<6xf32>
    %206 = vector.shape_cast %205 : vector<6xf32> to vector<6x1xf32>
    %cst_76 = arith.constant 1.000000e-16 : f32
    %207 = vector.broadcast %cst_76 : f32 to vector<6x1xf32>
    %208 = arith.maximumf %206, %207 : vector<6x1xf32>
    %209 = tpu.reciprocal %208 {approx = true} : vector<6x1xf32> -> vector<6x1xf32>
    %210 = vector.broadcast %209 : vector<6x1xf32> to vector<6x6xf32>
    %211 = arith.mulf %204, %210 : vector<6x6xf32>
    %cst_77 = arith.constant dense<0.000000e+00> : vector<6x32xf32>
    %212 = tpu.matmul %211, %176, %cst_77 {dimension_numbers = #tpu.dot_dimension_numbers<[1], [0], [0], [1], [0, 0, 1, 1], [], []>} : vector<6x6xf32>, vector<6x32xf32>, vector<6x32xf32> -> vector<6x32xf32>
    %213 = vector.extract_strided_slice %172 {offsets = [0, 32], sizes = [6, 32], strides = [1, 1]} : vector<6x128xf32> to vector<6x32xf32>
    %214 = vector.extract_strided_slice %173 {offsets = [0, 32], sizes = [6, 32], strides = [1, 1]} : vector<6x128xf32> to vector<6x32xf32>
    %215 = vector.extract_strided_slice %166 {offsets = [1, 0], sizes = [1, 32], strides = [1, 1]} : vector<4x32xf32> to vector<1x32xf32>
    %216 = vector.broadcast %215 : vector<1x32xf32> to vector<6x32xf32>
    %217 = arith.mulf %213, %216 : vector<6x32xf32>
    %cst_78 = arith.constant dense<0.000000e+00> : vector<6xf32>
    %218 = vector.multi_reduction <add>, %217, %cst_78 [1] : vector<6x32xf32> to vector<6xf32>
    %219 = vector.extract_strided_slice %167 {offsets = [1, 0], sizes = [1, 32], strides = [1, 1]} : vector<4x32xf32> to vector<1x32xf32>
    %220 = vector.broadcast %219 : vector<1x32xf32> to vector<6x32xf32>
    %221 = arith.mulf %214, %220 : vector<6x32xf32>
    %cst_79 = arith.constant dense<0.000000e+00> : vector<6xf32>
    %222 = vector.multi_reduction <add>, %221, %cst_79 [1] : vector<6x32xf32> to vector<6xf32>
    %223 = vector.shape_cast %222 : vector<6xf32> to vector<6x1xf32>
    %224 = vector.shape_cast %218 : vector<6xf32> to vector<1x6xf32>
    %225 = vector.broadcast %223 : vector<6x1xf32> to vector<6x6xf32>
    %226 = vector.broadcast %224 : vector<1x6xf32> to vector<6x6xf32>
    %227 = arith.addf %225, %226 : vector<6x6xf32>
    %cst_80 = arith.constant 0.000000e+00 : f32
    %228 = vector.broadcast %cst_80 : f32 to vector<6x6xf32>
    %229 = arith.cmpf ogt, %227, %228 : vector<6x6xf32>
    %cst_81 = arith.constant 2.000000e-01 : f32
    %230 = vector.broadcast %cst_81 : f32 to vector<6x6xf32>
    %231 = arith.mulf %230, %227 : vector<6x6xf32>
    %232 = arith.select %229, %227, %231 : vector<6x6xi1>, vector<6x6xf32>
    %cst_82 = arith.constant -1.000000e+30 : f32
    %233 = vector.broadcast %cst_82 : f32 to vector<6x6xf32>
    %234 = arith.select %175, %232, %233 : vector<6x6xi1>, vector<6x6xf32>
    %cst_83 = arith.constant dense<0xFF800000> : vector<6xf32>
    %235 = vector.multi_reduction <maximumf>, %234, %cst_83 [1] : vector<6x6xf32> to vector<6xf32>
    %236 = vector.shape_cast %235 : vector<6xf32> to vector<6x1xf32>
    %237 = vector.broadcast %236 : vector<6x1xf32> to vector<6x6xf32>
    %238 = arith.subf %234, %237 : vector<6x6xf32>
    %239 = math.exp %238 : vector<6x6xf32>
    %cst_84 = arith.constant 0.000000e+00 : f32
    %240 = vector.broadcast %cst_84 : f32 to vector<6x6xf32>
    %241 = arith.select %175, %239, %240 : vector<6x6xi1>, vector<6x6xf32>
    %cst_85 = arith.constant dense<0.000000e+00> : vector<6xf32>
    %242 = vector.multi_reduction <add>, %241, %cst_85 [1] : vector<6x6xf32> to vector<6xf32>
    %243 = vector.shape_cast %242 : vector<6xf32> to vector<6x1xf32>
    %cst_86 = arith.constant 1.000000e-16 : f32
    %244 = vector.broadcast %cst_86 : f32 to vector<6x1xf32>
    %245 = arith.maximumf %243, %244 : vector<6x1xf32>
    %246 = tpu.reciprocal %245 {approx = true} : vector<6x1xf32> -> vector<6x1xf32>
    %247 = vector.broadcast %246 : vector<6x1xf32> to vector<6x6xf32>
    %248 = arith.mulf %241, %247 : vector<6x6xf32>
    %cst_87 = arith.constant dense<0.000000e+00> : vector<6x32xf32>
    %249 = tpu.matmul %248, %213, %cst_87 {dimension_numbers = #tpu.dot_dimension_numbers<[1], [0], [0], [1], [0, 0, 1, 1], [], []>} : vector<6x6xf32>, vector<6x32xf32>, vector<6x32xf32> -> vector<6x32xf32>
    %250 = vector.extract_strided_slice %172 {offsets = [0, 64], sizes = [6, 32], strides = [1, 1]} : vector<6x128xf32> to vector<6x32xf32>
    %251 = vector.extract_strided_slice %173 {offsets = [0, 64], sizes = [6, 32], strides = [1, 1]} : vector<6x128xf32> to vector<6x32xf32>
    %252 = vector.extract_strided_slice %166 {offsets = [2, 0], sizes = [1, 32], strides = [1, 1]} : vector<4x32xf32> to vector<1x32xf32>
    %253 = vector.broadcast %252 : vector<1x32xf32> to vector<6x32xf32>
    %254 = arith.mulf %250, %253 : vector<6x32xf32>
    %cst_88 = arith.constant dense<0.000000e+00> : vector<6xf32>
    %255 = vector.multi_reduction <add>, %254, %cst_88 [1] : vector<6x32xf32> to vector<6xf32>
    %256 = vector.extract_strided_slice %167 {offsets = [2, 0], sizes = [1, 32], strides = [1, 1]} : vector<4x32xf32> to vector<1x32xf32>
    %257 = vector.broadcast %256 : vector<1x32xf32> to vector<6x32xf32>
    %258 = arith.mulf %251, %257 : vector<6x32xf32>
    %cst_89 = arith.constant dense<0.000000e+00> : vector<6xf32>
    %259 = vector.multi_reduction <add>, %258, %cst_89 [1] : vector<6x32xf32> to vector<6xf32>
    %260 = vector.shape_cast %259 : vector<6xf32> to vector<6x1xf32>
    %261 = vector.shape_cast %255 : vector<6xf32> to vector<1x6xf32>
    %262 = vector.broadcast %260 : vector<6x1xf32> to vector<6x6xf32>
    %263 = vector.broadcast %261 : vector<1x6xf32> to vector<6x6xf32>
    %264 = arith.addf %262, %263 : vector<6x6xf32>
    %cst_90 = arith.constant 0.000000e+00 : f32
    %265 = vector.broadcast %cst_90 : f32 to vector<6x6xf32>
    %266 = arith.cmpf ogt, %264, %265 : vector<6x6xf32>
    %cst_91 = arith.constant 2.000000e-01 : f32
    %267 = vector.broadcast %cst_91 : f32 to vector<6x6xf32>
    %268 = arith.mulf %267, %264 : vector<6x6xf32>
    %269 = arith.select %266, %264, %268 : vector<6x6xi1>, vector<6x6xf32>
    %cst_92 = arith.constant -1.000000e+30 : f32
    %270 = vector.broadcast %cst_92 : f32 to vector<6x6xf32>
    %271 = arith.select %175, %269, %270 : vector<6x6xi1>, vector<6x6xf32>
    %cst_93 = arith.constant dense<0xFF800000> : vector<6xf32>
    %272 = vector.multi_reduction <maximumf>, %271, %cst_93 [1] : vector<6x6xf32> to vector<6xf32>
    %273 = vector.shape_cast %272 : vector<6xf32> to vector<6x1xf32>
    %274 = vector.broadcast %273 : vector<6x1xf32> to vector<6x6xf32>
    %275 = arith.subf %271, %274 : vector<6x6xf32>
    %276 = math.exp %275 : vector<6x6xf32>
    %cst_94 = arith.constant 0.000000e+00 : f32
    %277 = vector.broadcast %cst_94 : f32 to vector<6x6xf32>
    %278 = arith.select %175, %276, %277 : vector<6x6xi1>, vector<6x6xf32>
    %cst_95 = arith.constant dense<0.000000e+00> : vector<6xf32>
    %279 = vector.multi_reduction <add>, %278, %cst_95 [1] : vector<6x6xf32> to vector<6xf32>
    %280 = vector.shape_cast %279 : vector<6xf32> to vector<6x1xf32>
    %cst_96 = arith.constant 1.000000e-16 : f32
    %281 = vector.broadcast %cst_96 : f32 to vector<6x1xf32>
    %282 = arith.maximumf %280, %281 : vector<6x1xf32>
    %283 = tpu.reciprocal %282 {approx = true} : vector<6x1xf32> -> vector<6x1xf32>
    %284 = vector.broadcast %283 : vector<6x1xf32> to vector<6x6xf32>
    %285 = arith.mulf %278, %284 : vector<6x6xf32>
    %cst_97 = arith.constant dense<0.000000e+00> : vector<6x32xf32>
    %286 = tpu.matmul %285, %250, %cst_97 {dimension_numbers = #tpu.dot_dimension_numbers<[1], [0], [0], [1], [0, 0, 1, 1], [], []>} : vector<6x6xf32>, vector<6x32xf32>, vector<6x32xf32> -> vector<6x32xf32>
    %287 = vector.extract_strided_slice %172 {offsets = [0, 96], sizes = [6, 32], strides = [1, 1]} : vector<6x128xf32> to vector<6x32xf32>
    %288 = vector.extract_strided_slice %173 {offsets = [0, 96], sizes = [6, 32], strides = [1, 1]} : vector<6x128xf32> to vector<6x32xf32>
    %289 = vector.extract_strided_slice %166 {offsets = [3, 0], sizes = [1, 32], strides = [1, 1]} : vector<4x32xf32> to vector<1x32xf32>
    %290 = vector.broadcast %289 : vector<1x32xf32> to vector<6x32xf32>
    %291 = arith.mulf %287, %290 : vector<6x32xf32>
    %cst_98 = arith.constant dense<0.000000e+00> : vector<6xf32>
    %292 = vector.multi_reduction <add>, %291, %cst_98 [1] : vector<6x32xf32> to vector<6xf32>
    %293 = vector.extract_strided_slice %167 {offsets = [3, 0], sizes = [1, 32], strides = [1, 1]} : vector<4x32xf32> to vector<1x32xf32>
    %294 = vector.broadcast %293 : vector<1x32xf32> to vector<6x32xf32>
    %295 = arith.mulf %288, %294 : vector<6x32xf32>
    %cst_99 = arith.constant dense<0.000000e+00> : vector<6xf32>
    %296 = vector.multi_reduction <add>, %295, %cst_99 [1] : vector<6x32xf32> to vector<6xf32>
    %297 = vector.shape_cast %296 : vector<6xf32> to vector<6x1xf32>
    %298 = vector.shape_cast %292 : vector<6xf32> to vector<1x6xf32>
    %299 = vector.broadcast %297 : vector<6x1xf32> to vector<6x6xf32>
    %300 = vector.broadcast %298 : vector<1x6xf32> to vector<6x6xf32>
    %301 = arith.addf %299, %300 : vector<6x6xf32>
    %cst_100 = arith.constant 0.000000e+00 : f32
    %302 = vector.broadcast %cst_100 : f32 to vector<6x6xf32>
    %303 = arith.cmpf ogt, %301, %302 : vector<6x6xf32>
    %cst_101 = arith.constant 2.000000e-01 : f32
    %304 = vector.broadcast %cst_101 : f32 to vector<6x6xf32>
    %305 = arith.mulf %304, %301 : vector<6x6xf32>
    %306 = arith.select %303, %301, %305 : vector<6x6xi1>, vector<6x6xf32>
    %cst_102 = arith.constant -1.000000e+30 : f32
    %307 = vector.broadcast %cst_102 : f32 to vector<6x6xf32>
    %308 = arith.select %175, %306, %307 : vector<6x6xi1>, vector<6x6xf32>
    %cst_103 = arith.constant dense<0xFF800000> : vector<6xf32>
    %309 = vector.multi_reduction <maximumf>, %308, %cst_103 [1] : vector<6x6xf32> to vector<6xf32>
    %310 = vector.shape_cast %309 : vector<6xf32> to vector<6x1xf32>
    %311 = vector.broadcast %310 : vector<6x1xf32> to vector<6x6xf32>
    %312 = arith.subf %308, %311 : vector<6x6xf32>
    %313 = math.exp %312 : vector<6x6xf32>
    %cst_104 = arith.constant 0.000000e+00 : f32
    %314 = vector.broadcast %cst_104 : f32 to vector<6x6xf32>
    %315 = arith.select %175, %313, %314 : vector<6x6xi1>, vector<6x6xf32>
    %cst_105 = arith.constant dense<0.000000e+00> : vector<6xf32>
    %316 = vector.multi_reduction <add>, %315, %cst_105 [1] : vector<6x6xf32> to vector<6xf32>
    %317 = vector.shape_cast %316 : vector<6xf32> to vector<6x1xf32>
    %cst_106 = arith.constant 1.000000e-16 : f32
    %318 = vector.broadcast %cst_106 : f32 to vector<6x1xf32>
    %319 = arith.maximumf %317, %318 : vector<6x1xf32>
    %320 = tpu.reciprocal %319 {approx = true} : vector<6x1xf32> -> vector<6x1xf32>
    %321 = vector.broadcast %320 : vector<6x1xf32> to vector<6x6xf32>
    %322 = arith.mulf %315, %321 : vector<6x6xf32>
    %cst_107 = arith.constant dense<0.000000e+00> : vector<6x32xf32>
    %323 = tpu.matmul %322, %287, %cst_107 {dimension_numbers = #tpu.dot_dimension_numbers<[1], [0], [0], [1], [0, 0, 1, 1], [], []>} : vector<6x6xf32>, vector<6x32xf32>, vector<6x32xf32> -> vector<6x32xf32>
    %324 = tpu.concatenate %212, %249, %286, %323 in 1 : vector<6x32xf32>, vector<6x32xf32>, vector<6x32xf32>, vector<6x32xf32> -> vector<6x128xf32>
    %325 = vector.broadcast %168 : vector<1x128xf32> to vector<6x128xf32>
    %326 = arith.addf %324, %325 : vector<6x128xf32>
    %327 = arith.addf %164, %326 : vector<6x128xf32>
    %c0_108 = arith.constant 0 : index
    %c0_109 = arith.constant 0 : index
    %328 = vector.load %arg14[%c0_108, %c0_109] : memref<16x128xf32, #tpu.memory_space<vmem>>, vector<16x128xf32>
    %c0_110 = arith.constant 0 : index
    %c0_111 = arith.constant 0 : index
    %329 = vector.load %arg15[%c0_110, %c0_111] : memref<4x32xf32, #tpu.memory_space<vmem>>, vector<4x32xf32>
    %c0_112 = arith.constant 0 : index
    %c0_113 = arith.constant 0 : index
    %330 = vector.load %arg16[%c0_112, %c0_113] : memref<4x32xf32, #tpu.memory_space<vmem>>, vector<4x32xf32>
    %c0_114 = arith.constant 0 : index
    %c0_115 = arith.constant 0 : index
    %331 = vector.load %arg17[%c0_114, %c0_115] : memref<1x128xf32, #tpu.memory_space<vmem>>, vector<1x128xf32>
    %c0_116 = arith.constant 0 : index
    %c0_117 = arith.constant 0 : index
    %332 = vector.load %arg5[%c0_116, %c0_117] : memref<2x6xf32, #tpu.memory_space<vmem>>, vector<2x6xf32>
    %333 = tpu.concatenate %0, %2 in 0 : vector<6x16xf32>, vector<2x16xf32> -> vector<8x16xf32>
    %cst_118 = arith.constant dense<0.000000e+00> : vector<8x128xf32>
    %334 = tpu.matmul %333, %328, %cst_118 {dimension_numbers = #tpu.dot_dimension_numbers<[1], [0], [0], [1], [0, 0, 1, 1], [], []>} : vector<8x16xf32>, vector<16x128xf32>, vector<8x128xf32> -> vector<8x128xf32>
    %335 = vector.extract_strided_slice %334 {offsets = [0, 0], sizes = [6, 128], strides = [1, 1]} : vector<8x128xf32> to vector<6x128xf32>
    %336 = vector.extract_strided_slice %334 {offsets = [6, 0], sizes = [2, 128], strides = [1, 1]} : vector<8x128xf32> to vector<2x128xf32>
    %cst_119 = arith.constant 0.000000e+00 : f32
    %337 = vector.broadcast %cst_119 : f32 to vector<2x6xf32>
    %338 = arith.cmpf ogt, %332, %337 : vector<2x6xf32>
    %339 = vector.extract_strided_slice %335 {offsets = [0, 0], sizes = [6, 32], strides = [1, 1]} : vector<6x128xf32> to vector<6x32xf32>
    %340 = vector.extract_strided_slice %336 {offsets = [0, 0], sizes = [2, 32], strides = [1, 1]} : vector<2x128xf32> to vector<2x32xf32>
    %341 = vector.extract_strided_slice %329 {offsets = [0, 0], sizes = [1, 32], strides = [1, 1]} : vector<4x32xf32> to vector<1x32xf32>
    %342 = vector.broadcast %341 : vector<1x32xf32> to vector<6x32xf32>
    %343 = arith.mulf %339, %342 : vector<6x32xf32>
    %cst_120 = arith.constant dense<0.000000e+00> : vector<6xf32>
    %344 = vector.multi_reduction <add>, %343, %cst_120 [1] : vector<6x32xf32> to vector<6xf32>
    %345 = vector.extract_strided_slice %330 {offsets = [0, 0], sizes = [1, 32], strides = [1, 1]} : vector<4x32xf32> to vector<1x32xf32>
    %346 = vector.broadcast %345 : vector<1x32xf32> to vector<2x32xf32>
    %347 = arith.mulf %340, %346 : vector<2x32xf32>
    %cst_121 = arith.constant dense<0.000000e+00> : vector<2xf32>
    %348 = vector.multi_reduction <add>, %347, %cst_121 [1] : vector<2x32xf32> to vector<2xf32>
    %349 = vector.shape_cast %348 : vector<2xf32> to vector<2x1xf32>
    %350 = vector.shape_cast %344 : vector<6xf32> to vector<1x6xf32>
    %351 = vector.broadcast %349 : vector<2x1xf32> to vector<2x6xf32>
    %352 = vector.broadcast %350 : vector<1x6xf32> to vector<2x6xf32>
    %353 = arith.addf %351, %352 : vector<2x6xf32>
    %cst_122 = arith.constant 0.000000e+00 : f32
    %354 = vector.broadcast %cst_122 : f32 to vector<2x6xf32>
    %355 = arith.cmpf ogt, %353, %354 : vector<2x6xf32>
    %cst_123 = arith.constant 2.000000e-01 : f32
    %356 = vector.broadcast %cst_123 : f32 to vector<2x6xf32>
    %357 = arith.mulf %356, %353 : vector<2x6xf32>
    %358 = arith.select %355, %353, %357 : vector<2x6xi1>, vector<2x6xf32>
    %cst_124 = arith.constant -1.000000e+30 : f32
    %359 = vector.broadcast %cst_124 : f32 to vector<2x6xf32>
    %360 = arith.select %338, %358, %359 : vector<2x6xi1>, vector<2x6xf32>
    %cst_125 = arith.constant dense<0xFF800000> : vector<2xf32>
    %361 = vector.multi_reduction <maximumf>, %360, %cst_125 [1] : vector<2x6xf32> to vector<2xf32>
    %362 = vector.shape_cast %361 : vector<2xf32> to vector<2x1xf32>
    %363 = vector.broadcast %362 : vector<2x1xf32> to vector<2x6xf32>
    %364 = arith.subf %360, %363 : vector<2x6xf32>
    %365 = math.exp %364 : vector<2x6xf32>
    %cst_126 = arith.constant 0.000000e+00 : f32
    %366 = vector.broadcast %cst_126 : f32 to vector<2x6xf32>
    %367 = arith.select %338, %365, %366 : vector<2x6xi1>, vector<2x6xf32>
    %cst_127 = arith.constant dense<0.000000e+00> : vector<2xf32>
    %368 = vector.multi_reduction <add>, %367, %cst_127 [1] : vector<2x6xf32> to vector<2xf32>
    %369 = vector.shape_cast %368 : vector<2xf32> to vector<2x1xf32>
    %cst_128 = arith.constant 1.000000e-16 : f32
    %370 = vector.broadcast %cst_128 : f32 to vector<2x1xf32>
    %371 = arith.maximumf %369, %370 : vector<2x1xf32>
    %372 = tpu.reciprocal %371 {approx = true} : vector<2x1xf32> -> vector<2x1xf32>
    %373 = vector.broadcast %372 : vector<2x1xf32> to vector<2x6xf32>
    %374 = arith.mulf %367, %373 : vector<2x6xf32>
    %cst_129 = arith.constant dense<0.000000e+00> : vector<2x32xf32>
    %375 = tpu.matmul %374, %339, %cst_129 {dimension_numbers = #tpu.dot_dimension_numbers<[1], [0], [0], [1], [0, 0, 1, 1], [], []>} : vector<2x6xf32>, vector<6x32xf32>, vector<2x32xf32> -> vector<2x32xf32>
    %376 = vector.extract_strided_slice %335 {offsets = [0, 32], sizes = [6, 32], strides = [1, 1]} : vector<6x128xf32> to vector<6x32xf32>
    %377 = vector.extract_strided_slice %336 {offsets = [0, 32], sizes = [2, 32], strides = [1, 1]} : vector<2x128xf32> to vector<2x32xf32>
    %378 = vector.extract_strided_slice %329 {offsets = [1, 0], sizes = [1, 32], strides = [1, 1]} : vector<4x32xf32> to vector<1x32xf32>
    %379 = vector.broadcast %378 : vector<1x32xf32> to vector<6x32xf32>
    %380 = arith.mulf %376, %379 : vector<6x32xf32>
    %cst_130 = arith.constant dense<0.000000e+00> : vector<6xf32>
    %381 = vector.multi_reduction <add>, %380, %cst_130 [1] : vector<6x32xf32> to vector<6xf32>
    %382 = vector.extract_strided_slice %330 {offsets = [1, 0], sizes = [1, 32], strides = [1, 1]} : vector<4x32xf32> to vector<1x32xf32>
    %383 = vector.broadcast %382 : vector<1x32xf32> to vector<2x32xf32>
    %384 = arith.mulf %377, %383 : vector<2x32xf32>
    %cst_131 = arith.constant dense<0.000000e+00> : vector<2xf32>
    %385 = vector.multi_reduction <add>, %384, %cst_131 [1] : vector<2x32xf32> to vector<2xf32>
    %386 = vector.shape_cast %385 : vector<2xf32> to vector<2x1xf32>
    %387 = vector.shape_cast %381 : vector<6xf32> to vector<1x6xf32>
    %388 = vector.broadcast %386 : vector<2x1xf32> to vector<2x6xf32>
    %389 = vector.broadcast %387 : vector<1x6xf32> to vector<2x6xf32>
    %390 = arith.addf %388, %389 : vector<2x6xf32>
    %cst_132 = arith.constant 0.000000e+00 : f32
    %391 = vector.broadcast %cst_132 : f32 to vector<2x6xf32>
    %392 = arith.cmpf ogt, %390, %391 : vector<2x6xf32>
    %cst_133 = arith.constant 2.000000e-01 : f32
    %393 = vector.broadcast %cst_133 : f32 to vector<2x6xf32>
    %394 = arith.mulf %393, %390 : vector<2x6xf32>
    %395 = arith.select %392, %390, %394 : vector<2x6xi1>, vector<2x6xf32>
    %cst_134 = arith.constant -1.000000e+30 : f32
    %396 = vector.broadcast %cst_134 : f32 to vector<2x6xf32>
    %397 = arith.select %338, %395, %396 : vector<2x6xi1>, vector<2x6xf32>
    %cst_135 = arith.constant dense<0xFF800000> : vector<2xf32>
    %398 = vector.multi_reduction <maximumf>, %397, %cst_135 [1] : vector<2x6xf32> to vector<2xf32>
    %399 = vector.shape_cast %398 : vector<2xf32> to vector<2x1xf32>
    %400 = vector.broadcast %399 : vector<2x1xf32> to vector<2x6xf32>
    %401 = arith.subf %397, %400 : vector<2x6xf32>
    %402 = math.exp %401 : vector<2x6xf32>
    %cst_136 = arith.constant 0.000000e+00 : f32
    %403 = vector.broadcast %cst_136 : f32 to vector<2x6xf32>
    %404 = arith.select %338, %402, %403 : vector<2x6xi1>, vector<2x6xf32>
    %cst_137 = arith.constant dense<0.000000e+00> : vector<2xf32>
    %405 = vector.multi_reduction <add>, %404, %cst_137 [1] : vector<2x6xf32> to vector<2xf32>
    %406 = vector.shape_cast %405 : vector<2xf32> to vector<2x1xf32>
    %cst_138 = arith.constant 1.000000e-16 : f32
    %407 = vector.broadcast %cst_138 : f32 to vector<2x1xf32>
    %408 = arith.maximumf %406, %407 : vector<2x1xf32>
    %409 = tpu.reciprocal %408 {approx = true} : vector<2x1xf32> -> vector<2x1xf32>
    %410 = vector.broadcast %409 : vector<2x1xf32> to vector<2x6xf32>
    %411 = arith.mulf %404, %410 : vector<2x6xf32>
    %cst_139 = arith.constant dense<0.000000e+00> : vector<2x32xf32>
    %412 = tpu.matmul %411, %376, %cst_139 {dimension_numbers = #tpu.dot_dimension_numbers<[1], [0], [0], [1], [0, 0, 1, 1], [], []>} : vector<2x6xf32>, vector<6x32xf32>, vector<2x32xf32> -> vector<2x32xf32>
    %413 = vector.extract_strided_slice %335 {offsets = [0, 64], sizes = [6, 32], strides = [1, 1]} : vector<6x128xf32> to vector<6x32xf32>
    %414 = vector.extract_strided_slice %336 {offsets = [0, 64], sizes = [2, 32], strides = [1, 1]} : vector<2x128xf32> to vector<2x32xf32>
    %415 = vector.extract_strided_slice %329 {offsets = [2, 0], sizes = [1, 32], strides = [1, 1]} : vector<4x32xf32> to vector<1x32xf32>
    %416 = vector.broadcast %415 : vector<1x32xf32> to vector<6x32xf32>
    %417 = arith.mulf %413, %416 : vector<6x32xf32>
    %cst_140 = arith.constant dense<0.000000e+00> : vector<6xf32>
    %418 = vector.multi_reduction <add>, %417, %cst_140 [1] : vector<6x32xf32> to vector<6xf32>
    %419 = vector.extract_strided_slice %330 {offsets = [2, 0], sizes = [1, 32], strides = [1, 1]} : vector<4x32xf32> to vector<1x32xf32>
    %420 = vector.broadcast %419 : vector<1x32xf32> to vector<2x32xf32>
    %421 = arith.mulf %414, %420 : vector<2x32xf32>
    %cst_141 = arith.constant dense<0.000000e+00> : vector<2xf32>
    %422 = vector.multi_reduction <add>, %421, %cst_141 [1] : vector<2x32xf32> to vector<2xf32>
    %423 = vector.shape_cast %422 : vector<2xf32> to vector<2x1xf32>
    %424 = vector.shape_cast %418 : vector<6xf32> to vector<1x6xf32>
    %425 = vector.broadcast %423 : vector<2x1xf32> to vector<2x6xf32>
    %426 = vector.broadcast %424 : vector<1x6xf32> to vector<2x6xf32>
    %427 = arith.addf %425, %426 : vector<2x6xf32>
    %cst_142 = arith.constant 0.000000e+00 : f32
    %428 = vector.broadcast %cst_142 : f32 to vector<2x6xf32>
    %429 = arith.cmpf ogt, %427, %428 : vector<2x6xf32>
    %cst_143 = arith.constant 2.000000e-01 : f32
    %430 = vector.broadcast %cst_143 : f32 to vector<2x6xf32>
    %431 = arith.mulf %430, %427 : vector<2x6xf32>
    %432 = arith.select %429, %427, %431 : vector<2x6xi1>, vector<2x6xf32>
    %cst_144 = arith.constant -1.000000e+30 : f32
    %433 = vector.broadcast %cst_144 : f32 to vector<2x6xf32>
    %434 = arith.select %338, %432, %433 : vector<2x6xi1>, vector<2x6xf32>
    %cst_145 = arith.constant dense<0xFF800000> : vector<2xf32>
    %435 = vector.multi_reduction <maximumf>, %434, %cst_145 [1] : vector<2x6xf32> to vector<2xf32>
    %436 = vector.shape_cast %435 : vector<2xf32> to vector<2x1xf32>
    %437 = vector.broadcast %436 : vector<2x1xf32> to vector<2x6xf32>
    %438 = arith.subf %434, %437 : vector<2x6xf32>
    %439 = math.exp %438 : vector<2x6xf32>
    %cst_146 = arith.constant 0.000000e+00 : f32
    %440 = vector.broadcast %cst_146 : f32 to vector<2x6xf32>
    %441 = arith.select %338, %439, %440 : vector<2x6xi1>, vector<2x6xf32>
    %cst_147 = arith.constant dense<0.000000e+00> : vector<2xf32>
    %442 = vector.multi_reduction <add>, %441, %cst_147 [1] : vector<2x6xf32> to vector<2xf32>
    %443 = vector.shape_cast %442 : vector<2xf32> to vector<2x1xf32>
    %cst_148 = arith.constant 1.000000e-16 : f32
    %444 = vector.broadcast %cst_148 : f32 to vector<2x1xf32>
    %445 = arith.maximumf %443, %444 : vector<2x1xf32>
    %446 = tpu.reciprocal %445 {approx = true} : vector<2x1xf32> -> vector<2x1xf32>
    %447 = vector.broadcast %446 : vector<2x1xf32> to vector<2x6xf32>
    %448 = arith.mulf %441, %447 : vector<2x6xf32>
    %cst_149 = arith.constant dense<0.000000e+00> : vector<2x32xf32>
    %449 = tpu.matmul %448, %413, %cst_149 {dimension_numbers = #tpu.dot_dimension_numbers<[1], [0], [0], [1], [0, 0, 1, 1], [], []>} : vector<2x6xf32>, vector<6x32xf32>, vector<2x32xf32> -> vector<2x32xf32>
    %450 = vector.extract_strided_slice %335 {offsets = [0, 96], sizes = [6, 32], strides = [1, 1]} : vector<6x128xf32> to vector<6x32xf32>
    %451 = vector.extract_strided_slice %336 {offsets = [0, 96], sizes = [2, 32], strides = [1, 1]} : vector<2x128xf32> to vector<2x32xf32>
    %452 = vector.extract_strided_slice %329 {offsets = [3, 0], sizes = [1, 32], strides = [1, 1]} : vector<4x32xf32> to vector<1x32xf32>
    %453 = vector.broadcast %452 : vector<1x32xf32> to vector<6x32xf32>
    %454 = arith.mulf %450, %453 : vector<6x32xf32>
    %cst_150 = arith.constant dense<0.000000e+00> : vector<6xf32>
    %455 = vector.multi_reduction <add>, %454, %cst_150 [1] : vector<6x32xf32> to vector<6xf32>
    %456 = vector.extract_strided_slice %330 {offsets = [3, 0], sizes = [1, 32], strides = [1, 1]} : vector<4x32xf32> to vector<1x32xf32>
    %457 = vector.broadcast %456 : vector<1x32xf32> to vector<2x32xf32>
    %458 = arith.mulf %451, %457 : vector<2x32xf32>
    %cst_151 = arith.constant dense<0.000000e+00> : vector<2xf32>
    %459 = vector.multi_reduction <add>, %458, %cst_151 [1] : vector<2x32xf32> to vector<2xf32>
    %460 = vector.shape_cast %459 : vector<2xf32> to vector<2x1xf32>
    %461 = vector.shape_cast %455 : vector<6xf32> to vector<1x6xf32>
    %462 = vector.broadcast %460 : vector<2x1xf32> to vector<2x6xf32>
    %463 = vector.broadcast %461 : vector<1x6xf32> to vector<2x6xf32>
    %464 = arith.addf %462, %463 : vector<2x6xf32>
    %cst_152 = arith.constant 0.000000e+00 : f32
    %465 = vector.broadcast %cst_152 : f32 to vector<2x6xf32>
    %466 = arith.cmpf ogt, %464, %465 : vector<2x6xf32>
    %cst_153 = arith.constant 2.000000e-01 : f32
    %467 = vector.broadcast %cst_153 : f32 to vector<2x6xf32>
    %468 = arith.mulf %467, %464 : vector<2x6xf32>
    %469 = arith.select %466, %464, %468 : vector<2x6xi1>, vector<2x6xf32>
    %cst_154 = arith.constant -1.000000e+30 : f32
    %470 = vector.broadcast %cst_154 : f32 to vector<2x6xf32>
    %471 = arith.select %338, %469, %470 : vector<2x6xi1>, vector<2x6xf32>
    %cst_155 = arith.constant dense<0xFF800000> : vector<2xf32>
    %472 = vector.multi_reduction <maximumf>, %471, %cst_155 [1] : vector<2x6xf32> to vector<2xf32>
    %473 = vector.shape_cast %472 : vector<2xf32> to vector<2x1xf32>
    %474 = vector.broadcast %473 : vector<2x1xf32> to vector<2x6xf32>
    %475 = arith.subf %471, %474 : vector<2x6xf32>
    %476 = math.exp %475 : vector<2x6xf32>
    %cst_156 = arith.constant 0.000000e+00 : f32
    %477 = vector.broadcast %cst_156 : f32 to vector<2x6xf32>
    %478 = arith.select %338, %476, %477 : vector<2x6xi1>, vector<2x6xf32>
    %cst_157 = arith.constant dense<0.000000e+00> : vector<2xf32>
    %479 = vector.multi_reduction <add>, %478, %cst_157 [1] : vector<2x6xf32> to vector<2xf32>
    %480 = vector.shape_cast %479 : vector<2xf32> to vector<2x1xf32>
    %cst_158 = arith.constant 1.000000e-16 : f32
    %481 = vector.broadcast %cst_158 : f32 to vector<2x1xf32>
    %482 = arith.maximumf %480, %481 : vector<2x1xf32>
    %483 = tpu.reciprocal %482 {approx = true} : vector<2x1xf32> -> vector<2x1xf32>
    %484 = vector.broadcast %483 : vector<2x1xf32> to vector<2x6xf32>
    %485 = arith.mulf %478, %484 : vector<2x6xf32>
    %cst_159 = arith.constant dense<0.000000e+00> : vector<2x32xf32>
    %486 = tpu.matmul %485, %450, %cst_159 {dimension_numbers = #tpu.dot_dimension_numbers<[1], [0], [0], [1], [0, 0, 1, 1], [], []>} : vector<2x6xf32>, vector<6x32xf32>, vector<2x32xf32> -> vector<2x32xf32>
    %487 = tpu.concatenate %375, %412, %449, %486 in 1 : vector<2x32xf32>, vector<2x32xf32>, vector<2x32xf32>, vector<2x32xf32> -> vector<2x128xf32>
    %488 = vector.broadcast %331 : vector<1x128xf32> to vector<2x128xf32>
    %489 = arith.addf %487, %488 : vector<2x128xf32>
    %c0_160 = arith.constant 0 : index
    %c0_161 = arith.constant 0 : index
    %490 = vector.load %arg18[%c0_160, %c0_161] : memref<128x32xf32, #tpu.memory_space<vmem>>, vector<128x32xf32>
    %c0_162 = arith.constant 0 : index
    %c0_163 = arith.constant 0 : index
    %491 = vector.load %arg19[%c0_162, %c0_163] : memref<1x32xf32, #tpu.memory_space<vmem>>, vector<1x32xf32>
    %c0_164 = arith.constant 0 : index
    %c0_165 = arith.constant 0 : index
    %492 = vector.load %arg20[%c0_164, %c0_165] : memref<1x32xf32, #tpu.memory_space<vmem>>, vector<1x32xf32>
    %c0_166 = arith.constant 0 : index
    %c0_167 = arith.constant 0 : index
    %493 = vector.load %arg21[%c0_166, %c0_167] : memref<1x32xf32, #tpu.memory_space<vmem>>, vector<1x32xf32>
    %c0_168 = arith.constant 0 : index
    %c0_169 = arith.constant 0 : index
    %494 = vector.load %arg5[%c0_168, %c0_169] : memref<2x6xf32, #tpu.memory_space<vmem>>, vector<2x6xf32>
    %495 = tpu.concatenate %327, %489 in 0 : vector<6x128xf32>, vector<2x128xf32> -> vector<8x128xf32>
    %cst_170 = arith.constant dense<0.000000e+00> : vector<8x32xf32>
    %496 = tpu.matmul %495, %490, %cst_170 {dimension_numbers = #tpu.dot_dimension_numbers<[1], [0], [0], [1], [0, 0, 1, 1], [], []>} : vector<8x128xf32>, vector<128x32xf32>, vector<8x32xf32> -> vector<8x32xf32>
    %497 = vector.extract_strided_slice %496 {offsets = [0, 0], sizes = [6, 32], strides = [1, 1]} : vector<8x32xf32> to vector<6x32xf32>
    %498 = vector.extract_strided_slice %496 {offsets = [6, 0], sizes = [2, 32], strides = [1, 1]} : vector<8x32xf32> to vector<2x32xf32>
    %cst_171 = arith.constant 0.000000e+00 : f32
    %499 = vector.broadcast %cst_171 : f32 to vector<2x6xf32>
    %500 = arith.cmpf ogt, %494, %499 : vector<2x6xf32>
    %501 = vector.broadcast %491 : vector<1x32xf32> to vector<6x32xf32>
    %502 = arith.mulf %497, %501 : vector<6x32xf32>
    %cst_172 = arith.constant dense<0.000000e+00> : vector<6xf32>
    %503 = vector.multi_reduction <add>, %502, %cst_172 [1] : vector<6x32xf32> to vector<6xf32>
    %504 = vector.broadcast %492 : vector<1x32xf32> to vector<2x32xf32>
    %505 = arith.mulf %498, %504 : vector<2x32xf32>
    %cst_173 = arith.constant dense<0.000000e+00> : vector<2xf32>
    %506 = vector.multi_reduction <add>, %505, %cst_173 [1] : vector<2x32xf32> to vector<2xf32>
    %507 = vector.shape_cast %506 : vector<2xf32> to vector<2x1xf32>
    %508 = vector.shape_cast %503 : vector<6xf32> to vector<1x6xf32>
    %509 = vector.broadcast %507 : vector<2x1xf32> to vector<2x6xf32>
    %510 = vector.broadcast %508 : vector<1x6xf32> to vector<2x6xf32>
    %511 = arith.addf %509, %510 : vector<2x6xf32>
    %cst_174 = arith.constant 0.000000e+00 : f32
    %512 = vector.broadcast %cst_174 : f32 to vector<2x6xf32>
    %513 = arith.cmpf ogt, %511, %512 : vector<2x6xf32>
    %cst_175 = arith.constant 2.000000e-01 : f32
    %514 = vector.broadcast %cst_175 : f32 to vector<2x6xf32>
    %515 = arith.mulf %514, %511 : vector<2x6xf32>
    %516 = arith.select %513, %511, %515 : vector<2x6xi1>, vector<2x6xf32>
    %cst_176 = arith.constant -1.000000e+30 : f32
    %517 = vector.broadcast %cst_176 : f32 to vector<2x6xf32>
    %518 = arith.select %500, %516, %517 : vector<2x6xi1>, vector<2x6xf32>
    %cst_177 = arith.constant dense<0xFF800000> : vector<2xf32>
    %519 = vector.multi_reduction <maximumf>, %518, %cst_177 [1] : vector<2x6xf32> to vector<2xf32>
    %520 = vector.shape_cast %519 : vector<2xf32> to vector<2x1xf32>
    %521 = vector.broadcast %520 : vector<2x1xf32> to vector<2x6xf32>
    %522 = arith.subf %518, %521 : vector<2x6xf32>
    %523 = math.exp %522 : vector<2x6xf32>
    %cst_178 = arith.constant 0.000000e+00 : f32
    %524 = vector.broadcast %cst_178 : f32 to vector<2x6xf32>
    %525 = arith.select %500, %523, %524 : vector<2x6xi1>, vector<2x6xf32>
    %cst_179 = arith.constant dense<0.000000e+00> : vector<2xf32>
    %526 = vector.multi_reduction <add>, %525, %cst_179 [1] : vector<2x6xf32> to vector<2xf32>
    %527 = vector.shape_cast %526 : vector<2xf32> to vector<2x1xf32>
    %cst_180 = arith.constant 1.000000e-16 : f32
    %528 = vector.broadcast %cst_180 : f32 to vector<2x1xf32>
    %529 = arith.maximumf %527, %528 : vector<2x1xf32>
    %530 = tpu.reciprocal %529 {approx = true} : vector<2x1xf32> -> vector<2x1xf32>
    %531 = vector.broadcast %530 : vector<2x1xf32> to vector<2x6xf32>
    %532 = arith.mulf %525, %531 : vector<2x6xf32>
    %cst_181 = arith.constant dense<0.000000e+00> : vector<2x32xf32>
    %533 = tpu.matmul %532, %497, %cst_181 {dimension_numbers = #tpu.dot_dimension_numbers<[1], [0], [0], [1], [0, 0, 1, 1], [], []>} : vector<2x6xf32>, vector<6x32xf32>, vector<2x32xf32> -> vector<2x32xf32>
    %534 = vector.broadcast %493 : vector<1x32xf32> to vector<2x32xf32>
    %535 = arith.addf %533, %534 : vector<2x32xf32>
    %c0_182 = arith.constant 0 : index
    %c0_183 = arith.constant 0 : index
    %536 = vector.load %arg41[%c0_182, %c0_183] : memref<2x32xf32, #tpu.memory_space<vmem>>, vector<2x32xf32>
    tpu.vector_store %arg41[%c0_182, %c0_183], %535 {strides = array<i32>} : memref<2x32xf32, #tpu.memory_space<vmem>>, vector<2x32xf32>,
    %c0_184 = arith.constant 0 : index
    %c0_185 = arith.constant 0 : index
    %537 = vector.load %arg22[%c0_184, %c0_185] : memref<2x32xf32, #tpu.memory_space<vmem>>, vector<2x32xf32>
    %c0_186 = arith.constant 0 : index
    %c0_187 = arith.constant 0 : index
    %538 = vector.load %arg23[%c0_186, %c0_187] : memref<32x32xf32, #tpu.memory_space<vmem>>, vector<32x32xf32>
    %cst_188 = arith.constant dense<0.000000e+00> : vector<2x32xf32>
    %539 = tpu.matmul %537, %538, %cst_188 {dimension_numbers = #tpu.dot_dimension_numbers<[1], [0], [0], [1], [0, 0, 1, 1], [], []>} : vector<2x32xf32>, vector<32x32xf32>, vector<2x32xf32> -> vector<2x32xf32>
    %c0_189 = arith.constant 0 : index
    %c0_190 = arith.constant 0 : index
    %540 = vector.load %arg24[%c0_189, %c0_190] : memref<1x32xf32, #tpu.memory_space<vmem>>, vector<1x32xf32>
    %541 = vector.broadcast %540 : vector<1x32xf32> to vector<2x32xf32>
    %542 = arith.addf %539, %541 : vector<2x32xf32>
    %c0_191 = arith.constant 0 : index
    %c0_192 = arith.constant 0 : index
    %543 = vector.load %arg42[%c0_191, %c0_192] : memref<2x32xf32, #tpu.memory_space<vmem>>, vector<2x32xf32>
    tpu.vector_store %arg42[%c0_191, %c0_192], %542 {strides = array<i32>} : memref<2x32xf32, #tpu.memory_space<vmem>>, vector<2x32xf32>,
    %c0_193 = arith.constant 0 : index
    %c0_194 = arith.constant 0 : index
    %544 = vector.load %arg25[%c0_193, %c0_194] : memref<8x64xf32, #tpu.memory_space<vmem>>, vector<8x64xf32>
    %c0_195 = arith.constant 0 : index
    %c0_196 = arith.constant 0 : index
    %545 = vector.load %arg26[%c0_195, %c0_196] : memref<64x192xf32, #tpu.memory_space<vmem>>, vector<64x192xf32>
    %cst_197 = arith.constant dense<0.000000e+00> : vector<8x192xf32>
    %546 = tpu.matmul %544, %545, %cst_197 {dimension_numbers = #tpu.dot_dimension_numbers<[1], [0], [0], [1], [0, 0, 1, 1], [], []>} : vector<8x64xf32>, vector<64x192xf32>, vector<8x192xf32> -> vector<8x192xf32>
    %c0_198 = arith.constant 0 : index
    %c0_199 = arith.constant 0 : index
    %547 = vector.load %arg27[%c0_198, %c0_199] : memref<1x192xf32, #tpu.memory_space<vmem>>, vector<1x192xf32>
    %548 = vector.broadcast %547 : vector<1x192xf32> to vector<8x192xf32>
    %549 = arith.addf %546, %548 : vector<8x192xf32>
    %550 = vector.extract_strided_slice %549 {offsets = [0, 0], sizes = [8, 64], strides = [1, 1]} : vector<8x192xf32> to vector<8x64xf32>
    %551 = vector.extract_strided_slice %549 {offsets = [0, 64], sizes = [8, 64], strides = [1, 1]} : vector<8x192xf32> to vector<8x64xf32>
    %552 = vector.extract_strided_slice %549 {offsets = [0, 128], sizes = [8, 64], strides = [1, 1]} : vector<8x192xf32> to vector<8x64xf32>
    %553 = vector.extract_strided_slice %550 {offsets = [0, 0], sizes = [4, 64], strides = [1, 1]} : vector<8x64xf32> to vector<4x64xf32>
    %554 = vector.extract_strided_slice %551 {offsets = [0, 0], sizes = [4, 64], strides = [1, 1]} : vector<8x64xf32> to vector<4x64xf32>
    %555 = vector.extract_strided_slice %552 {offsets = [0, 0], sizes = [4, 64], strides = [1, 1]} : vector<8x64xf32> to vector<4x64xf32>
    %556 = vector.extract_strided_slice %553 {offsets = [0, 0], sizes = [4, 8], strides = [1, 1]} : vector<4x64xf32> to vector<4x8xf32>
    %557 = vector.extract_strided_slice %554 {offsets = [0, 0], sizes = [4, 8], strides = [1, 1]} : vector<4x64xf32> to vector<4x8xf32>
    %558 = vector.extract_strided_slice %555 {offsets = [0, 0], sizes = [4, 8], strides = [1, 1]} : vector<4x64xf32> to vector<4x8xf32>
    "tpu.trace_start"() <{level = 10 : i32, message = "ld,md->lm"}> : () -> ()
    %cst_200 = arith.constant dense<0.000000e+00> : vector<4x4xf32>
    %559 = tpu.matmul %556, %557, %cst_200 {dimension_numbers = #tpu.dot_dimension_numbers<[1], [1], [0], [0], [0, 0, 1, 0], [], []>} : vector<4x8xf32>, vector<4x8xf32>, vector<4x4xf32> -> vector<4x4xf32>
    "tpu.trace_stop"() : () -> ()
    %cst_201 = arith.constant 0.353553385 : f32
    %560 = vector.broadcast %cst_201 : f32 to vector<4x4xf32>
    %561 = arith.mulf %559, %560 : vector<4x4xf32>
    %cst_202 = arith.constant dense<0xFF800000> : vector<4xf32>
    %562 = vector.multi_reduction <maximumf>, %561, %cst_202 [1] : vector<4x4xf32> to vector<4xf32>
    %563 = vector.shape_cast %562 : vector<4xf32> to vector<4x1xf32>
    %564 = vector.broadcast %563 : vector<4x1xf32> to vector<4x4xf32>
    %565 = arith.subf %561, %564 : vector<4x4xf32>
    %566 = math.exp %565 : vector<4x4xf32>
    %cst_203 = arith.constant dense<0.000000e+00> : vector<4xf32>
    %567 = vector.multi_reduction <add>, %566, %cst_203 [1] : vector<4x4xf32> to vector<4xf32>
    %568 = vector.shape_cast %567 : vector<4xf32> to vector<4x1xf32>
    %569 = tpu.reciprocal %568 {approx = true} : vector<4x1xf32> -> vector<4x1xf32>
    %570 = vector.broadcast %569 : vector<4x1xf32> to vector<4x4xf32>
    %571 = arith.mulf %566, %570 : vector<4x4xf32>
    %cst_204 = arith.constant dense<0.000000e+00> : vector<4x8xf32>
    %572 = tpu.matmul %571, %558, %cst_204 {dimension_numbers = #tpu.dot_dimension_numbers<[1], [0], [0], [1], [0, 0, 1, 1], [], []>} : vector<4x4xf32>, vector<4x8xf32>, vector<4x8xf32> -> vector<4x8xf32>
    %573 = vector.extract_strided_slice %553 {offsets = [0, 8], sizes = [4, 8], strides = [1, 1]} : vector<4x64xf32> to vector<4x8xf32>
    %574 = vector.extract_strided_slice %554 {offsets = [0, 8], sizes = [4, 8], strides = [1, 1]} : vector<4x64xf32> to vector<4x8xf32>
    %575 = vector.extract_strided_slice %555 {offsets = [0, 8], sizes = [4, 8], strides = [1, 1]} : vector<4x64xf32> to vector<4x8xf32>
    "tpu.trace_start"() <{level = 10 : i32, message = "ld,md->lm"}> : () -> ()
    %cst_205 = arith.constant dense<0.000000e+00> : vector<4x4xf32>
    %576 = tpu.matmul %573, %574, %cst_205 {dimension_numbers = #tpu.dot_dimension_numbers<[1], [1], [0], [0], [0, 0, 1, 0], [], []>} : vector<4x8xf32>, vector<4x8xf32>, vector<4x4xf32> -> vector<4x4xf32>
    "tpu.trace_stop"() : () -> ()
    %cst_206 = arith.constant 0.353553385 : f32
    %577 = vector.broadcast %cst_206 : f32 to vector<4x4xf32>
    %578 = arith.mulf %576, %577 : vector<4x4xf32>
    %cst_207 = arith.constant dense<0xFF800000> : vector<4xf32>
    %579 = vector.multi_reduction <maximumf>, %578, %cst_207 [1] : vector<4x4xf32> to vector<4xf32>
    %580 = vector.shape_cast %579 : vector<4xf32> to vector<4x1xf32>
    %581 = vector.broadcast %580 : vector<4x1xf32> to vector<4x4xf32>
    %582 = arith.subf %578, %581 : vector<4x4xf32>
    %583 = math.exp %582 : vector<4x4xf32>
    %cst_208 = arith.constant dense<0.000000e+00> : vector<4xf32>
    %584 = vector.multi_reduction <add>, %583, %cst_208 [1] : vector<4x4xf32> to vector<4xf32>
    %585 = vector.shape_cast %584 : vector<4xf32> to vector<4x1xf32>
    %586 = tpu.reciprocal %585 {approx = true} : vector<4x1xf32> -> vector<4x1xf32>
    %587 = vector.broadcast %586 : vector<4x1xf32> to vector<4x4xf32>
    %588 = arith.mulf %583, %587 : vector<4x4xf32>
    %cst_209 = arith.constant dense<0.000000e+00> : vector<4x8xf32>
    %589 = tpu.matmul %588, %575, %cst_209 {dimension_numbers = #tpu.dot_dimension_numbers<[1], [0], [0], [1], [0, 0, 1, 1], [], []>} : vector<4x4xf32>, vector<4x8xf32>, vector<4x8xf32> -> vector<4x8xf32>
    %590 = vector.extract_strided_slice %553 {offsets = [0, 16], sizes = [4, 8], strides = [1, 1]} : vector<4x64xf32> to vector<4x8xf32>
    %591 = vector.extract_strided_slice %554 {offsets = [0, 16], sizes = [4, 8], strides = [1, 1]} : vector<4x64xf32> to vector<4x8xf32>
    %592 = vector.extract_strided_slice %555 {offsets = [0, 16], sizes = [4, 8], strides = [1, 1]} : vector<4x64xf32> to vector<4x8xf32>
    "tpu.trace_start"() <{level = 10 : i32, message = "ld,md->lm"}> : () -> ()
    %cst_210 = arith.constant dense<0.000000e+00> : vector<4x4xf32>
    %593 = tpu.matmul %590, %591, %cst_210 {dimension_numbers = #tpu.dot_dimension_numbers<[1], [1], [0], [0], [0, 0, 1, 0], [], []>} : vector<4x8xf32>, vector<4x8xf32>, vector<4x4xf32> -> vector<4x4xf32>
    "tpu.trace_stop"() : () -> ()
    %cst_211 = arith.constant 0.353553385 : f32
    %594 = vector.broadcast %cst_211 : f32 to vector<4x4xf32>
    %595 = arith.mulf %593, %594 : vector<4x4xf32>
    %cst_212 = arith.constant dense<0xFF800000> : vector<4xf32>
    %596 = vector.multi_reduction <maximumf>, %595, %cst_212 [1] : vector<4x4xf32> to vector<4xf32>
    %597 = vector.shape_cast %596 : vector<4xf32> to vector<4x1xf32>
    %598 = vector.broadcast %597 : vector<4x1xf32> to vector<4x4xf32>
    %599 = arith.subf %595, %598 : vector<4x4xf32>
    %600 = math.exp %599 : vector<4x4xf32>
    %cst_213 = arith.constant dense<0.000000e+00> : vector<4xf32>
    %601 = vector.multi_reduction <add>, %600, %cst_213 [1] : vector<4x4xf32> to vector<4xf32>
    %602 = vector.shape_cast %601 : vector<4xf32> to vector<4x1xf32>
    %603 = tpu.reciprocal %602 {approx = true} : vector<4x1xf32> -> vector<4x1xf32>
    %604 = vector.broadcast %603 : vector<4x1xf32> to vector<4x4xf32>
    %605 = arith.mulf %600, %604 : vector<4x4xf32>
    %cst_214 = arith.constant dense<0.000000e+00> : vector<4x8xf32>
    %606 = tpu.matmul %605, %592, %cst_214 {dimension_numbers = #tpu.dot_dimension_numbers<[1], [0], [0], [1], [0, 0, 1, 1], [], []>} : vector<4x4xf32>, vector<4x8xf32>, vector<4x8xf32> -> vector<4x8xf32>
    %607 = vector.extract_strided_slice %553 {offsets = [0, 24], sizes = [4, 8], strides = [1, 1]} : vector<4x64xf32> to vector<4x8xf32>
    %608 = vector.extract_strided_slice %554 {offsets = [0, 24], sizes = [4, 8], strides = [1, 1]} : vector<4x64xf32> to vector<4x8xf32>
    %609 = vector.extract_strided_slice %555 {offsets = [0, 24], sizes = [4, 8], strides = [1, 1]} : vector<4x64xf32> to vector<4x8xf32>
    "tpu.trace_start"() <{level = 10 : i32, message = "ld,md->lm"}> : () -> ()
    %cst_215 = arith.constant dense<0.000000e+00> : vector<4x4xf32>
    %610 = tpu.matmul %607, %608, %cst_215 {dimension_numbers = #tpu.dot_dimension_numbers<[1], [1], [0], [0], [0, 0, 1, 0], [], []>} : vector<4x8xf32>, vector<4x8xf32>, vector<4x4xf32> -> vector<4x4xf32>
    "tpu.trace_stop"() : () -> ()
    %cst_216 = arith.constant 0.353553385 : f32
    %611 = vector.broadcast %cst_216 : f32 to vector<4x4xf32>
    %612 = arith.mulf %610, %611 : vector<4x4xf32>
    %cst_217 = arith.constant dense<0xFF800000> : vector<4xf32>
    %613 = vector.multi_reduction <maximumf>, %612, %cst_217 [1] : vector<4x4xf32> to vector<4xf32>
    %614 = vector.shape_cast %613 : vector<4xf32> to vector<4x1xf32>
    %615 = vector.broadcast %614 : vector<4x1xf32> to vector<4x4xf32>
    %616 = arith.subf %612, %615 : vector<4x4xf32>
    %617 = math.exp %616 : vector<4x4xf32>
    %cst_218 = arith.constant dense<0.000000e+00> : vector<4xf32>
    %618 = vector.multi_reduction <add>, %617, %cst_218 [1] : vector<4x4xf32> to vector<4xf32>
    %619 = vector.shape_cast %618 : vector<4xf32> to vector<4x1xf32>
    %620 = tpu.reciprocal %619 {approx = true} : vector<4x1xf32> -> vector<4x1xf32>
    %621 = vector.broadcast %620 : vector<4x1xf32> to vector<4x4xf32>
    %622 = arith.mulf %617, %621 : vector<4x4xf32>
    %cst_219 = arith.constant dense<0.000000e+00> : vector<4x8xf32>
    %623 = tpu.matmul %622, %609, %cst_219 {dimension_numbers = #tpu.dot_dimension_numbers<[1], [0], [0], [1], [0, 0, 1, 1], [], []>} : vector<4x4xf32>, vector<4x8xf32>, vector<4x8xf32> -> vector<4x8xf32>
    %624 = vector.extract_strided_slice %553 {offsets = [0, 32], sizes = [4, 8], strides = [1, 1]} : vector<4x64xf32> to vector<4x8xf32>
    %625 = vector.extract_strided_slice %554 {offsets = [0, 32], sizes = [4, 8], strides = [1, 1]} : vector<4x64xf32> to vector<4x8xf32>
    %626 = vector.extract_strided_slice %555 {offsets = [0, 32], sizes = [4, 8], strides = [1, 1]} : vector<4x64xf32> to vector<4x8xf32>
    "tpu.trace_start"() <{level = 10 : i32, message = "ld,md->lm"}> : () -> ()
    %cst_220 = arith.constant dense<0.000000e+00> : vector<4x4xf32>
    %627 = tpu.matmul %624, %625, %cst_220 {dimension_numbers = #tpu.dot_dimension_numbers<[1], [1], [0], [0], [0, 0, 1, 0], [], []>} : vector<4x8xf32>, vector<4x8xf32>, vector<4x4xf32> -> vector<4x4xf32>
    "tpu.trace_stop"() : () -> ()
    %cst_221 = arith.constant 0.353553385 : f32
    %628 = vector.broadcast %cst_221 : f32 to vector<4x4xf32>
    %629 = arith.mulf %627, %628 : vector<4x4xf32>
    %cst_222 = arith.constant dense<0xFF800000> : vector<4xf32>
    %630 = vector.multi_reduction <maximumf>, %629, %cst_222 [1] : vector<4x4xf32> to vector<4xf32>
    %631 = vector.shape_cast %630 : vector<4xf32> to vector<4x1xf32>
    %632 = vector.broadcast %631 : vector<4x1xf32> to vector<4x4xf32>
    %633 = arith.subf %629, %632 : vector<4x4xf32>
    %634 = math.exp %633 : vector<4x4xf32>
    %cst_223 = arith.constant dense<0.000000e+00> : vector<4xf32>
    %635 = vector.multi_reduction <add>, %634, %cst_223 [1] : vector<4x4xf32> to vector<4xf32>
    %636 = vector.shape_cast %635 : vector<4xf32> to vector<4x1xf32>
    %637 = tpu.reciprocal %636 {approx = true} : vector<4x1xf32> -> vector<4x1xf32>
    %638 = vector.broadcast %637 : vector<4x1xf32> to vector<4x4xf32>
    %639 = arith.mulf %634, %638 : vector<4x4xf32>
    %cst_224 = arith.constant dense<0.000000e+00> : vector<4x8xf32>
    %640 = tpu.matmul %639, %626, %cst_224 {dimension_numbers = #tpu.dot_dimension_numbers<[1], [0], [0], [1], [0, 0, 1, 1], [], []>} : vector<4x4xf32>, vector<4x8xf32>, vector<4x8xf32> -> vector<4x8xf32>
    %641 = vector.extract_strided_slice %553 {offsets = [0, 40], sizes = [4, 8], strides = [1, 1]} : vector<4x64xf32> to vector<4x8xf32>
    %642 = vector.extract_strided_slice %554 {offsets = [0, 40], sizes = [4, 8], strides = [1, 1]} : vector<4x64xf32> to vector<4x8xf32>
    %643 = vector.extract_strided_slice %555 {offsets = [0, 40], sizes = [4, 8], strides = [1, 1]} : vector<4x64xf32> to vector<4x8xf32>
    "tpu.trace_start"() <{level = 10 : i32, message = "ld,md->lm"}> : () -> ()
    %cst_225 = arith.constant dense<0.000000e+00> : vector<4x4xf32>
    %644 = tpu.matmul %641, %642, %cst_225 {dimension_numbers = #tpu.dot_dimension_numbers<[1], [1], [0], [0], [0, 0, 1, 0], [], []>} : vector<4x8xf32>, vector<4x8xf32>, vector<4x4xf32> -> vector<4x4xf32>
    "tpu.trace_stop"() : () -> ()
    %cst_226 = arith.constant 0.353553385 : f32
    %645 = vector.broadcast %cst_226 : f32 to vector<4x4xf32>
    %646 = arith.mulf %644, %645 : vector<4x4xf32>
    %cst_227 = arith.constant dense<0xFF800000> : vector<4xf32>
    %647 = vector.multi_reduction <maximumf>, %646, %cst_227 [1] : vector<4x4xf32> to vector<4xf32>
    %648 = vector.shape_cast %647 : vector<4xf32> to vector<4x1xf32>
    %649 = vector.broadcast %648 : vector<4x1xf32> to vector<4x4xf32>
    %650 = arith.subf %646, %649 : vector<4x4xf32>
    %651 = math.exp %650 : vector<4x4xf32>
    %cst_228 = arith.constant dense<0.000000e+00> : vector<4xf32>
    %652 = vector.multi_reduction <add>, %651, %cst_228 [1] : vector<4x4xf32> to vector<4xf32>
    %653 = vector.shape_cast %652 : vector<4xf32> to vector<4x1xf32>
    %654 = tpu.reciprocal %653 {approx = true} : vector<4x1xf32> -> vector<4x1xf32>
    %655 = vector.broadcast %654 : vector<4x1xf32> to vector<4x4xf32>
    %656 = arith.mulf %651, %655 : vector<4x4xf32>
    %cst_229 = arith.constant dense<0.000000e+00> : vector<4x8xf32>
    %657 = tpu.matmul %656, %643, %cst_229 {dimension_numbers = #tpu.dot_dimension_numbers<[1], [0], [0], [1], [0, 0, 1, 1], [], []>} : vector<4x4xf32>, vector<4x8xf32>, vector<4x8xf32> -> vector<4x8xf32>
    %658 = vector.extract_strided_slice %553 {offsets = [0, 48], sizes = [4, 8], strides = [1, 1]} : vector<4x64xf32> to vector<4x8xf32>
    %659 = vector.extract_strided_slice %554 {offsets = [0, 48], sizes = [4, 8], strides = [1, 1]} : vector<4x64xf32> to vector<4x8xf32>
    %660 = vector.extract_strided_slice %555 {offsets = [0, 48], sizes = [4, 8], strides = [1, 1]} : vector<4x64xf32> to vector<4x8xf32>
    "tpu.trace_start"() <{level = 10 : i32, message = "ld,md->lm"}> : () -> ()
    %cst_230 = arith.constant dense<0.000000e+00> : vector<4x4xf32>
    %661 = tpu.matmul %658, %659, %cst_230 {dimension_numbers = #tpu.dot_dimension_numbers<[1], [1], [0], [0], [0, 0, 1, 0], [], []>} : vector<4x8xf32>, vector<4x8xf32>, vector<4x4xf32> -> vector<4x4xf32>
    "tpu.trace_stop"() : () -> ()
    %cst_231 = arith.constant 0.353553385 : f32
    %662 = vector.broadcast %cst_231 : f32 to vector<4x4xf32>
    %663 = arith.mulf %661, %662 : vector<4x4xf32>
    %cst_232 = arith.constant dense<0xFF800000> : vector<4xf32>
    %664 = vector.multi_reduction <maximumf>, %663, %cst_232 [1] : vector<4x4xf32> to vector<4xf32>
    %665 = vector.shape_cast %664 : vector<4xf32> to vector<4x1xf32>
    %666 = vector.broadcast %665 : vector<4x1xf32> to vector<4x4xf32>
    %667 = arith.subf %663, %666 : vector<4x4xf32>
    %668 = math.exp %667 : vector<4x4xf32>
    %cst_233 = arith.constant dense<0.000000e+00> : vector<4xf32>
    %669 = vector.multi_reduction <add>, %668, %cst_233 [1] : vector<4x4xf32> to vector<4xf32>
    %670 = vector.shape_cast %669 : vector<4xf32> to vector<4x1xf32>
    %671 = tpu.reciprocal %670 {approx = true} : vector<4x1xf32> -> vector<4x1xf32>
    %672 = vector.broadcast %671 : vector<4x1xf32> to vector<4x4xf32>
    %673 = arith.mulf %668, %672 : vector<4x4xf32>
    %cst_234 = arith.constant dense<0.000000e+00> : vector<4x8xf32>
    %674 = tpu.matmul %673, %660, %cst_234 {dimension_numbers = #tpu.dot_dimension_numbers<[1], [0], [0], [1], [0, 0, 1, 1], [], []>} : vector<4x4xf32>, vector<4x8xf32>, vector<4x8xf32> -> vector<4x8xf32>
    %675 = vector.extract_strided_slice %553 {offsets = [0, 56], sizes = [4, 8], strides = [1, 1]} : vector<4x64xf32> to vector<4x8xf32>
    %676 = vector.extract_strided_slice %554 {offsets = [0, 56], sizes = [4, 8], strides = [1, 1]} : vector<4x64xf32> to vector<4x8xf32>
    %677 = vector.extract_strided_slice %555 {offsets = [0, 56], sizes = [4, 8], strides = [1, 1]} : vector<4x64xf32> to vector<4x8xf32>
    "tpu.trace_start"() <{level = 10 : i32, message = "ld,md->lm"}> : () -> ()
    %cst_235 = arith.constant dense<0.000000e+00> : vector<4x4xf32>
    %678 = tpu.matmul %675, %676, %cst_235 {dimension_numbers = #tpu.dot_dimension_numbers<[1], [1], [0], [0], [0, 0, 1, 0], [], []>} : vector<4x8xf32>, vector<4x8xf32>, vector<4x4xf32> -> vector<4x4xf32>
    "tpu.trace_stop"() : () -> ()
    %cst_236 = arith.constant 0.353553385 : f32
    %679 = vector.broadcast %cst_236 : f32 to vector<4x4xf32>
    %680 = arith.mulf %678, %679 : vector<4x4xf32>
    %cst_237 = arith.constant dense<0xFF800000> : vector<4xf32>
    %681 = vector.multi_reduction <maximumf>, %680, %cst_237 [1] : vector<4x4xf32> to vector<4xf32>
    %682 = vector.shape_cast %681 : vector<4xf32> to vector<4x1xf32>
    %683 = vector.broadcast %682 : vector<4x1xf32> to vector<4x4xf32>
    %684 = arith.subf %680, %683 : vector<4x4xf32>
    %685 = math.exp %684 : vector<4x4xf32>
    %cst_238 = arith.constant dense<0.000000e+00> : vector<4xf32>
    %686 = vector.multi_reduction <add>, %685, %cst_238 [1] : vector<4x4xf32> to vector<4xf32>
    %687 = vector.shape_cast %686 : vector<4xf32> to vector<4x1xf32>
    %688 = tpu.reciprocal %687 {approx = true} : vector<4x1xf32> -> vector<4x1xf32>
    %689 = vector.broadcast %688 : vector<4x1xf32> to vector<4x4xf32>
    %690 = arith.mulf %685, %689 : vector<4x4xf32>
    %cst_239 = arith.constant dense<0.000000e+00> : vector<4x8xf32>
    %691 = tpu.matmul %690, %677, %cst_239 {dimension_numbers = #tpu.dot_dimension_numbers<[1], [0], [0], [1], [0, 0, 1, 1], [], []>} : vector<4x4xf32>, vector<4x8xf32>, vector<4x8xf32> -> vector<4x8xf32>
    %692 = tpu.concatenate %572, %589, %606, %623, %640, %657, %674, %691 in 1 : vector<4x8xf32>, vector<4x8xf32>, vector<4x8xf32>, vector<4x8xf32>, vector<4x8xf32>, vector<4x8xf32>, vector<4x8xf32>, vector<4x8xf32> -> vector<4x64xf32>
    %693 = vector.extract_strided_slice %550 {offsets = [4, 0], sizes = [4, 64], strides = [1, 1]} : vector<8x64xf32> to vector<4x64xf32>
    %694 = vector.extract_strided_slice %551 {offsets = [4, 0], sizes = [4, 64], strides = [1, 1]} : vector<8x64xf32> to vector<4x64xf32>
    %695 = vector.extract_strided_slice %552 {offsets = [4, 0], sizes = [4, 64], strides = [1, 1]} : vector<8x64xf32> to vector<4x64xf32>
    %696 = vector.extract_strided_slice %693 {offsets = [0, 0], sizes = [4, 8], strides = [1, 1]} : vector<4x64xf32> to vector<4x8xf32>
    %697 = vector.extract_strided_slice %694 {offsets = [0, 0], sizes = [4, 8], strides = [1, 1]} : vector<4x64xf32> to vector<4x8xf32>
    %698 = vector.extract_strided_slice %695 {offsets = [0, 0], sizes = [4, 8], strides = [1, 1]} : vector<4x64xf32> to vector<4x8xf32>
    "tpu.trace_start"() <{level = 10 : i32, message = "ld,md->lm"}> : () -> ()
    %cst_240 = arith.constant dense<0.000000e+00> : vector<4x4xf32>
    %699 = tpu.matmul %696, %697, %cst_240 {dimension_numbers = #tpu.dot_dimension_numbers<[1], [1], [0], [0], [0, 0, 1, 0], [], []>} : vector<4x8xf32>, vector<4x8xf32>, vector<4x4xf32> -> vector<4x4xf32>
    "tpu.trace_stop"() : () -> ()
    %cst_241 = arith.constant 0.353553385 : f32
    %700 = vector.broadcast %cst_241 : f32 to vector<4x4xf32>
    %701 = arith.mulf %699, %700 : vector<4x4xf32>
    %cst_242 = arith.constant dense<0xFF800000> : vector<4xf32>
    %702 = vector.multi_reduction <maximumf>, %701, %cst_242 [1] : vector<4x4xf32> to vector<4xf32>
    %703 = vector.shape_cast %702 : vector<4xf32> to vector<4x1xf32>
    %704 = vector.broadcast %703 : vector<4x1xf32> to vector<4x4xf32>
    %705 = arith.subf %701, %704 : vector<4x4xf32>
    %706 = math.exp %705 : vector<4x4xf32>
    %cst_243 = arith.constant dense<0.000000e+00> : vector<4xf32>
    %707 = vector.multi_reduction <add>, %706, %cst_243 [1] : vector<4x4xf32> to vector<4xf32>
    %708 = vector.shape_cast %707 : vector<4xf32> to vector<4x1xf32>
    %709 = tpu.reciprocal %708 {approx = true} : vector<4x1xf32> -> vector<4x1xf32>
    %710 = vector.broadcast %709 : vector<4x1xf32> to vector<4x4xf32>
    %711 = arith.mulf %706, %710 : vector<4x4xf32>
    %cst_244 = arith.constant dense<0.000000e+00> : vector<4x8xf32>
    %712 = tpu.matmul %711, %698, %cst_244 {dimension_numbers = #tpu.dot_dimension_numbers<[1], [0], [0], [1], [0, 0, 1, 1], [], []>} : vector<4x4xf32>, vector<4x8xf32>, vector<4x8xf32> -> vector<4x8xf32>
    %713 = vector.extract_strided_slice %693 {offsets = [0, 8], sizes = [4, 8], strides = [1, 1]} : vector<4x64xf32> to vector<4x8xf32>
    %714 = vector.extract_strided_slice %694 {offsets = [0, 8], sizes = [4, 8], strides = [1, 1]} : vector<4x64xf32> to vector<4x8xf32>
    %715 = vector.extract_strided_slice %695 {offsets = [0, 8], sizes = [4, 8], strides = [1, 1]} : vector<4x64xf32> to vector<4x8xf32>
    "tpu.trace_start"() <{level = 10 : i32, message = "ld,md->lm"}> : () -> ()
    %cst_245 = arith.constant dense<0.000000e+00> : vector<4x4xf32>
    %716 = tpu.matmul %713, %714, %cst_245 {dimension_numbers = #tpu.dot_dimension_numbers<[1], [1], [0], [0], [0, 0, 1, 0], [], []>} : vector<4x8xf32>, vector<4x8xf32>, vector<4x4xf32> -> vector<4x4xf32>
    "tpu.trace_stop"() : () -> ()
    %cst_246 = arith.constant 0.353553385 : f32
    %717 = vector.broadcast %cst_246 : f32 to vector<4x4xf32>
    %718 = arith.mulf %716, %717 : vector<4x4xf32>
    %cst_247 = arith.constant dense<0xFF800000> : vector<4xf32>
    %719 = vector.multi_reduction <maximumf>, %718, %cst_247 [1] : vector<4x4xf32> to vector<4xf32>
    %720 = vector.shape_cast %719 : vector<4xf32> to vector<4x1xf32>
    %721 = vector.broadcast %720 : vector<4x1xf32> to vector<4x4xf32>
    %722 = arith.subf %718, %721 : vector<4x4xf32>
    %723 = math.exp %722 : vector<4x4xf32>
    %cst_248 = arith.constant dense<0.000000e+00> : vector<4xf32>
    %724 = vector.multi_reduction <add>, %723, %cst_248 [1] : vector<4x4xf32> to vector<4xf32>
    %725 = vector.shape_cast %724 : vector<4xf32> to vector<4x1xf32>
    %726 = tpu.reciprocal %725 {approx = true} : vector<4x1xf32> -> vector<4x1xf32>
    %727 = vector.broadcast %726 : vector<4x1xf32> to vector<4x4xf32>
    %728 = arith.mulf %723, %727 : vector<4x4xf32>
    %cst_249 = arith.constant dense<0.000000e+00> : vector<4x8xf32>
    %729 = tpu.matmul %728, %715, %cst_249 {dimension_numbers = #tpu.dot_dimension_numbers<[1], [0], [0], [1], [0, 0, 1, 1], [], []>} : vector<4x4xf32>, vector<4x8xf32>, vector<4x8xf32> -> vector<4x8xf32>
    %730 = vector.extract_strided_slice %693 {offsets = [0, 16], sizes = [4, 8], strides = [1, 1]} : vector<4x64xf32> to vector<4x8xf32>
    %731 = vector.extract_strided_slice %694 {offsets = [0, 16], sizes = [4, 8], strides = [1, 1]} : vector<4x64xf32> to vector<4x8xf32>
    %732 = vector.extract_strided_slice %695 {offsets = [0, 16], sizes = [4, 8], strides = [1, 1]} : vector<4x64xf32> to vector<4x8xf32>
    "tpu.trace_start"() <{level = 10 : i32, message = "ld,md->lm"}> : () -> ()
    %cst_250 = arith.constant dense<0.000000e+00> : vector<4x4xf32>
    %733 = tpu.matmul %730, %731, %cst_250 {dimension_numbers = #tpu.dot_dimension_numbers<[1], [1], [0], [0], [0, 0, 1, 0], [], []>} : vector<4x8xf32>, vector<4x8xf32>, vector<4x4xf32> -> vector<4x4xf32>
    "tpu.trace_stop"() : () -> ()
    %cst_251 = arith.constant 0.353553385 : f32
    %734 = vector.broadcast %cst_251 : f32 to vector<4x4xf32>
    %735 = arith.mulf %733, %734 : vector<4x4xf32>
    %cst_252 = arith.constant dense<0xFF800000> : vector<4xf32>
    %736 = vector.multi_reduction <maximumf>, %735, %cst_252 [1] : vector<4x4xf32> to vector<4xf32>
    %737 = vector.shape_cast %736 : vector<4xf32> to vector<4x1xf32>
    %738 = vector.broadcast %737 : vector<4x1xf32> to vector<4x4xf32>
    %739 = arith.subf %735, %738 : vector<4x4xf32>
    %740 = math.exp %739 : vector<4x4xf32>
    %cst_253 = arith.constant dense<0.000000e+00> : vector<4xf32>
    %741 = vector.multi_reduction <add>, %740, %cst_253 [1] : vector<4x4xf32> to vector<4xf32>
    %742 = vector.shape_cast %741 : vector<4xf32> to vector<4x1xf32>
    %743 = tpu.reciprocal %742 {approx = true} : vector<4x1xf32> -> vector<4x1xf32>
    %744 = vector.broadcast %743 : vector<4x1xf32> to vector<4x4xf32>
    %745 = arith.mulf %740, %744 : vector<4x4xf32>
    %cst_254 = arith.constant dense<0.000000e+00> : vector<4x8xf32>
    %746 = tpu.matmul %745, %732, %cst_254 {dimension_numbers = #tpu.dot_dimension_numbers<[1], [0], [0], [1], [0, 0, 1, 1], [], []>} : vector<4x4xf32>, vector<4x8xf32>, vector<4x8xf32> -> vector<4x8xf32>
    %747 = vector.extract_strided_slice %693 {offsets = [0, 24], sizes = [4, 8], strides = [1, 1]} : vector<4x64xf32> to vector<4x8xf32>
    %748 = vector.extract_strided_slice %694 {offsets = [0, 24], sizes = [4, 8], strides = [1, 1]} : vector<4x64xf32> to vector<4x8xf32>
    %749 = vector.extract_strided_slice %695 {offsets = [0, 24], sizes = [4, 8], strides = [1, 1]} : vector<4x64xf32> to vector<4x8xf32>
    "tpu.trace_start"() <{level = 10 : i32, message = "ld,md->lm"}> : () -> ()
    %cst_255 = arith.constant dense<0.000000e+00> : vector<4x4xf32>
    %750 = tpu.matmul %747, %748, %cst_255 {dimension_numbers = #tpu.dot_dimension_numbers<[1], [1], [0], [0], [0, 0, 1, 0], [], []>} : vector<4x8xf32>, vector<4x8xf32>, vector<4x4xf32> -> vector<4x4xf32>
    "tpu.trace_stop"() : () -> ()
    %cst_256 = arith.constant 0.353553385 : f32
    %751 = vector.broadcast %cst_256 : f32 to vector<4x4xf32>
    %752 = arith.mulf %750, %751 : vector<4x4xf32>
    %cst_257 = arith.constant dense<0xFF800000> : vector<4xf32>
    %753 = vector.multi_reduction <maximumf>, %752, %cst_257 [1] : vector<4x4xf32> to vector<4xf32>
    %754 = vector.shape_cast %753 : vector<4xf32> to vector<4x1xf32>
    %755 = vector.broadcast %754 : vector<4x1xf32> to vector<4x4xf32>
    %756 = arith.subf %752, %755 : vector<4x4xf32>
    %757 = math.exp %756 : vector<4x4xf32>
    %cst_258 = arith.constant dense<0.000000e+00> : vector<4xf32>
    %758 = vector.multi_reduction <add>, %757, %cst_258 [1] : vector<4x4xf32> to vector<4xf32>
    %759 = vector.shape_cast %758 : vector<4xf32> to vector<4x1xf32>
    %760 = tpu.reciprocal %759 {approx = true} : vector<4x1xf32> -> vector<4x1xf32>
    %761 = vector.broadcast %760 : vector<4x1xf32> to vector<4x4xf32>
    %762 = arith.mulf %757, %761 : vector<4x4xf32>
    %cst_259 = arith.constant dense<0.000000e+00> : vector<4x8xf32>
    %763 = tpu.matmul %762, %749, %cst_259 {dimension_numbers = #tpu.dot_dimension_numbers<[1], [0], [0], [1], [0, 0, 1, 1], [], []>} : vector<4x4xf32>, vector<4x8xf32>, vector<4x8xf32> -> vector<4x8xf32>
    %764 = vector.extract_strided_slice %693 {offsets = [0, 32], sizes = [4, 8], strides = [1, 1]} : vector<4x64xf32> to vector<4x8xf32>
    %765 = vector.extract_strided_slice %694 {offsets = [0, 32], sizes = [4, 8], strides = [1, 1]} : vector<4x64xf32> to vector<4x8xf32>
    %766 = vector.extract_strided_slice %695 {offsets = [0, 32], sizes = [4, 8], strides = [1, 1]} : vector<4x64xf32> to vector<4x8xf32>
    "tpu.trace_start"() <{level = 10 : i32, message = "ld,md->lm"}> : () -> ()
    %cst_260 = arith.constant dense<0.000000e+00> : vector<4x4xf32>
    %767 = tpu.matmul %764, %765, %cst_260 {dimension_numbers = #tpu.dot_dimension_numbers<[1], [1], [0], [0], [0, 0, 1, 0], [], []>} : vector<4x8xf32>, vector<4x8xf32>, vector<4x4xf32> -> vector<4x4xf32>
    "tpu.trace_stop"() : () -> ()
    %cst_261 = arith.constant 0.353553385 : f32
    %768 = vector.broadcast %cst_261 : f32 to vector<4x4xf32>
    %769 = arith.mulf %767, %768 : vector<4x4xf32>
    %cst_262 = arith.constant dense<0xFF800000> : vector<4xf32>
    %770 = vector.multi_reduction <maximumf>, %769, %cst_262 [1] : vector<4x4xf32> to vector<4xf32>
    %771 = vector.shape_cast %770 : vector<4xf32> to vector<4x1xf32>
    %772 = vector.broadcast %771 : vector<4x1xf32> to vector<4x4xf32>
    %773 = arith.subf %769, %772 : vector<4x4xf32>
    %774 = math.exp %773 : vector<4x4xf32>
    %cst_263 = arith.constant dense<0.000000e+00> : vector<4xf32>
    %775 = vector.multi_reduction <add>, %774, %cst_263 [1] : vector<4x4xf32> to vector<4xf32>
    %776 = vector.shape_cast %775 : vector<4xf32> to vector<4x1xf32>
    %777 = tpu.reciprocal %776 {approx = true} : vector<4x1xf32> -> vector<4x1xf32>
    %778 = vector.broadcast %777 : vector<4x1xf32> to vector<4x4xf32>
    %779 = arith.mulf %774, %778 : vector<4x4xf32>
    %cst_264 = arith.constant dense<0.000000e+00> : vector<4x8xf32>
    %780 = tpu.matmul %779, %766, %cst_264 {dimension_numbers = #tpu.dot_dimension_numbers<[1], [0], [0], [1], [0, 0, 1, 1], [], []>} : vector<4x4xf32>, vector<4x8xf32>, vector<4x8xf32> -> vector<4x8xf32>
    %781 = vector.extract_strided_slice %693 {offsets = [0, 40], sizes = [4, 8], strides = [1, 1]} : vector<4x64xf32> to vector<4x8xf32>
    %782 = vector.extract_strided_slice %694 {offsets = [0, 40], sizes = [4, 8], strides = [1, 1]} : vector<4x64xf32> to vector<4x8xf32>
    %783 = vector.extract_strided_slice %695 {offsets = [0, 40], sizes = [4, 8], strides = [1, 1]} : vector<4x64xf32> to vector<4x8xf32>
    "tpu.trace_start"() <{level = 10 : i32, message = "ld,md->lm"}> : () -> ()
    %cst_265 = arith.constant dense<0.000000e+00> : vector<4x4xf32>
    %784 = tpu.matmul %781, %782, %cst_265 {dimension_numbers = #tpu.dot_dimension_numbers<[1], [1], [0], [0], [0, 0, 1, 0], [], []>} : vector<4x8xf32>, vector<4x8xf32>, vector<4x4xf32> -> vector<4x4xf32>
    "tpu.trace_stop"() : () -> ()
    %cst_266 = arith.constant 0.353553385 : f32
    %785 = vector.broadcast %cst_266 : f32 to vector<4x4xf32>
    %786 = arith.mulf %784, %785 : vector<4x4xf32>
    %cst_267 = arith.constant dense<0xFF800000> : vector<4xf32>
    %787 = vector.multi_reduction <maximumf>, %786, %cst_267 [1] : vector<4x4xf32> to vector<4xf32>
    %788 = vector.shape_cast %787 : vector<4xf32> to vector<4x1xf32>
    %789 = vector.broadcast %788 : vector<4x1xf32> to vector<4x4xf32>
    %790 = arith.subf %786, %789 : vector<4x4xf32>
    %791 = math.exp %790 : vector<4x4xf32>
    %cst_268 = arith.constant dense<0.000000e+00> : vector<4xf32>
    %792 = vector.multi_reduction <add>, %791, %cst_268 [1] : vector<4x4xf32> to vector<4xf32>
    %793 = vector.shape_cast %792 : vector<4xf32> to vector<4x1xf32>
    %794 = tpu.reciprocal %793 {approx = true} : vector<4x1xf32> -> vector<4x1xf32>
    %795 = vector.broadcast %794 : vector<4x1xf32> to vector<4x4xf32>
    %796 = arith.mulf %791, %795 : vector<4x4xf32>
    %cst_269 = arith.constant dense<0.000000e+00> : vector<4x8xf32>
    %797 = tpu.matmul %796, %783, %cst_269 {dimension_numbers = #tpu.dot_dimension_numbers<[1], [0], [0], [1], [0, 0, 1, 1], [], []>} : vector<4x4xf32>, vector<4x8xf32>, vector<4x8xf32> -> vector<4x8xf32>
    %798 = vector.extract_strided_slice %693 {offsets = [0, 48], sizes = [4, 8], strides = [1, 1]} : vector<4x64xf32> to vector<4x8xf32>
    %799 = vector.extract_strided_slice %694 {offsets = [0, 48], sizes = [4, 8], strides = [1, 1]} : vector<4x64xf32> to vector<4x8xf32>
    %800 = vector.extract_strided_slice %695 {offsets = [0, 48], sizes = [4, 8], strides = [1, 1]} : vector<4x64xf32> to vector<4x8xf32>
    "tpu.trace_start"() <{level = 10 : i32, message = "ld,md->lm"}> : () -> ()
    %cst_270 = arith.constant dense<0.000000e+00> : vector<4x4xf32>
    %801 = tpu.matmul %798, %799, %cst_270 {dimension_numbers = #tpu.dot_dimension_numbers<[1], [1], [0], [0], [0, 0, 1, 0], [], []>} : vector<4x8xf32>, vector<4x8xf32>, vector<4x4xf32> -> vector<4x4xf32>
    "tpu.trace_stop"() : () -> ()
    %cst_271 = arith.constant 0.353553385 : f32
    %802 = vector.broadcast %cst_271 : f32 to vector<4x4xf32>
    %803 = arith.mulf %801, %802 : vector<4x4xf32>
    %cst_272 = arith.constant dense<0xFF800000> : vector<4xf32>
    %804 = vector.multi_reduction <maximumf>, %803, %cst_272 [1] : vector<4x4xf32> to vector<4xf32>
    %805 = vector.shape_cast %804 : vector<4xf32> to vector<4x1xf32>
    %806 = vector.broadcast %805 : vector<4x1xf32> to vector<4x4xf32>
    %807 = arith.subf %803, %806 : vector<4x4xf32>
    %808 = math.exp %807 : vector<4x4xf32>
    %cst_273 = arith.constant dense<0.000000e+00> : vector<4xf32>
    %809 = vector.multi_reduction <add>, %808, %cst_273 [1] : vector<4x4xf32> to vector<4xf32>
    %810 = vector.shape_cast %809 : vector<4xf32> to vector<4x1xf32>
    %811 = tpu.reciprocal %810 {approx = true} : vector<4x1xf32> -> vector<4x1xf32>
    %812 = vector.broadcast %811 : vector<4x1xf32> to vector<4x4xf32>
    %813 = arith.mulf %808, %812 : vector<4x4xf32>
    %cst_274 = arith.constant dense<0.000000e+00> : vector<4x8xf32>
    %814 = tpu.matmul %813, %800, %cst_274 {dimension_numbers = #tpu.dot_dimension_numbers<[1], [0], [0], [1], [0, 0, 1, 1], [], []>} : vector<4x4xf32>, vector<4x8xf32>, vector<4x8xf32> -> vector<4x8xf32>
    %815 = vector.extract_strided_slice %693 {offsets = [0, 56], sizes = [4, 8], strides = [1, 1]} : vector<4x64xf32> to vector<4x8xf32>
    %816 = vector.extract_strided_slice %694 {offsets = [0, 56], sizes = [4, 8], strides = [1, 1]} : vector<4x64xf32> to vector<4x8xf32>
    %817 = vector.extract_strided_slice %695 {offsets = [0, 56], sizes = [4, 8], strides = [1, 1]} : vector<4x64xf32> to vector<4x8xf32>
    "tpu.trace_start"() <{level = 10 : i32, message = "ld,md->lm"}> : () -> ()
    %cst_275 = arith.constant dense<0.000000e+00> : vector<4x4xf32>
    %818 = tpu.matmul %815, %816, %cst_275 {dimension_numbers = #tpu.dot_dimension_numbers<[1], [1], [0], [0], [0, 0, 1, 0], [], []>} : vector<4x8xf32>, vector<4x8xf32>, vector<4x4xf32> -> vector<4x4xf32>
    "tpu.trace_stop"() : () -> ()
    %cst_276 = arith.constant 0.353553385 : f32
    %819 = vector.broadcast %cst_276 : f32 to vector<4x4xf32>
    %820 = arith.mulf %818, %819 : vector<4x4xf32>
    %cst_277 = arith.constant dense<0xFF800000> : vector<4xf32>
    %821 = vector.multi_reduction <maximumf>, %820, %cst_277 [1] : vector<4x4xf32> to vector<4xf32>
    %822 = vector.shape_cast %821 : vector<4xf32> to vector<4x1xf32>
    %823 = vector.broadcast %822 : vector<4x1xf32> to vector<4x4xf32>
    %824 = arith.subf %820, %823 : vector<4x4xf32>
    %825 = math.exp %824 : vector<4x4xf32>
    %cst_278 = arith.constant dense<0.000000e+00> : vector<4xf32>
    %826 = vector.multi_reduction <add>, %825, %cst_278 [1] : vector<4x4xf32> to vector<4xf32>
    %827 = vector.shape_cast %826 : vector<4xf32> to vector<4x1xf32>
    %828 = tpu.reciprocal %827 {approx = true} : vector<4x1xf32> -> vector<4x1xf32>
    %829 = vector.broadcast %828 : vector<4x1xf32> to vector<4x4xf32>
    %830 = arith.mulf %825, %829 : vector<4x4xf32>
    %cst_279 = arith.constant dense<0.000000e+00> : vector<4x8xf32>
    %831 = tpu.matmul %830, %817, %cst_279 {dimension_numbers = #tpu.dot_dimension_numbers<[1], [0], [0], [1], [0, 0, 1, 1], [], []>} : vector<4x4xf32>, vector<4x8xf32>, vector<4x8xf32> -> vector<4x8xf32>
    %832 = tpu.concatenate %712, %729, %746, %763, %780, %797, %814, %831 in 1 : vector<4x8xf32>, vector<4x8xf32>, vector<4x8xf32>, vector<4x8xf32>, vector<4x8xf32>, vector<4x8xf32>, vector<4x8xf32>, vector<4x8xf32> -> vector<4x64xf32>
    %833 = tpu.concatenate %692, %832 in 0 : vector<4x64xf32>, vector<4x64xf32> -> vector<8x64xf32>
    %c0_280 = arith.constant 0 : index
    %c0_281 = arith.constant 0 : index
    %834 = vector.load %arg28[%c0_280, %c0_281] : memref<64x64xf32, #tpu.memory_space<vmem>>, vector<64x64xf32>
    %cst_282 = arith.constant dense<0.000000e+00> : vector<8x64xf32>
    %835 = tpu.matmul %833, %834, %cst_282 {dimension_numbers = #tpu.dot_dimension_numbers<[1], [0], [0], [1], [0, 0, 1, 1], [], []>} : vector<8x64xf32>, vector<64x64xf32>, vector<8x64xf32> -> vector<8x64xf32>
    %c0_283 = arith.constant 0 : index
    %c0_284 = arith.constant 0 : index
    %836 = vector.load %arg29[%c0_283, %c0_284] : memref<1x64xf32, #tpu.memory_space<vmem>>, vector<1x64xf32>
    %837 = vector.broadcast %836 : vector<1x64xf32> to vector<8x64xf32>
    %838 = arith.addf %835, %837 : vector<8x64xf32>
    %c0_285 = arith.constant 0 : index
    %c0_286 = arith.constant 0 : index
    %839 = vector.load %arg30[%c0_285, %c0_286] : memref<64x8xf32, #tpu.memory_space<vmem>>, vector<64x8xf32>
    %c0_287 = arith.constant 0 : index
    %c0_288 = arith.constant 0 : index
    %840 = vector.load %arg31[%c0_287, %c0_288] : memref<64x8xf32, #tpu.memory_space<vmem>>, vector<64x8xf32>
    %c0_289 = arith.constant 0 : index
    %c0_290 = arith.constant 0 : index
    %841 = vector.load %arg32[%c0_289, %c0_290] : memref<64x8xf32, #tpu.memory_space<vmem>>, vector<64x8xf32>
    %c0_291 = arith.constant 0 : index
    %c0_292 = arith.constant 0 : index
    %842 = vector.load %arg33[%c0_291, %c0_292] : memref<1x8xf32, #tpu.memory_space<vmem>>, vector<1x8xf32>
    %843 = vector.extract_strided_slice %838 {offsets = [0, 0], sizes = [1, 64], strides = [1, 1]} : vector<8x64xf32> to vector<1x64xf32>
    %cst_293 = arith.constant dense<0.000000e+00> : vector<1x8xf32>
    %844 = tpu.matmul %843, %839, %cst_293 {dimension_numbers = #tpu.dot_dimension_numbers<[1], [0], [0], [1], [0, 0, 1, 1], [], []>} : vector<1x64xf32>, vector<64x8xf32>, vector<1x8xf32> -> vector<1x8xf32>
    %845 = arith.addf %842, %844 : vector<1x8xf32>
    %846 = vector.extract_strided_slice %838 {offsets = [1, 0], sizes = [1, 64], strides = [1, 1]} : vector<8x64xf32> to vector<1x64xf32>
    %cst_294 = arith.constant dense<0.000000e+00> : vector<1x8xf32>
    %847 = tpu.matmul %846, %840, %cst_294 {dimension_numbers = #tpu.dot_dimension_numbers<[1], [0], [0], [1], [0, 0, 1, 1], [], []>} : vector<1x64xf32>, vector<64x8xf32>, vector<1x8xf32> -> vector<1x8xf32>
    %848 = arith.addf %845, %847 : vector<1x8xf32>
    %849 = vector.extract_strided_slice %838 {offsets = [2, 0], sizes = [1, 64], strides = [1, 1]} : vector<8x64xf32> to vector<1x64xf32>
    %cst_295 = arith.constant dense<0.000000e+00> : vector<1x8xf32>
    %850 = tpu.matmul %849, %841, %cst_295 {dimension_numbers = #tpu.dot_dimension_numbers<[1], [0], [0], [1], [0, 0, 1, 1], [], []>} : vector<1x64xf32>, vector<64x8xf32>, vector<1x8xf32> -> vector<1x8xf32>
    %851 = arith.addf %848, %850 : vector<1x8xf32>
    %c0_296 = arith.constant 0 : index
    %c0_297 = arith.constant 0 : index
    %852 = vector.load %arg33[%c0_296, %c0_297] : memref<1x8xf32, #tpu.memory_space<vmem>>, vector<1x8xf32>
    %853 = vector.extract_strided_slice %838 {offsets = [4, 0], sizes = [1, 64], strides = [1, 1]} : vector<8x64xf32> to vector<1x64xf32>
    %cst_298 = arith.constant dense<0.000000e+00> : vector<1x8xf32>
    %854 = tpu.matmul %853, %839, %cst_298 {dimension_numbers = #tpu.dot_dimension_numbers<[1], [0], [0], [1], [0, 0, 1, 1], [], []>} : vector<1x64xf32>, vector<64x8xf32>, vector<1x8xf32> -> vector<1x8xf32>
    %855 = arith.addf %852, %854 : vector<1x8xf32>
    %856 = vector.extract_strided_slice %838 {offsets = [5, 0], sizes = [1, 64], strides = [1, 1]} : vector<8x64xf32> to vector<1x64xf32>
    %cst_299 = arith.constant dense<0.000000e+00> : vector<1x8xf32>
    %857 = tpu.matmul %856, %840, %cst_299 {dimension_numbers = #tpu.dot_dimension_numbers<[1], [0], [0], [1], [0, 0, 1, 1], [], []>} : vector<1x64xf32>, vector<64x8xf32>, vector<1x8xf32> -> vector<1x8xf32>
    %858 = arith.addf %855, %857 : vector<1x8xf32>
    %859 = vector.extract_strided_slice %838 {offsets = [6, 0], sizes = [1, 64], strides = [1, 1]} : vector<8x64xf32> to vector<1x64xf32>
    %cst_300 = arith.constant dense<0.000000e+00> : vector<1x8xf32>
    %860 = tpu.matmul %859, %841, %cst_300 {dimension_numbers = #tpu.dot_dimension_numbers<[1], [0], [0], [1], [0, 0, 1, 1], [], []>} : vector<1x64xf32>, vector<64x8xf32>, vector<1x8xf32> -> vector<1x8xf32>
    %861 = arith.addf %858, %860 : vector<1x8xf32>
    %862 = tpu.concatenate %851, %861 in 0 : vector<1x8xf32>, vector<1x8xf32> -> vector<2x8xf32>
    %c0_301 = arith.constant 0 : index
    %c0_302 = arith.constant 0 : index
    %863 = vector.load %arg34[%c0_301, %c0_302] : memref<8x36xf32, #tpu.memory_space<vmem>>, vector<8x36xf32>
    %cst_303 = arith.constant dense<0.000000e+00> : vector<2x36xf32>
    %864 = tpu.matmul %862, %863, %cst_303 {dimension_numbers = #tpu.dot_dimension_numbers<[1], [0], [0], [1], [0, 0, 1, 1], [], []>} : vector<2x8xf32>, vector<8x36xf32>, vector<2x36xf32> -> vector<2x36xf32>
    %c0_304 = arith.constant 0 : index
    %c0_305 = arith.constant 0 : index
    %865 = vector.load %arg35[%c0_304, %c0_305] : memref<32x36xf32, #tpu.memory_space<vmem>>, vector<32x36xf32>
    %cst_306 = arith.constant dense<0.000000e+00> : vector<2x36xf32>
    %866 = tpu.matmul %542, %865, %cst_306 {dimension_numbers = #tpu.dot_dimension_numbers<[1], [0], [0], [1], [0, 0, 1, 1], [], []>} : vector<2x32xf32>, vector<32x36xf32>, vector<2x36xf32> -> vector<2x36xf32>
    %867 = arith.addf %864, %866 : vector<2x36xf32>
    %c0_307 = arith.constant 0 : index
    %c0_308 = arith.constant 0 : index
    %868 = vector.load %arg36[%c0_307, %c0_308] : memref<32x36xf32, #tpu.memory_space<vmem>>, vector<32x36xf32>
    %cst_309 = arith.constant dense<0.000000e+00> : vector<2x36xf32>
    %869 = tpu.matmul %535, %868, %cst_309 {dimension_numbers = #tpu.dot_dimension_numbers<[1], [0], [0], [1], [0, 0, 1, 1], [], []>} : vector<2x32xf32>, vector<32x36xf32>, vector<2x36xf32> -> vector<2x36xf32>
    %870 = arith.addf %867, %869 : vector<2x36xf32>
    %c0_310 = arith.constant 0 : index
    %c0_311 = arith.constant 0 : index
    %871 = vector.load %arg37[%c0_310, %c0_311] : memref<1x36xf32, #tpu.memory_space<vmem>>, vector<1x36xf32>
    %872 = vector.broadcast %871 : vector<1x36xf32> to vector<2x36xf32>
    %873 = arith.addf %870, %872 : vector<2x36xf32>
    %cst_312 = arith.constant 0.000000e+00 : f32
    %874 = vector.broadcast %cst_312 : f32 to vector<2x36xf32>
    %875 = arith.cmpf ogt, %873, %874 : vector<2x36xf32>
    %cst_313 = arith.constant 0.00999999977 : f32
    %876 = vector.broadcast %cst_313 : f32 to vector<2x36xf32>
    %877 = arith.mulf %876, %873 : vector<2x36xf32>
    %878 = arith.select %875, %873, %877 : vector<2x36xi1>, vector<2x36xf32>
    %c0_314 = arith.constant 0 : index
    %c0_315 = arith.constant 0 : index
    %879 = vector.load %arg38[%c0_314, %c0_315] : memref<36x2xf32, #tpu.memory_space<vmem>>, vector<36x2xf32>
    %cst_316 = arith.constant dense<0.000000e+00> : vector<2x2xf32>
    %880 = tpu.matmul %878, %879, %cst_316 {dimension_numbers = #tpu.dot_dimension_numbers<[1], [0], [0], [1], [0, 0, 1, 1], [], []>} : vector<2x36xf32>, vector<36x2xf32>, vector<2x2xf32> -> vector<2x2xf32>
    %c0_317 = arith.constant 0 : index
    %c0_318 = arith.constant 0 : index
    %881 = vector.load %arg39[%c0_317, %c0_318] : memref<1x2xf32, #tpu.memory_space<vmem>>, vector<1x2xf32>
    %882 = vector.broadcast %881 : vector<1x2xf32> to vector<2x2xf32>
    %883 = arith.addf %880, %882 : vector<2x2xf32>
    %c0_319 = arith.constant 0 : index
    %c0_320 = arith.constant 0 : index
    %884 = vector.load %arg40[%c0_319, %c0_320] : memref<2x2xf32, #tpu.memory_space<vmem>>, vector<2x2xf32>
    tpu.vector_store %arg40[%c0_319, %c0_320], %883 {strides = array<i32>} : memref<2x2xf32, #tpu.memory_space<vmem>>, vector<2x2xf32>,
    return
  }
}

</mosaic_0001>

<bundles_post_ra>
// kernel: forward.1
= control target key start
LH: loop header
LB: loop body
LE: loop exit
PB: predicated region body
PF: predicated region fallthrough
CT: control target
= control target key end

     0   :  { %s7597_s6 = smov 1   ;;  %s7598_s10 = smov 2   ;;  %s9031_s0 = inlined_call_operand.smem [shape: u32[43], index: -1, kind: input, shape index: {}] }
   0x1   :  { %s7668_s5 = sld [smem:[%s9031_s0]]   ;;  %s7599_s14 = smov 3  }
   0x2   :  { %s7673_s9 = sld [smem:[%s9031_s0 + %s7597_s6]]   ;;  %s7600_s18 = smov 4  }
   0x3   :  { %s7678_s13 = sld [smem:[%s9031_s0 + %s7598_s10]]   ;;  %s7601_s22 = smov 5  }
   0x4   :  { %s7683_s17 = sld [smem:[%s9031_s0 + %s7599_s14]]   ;;  %s7602_s26 = smov 6  }
   0x5   :  { %s7688_s21 = sld [smem:[%s9031_s0 + %s7600_s18]]   ;;  %s7603_s30 = smov 7  }
   0x6   :  { %s7693_s25 = sld [smem:[%s9031_s0 + %s7601_s22]]   ;;  %s7604_s4 = smov 8  }
   0x7   :  { %s7698_s29 = sld [smem:[%s9031_s0 + %s7602_s26]]   ;;  %s7605_s10 = smov 9  }
   0x8   :  { %s7703_s3 = sld [smem:[%s9031_s0 + %s7603_s30]]   ;;  %s7606_s15 = smov 10  }
   0x9   :  { %s7708_s8 = sld [smem:[%s9031_s0 + %s7604_s4]]   ;;  %s7607_s20 = smov 11  }
   0xa   :  { %s7713_s14 = sld [smem:[%s9031_s0 + %s7605_s10]]   ;;  %s7608_s26 = smov 12  }
   0xb   :  { %s7718_s19 = sld [smem:[%s9031_s0 + %s7606_s15]]   ;;  %s7609_s1 = smov 13  }
   0xc   :  { %9042 = sst [smem:[#allocation9_spill]] %s7693_s25  ;;  %s7610_s7 = smov 14  }
   0xd   :  { %s7723_s24 = sld [smem:[%s9031_s0 + %s7607_s20]]   ;;  %s7611_s15 = smov 15  }
   0xe   :  { %s7728_s30 = sld [smem:[%s9031_s0 + %s7608_s26]]   ;;  %s7612_s22 = smov 16  }
   0xf   :  { %s7733_s6 = sld [smem:[%s9031_s0 + %s7609_s1]]   ;;  %s7613_s28 = smov 17  }
  0x10   :  { %9043 = sst [smem:[#allocation10_spill]] %s7713_s14 }
  0x11   :  { %s7738_s12 = sld [smem:[%s9031_s0 + %s7610_s7]]   ;;  %s7614_s7 = smov 18  }
  0x12   :  { %s7743_s20 = sld [smem:[%s9031_s0 + %s7611_s15]]   ;;  %s7615_s15 = smov 19  }
  0x13   :  { %s7748_s27 = sld [smem:[%s9031_s0 + %s7612_s22]]   ;;  %s7616_s22 = smov 20  }
  0x14   :  { %s7753_s4 = sld [smem:[%s9031_s0 + %s7613_s28]]   ;;  %s7617_s28 = smov 21  }
  0x15   :  { %9044 = sst [smem:[#allocation11_spill]] %s7733_s6 }
  0x16   :  { %s7758_s6 = sld [smem:[%s9031_s0 + %s7614_s7]]   ;;  %s7618_s7 = smov 22  }
  0x17   :  { %s7763_s14 = sld [smem:[%s9031_s0 + %s7615_s15]]   ;;  %s7619_s15 = smov 23  }
  0x18   :  { %s7768_s25 = sld [smem:[%s9031_s0 + %s7616_s22]]   ;;  %s7620_s22 = smov 24  }
  0x1a   :  { %9045 = sst [smem:[#allocation12_spill]] %s7753_s4 }
  0x1b   :  { %s7773_s4 = sld [smem:[%s9031_s0 + %s7617_s28]]   ;;  %s7621_s28 = smov 25  }
  0x1c   :  { %9046 = sst [smem:[#allocation13_spill]] %s7758_s6 }
  0x1d   :  { %9047 = sst [smem:[#allocation14_spill]] %s7763_s14 }
  0x1e   :  { %9048 = sst [smem:[#allocation15_spill]] %s7768_s25 }
  0x1f   :  { %s7778_s6 = sld [smem:[%s9031_s0 + %s7618_s7]]   ;;  %s7622_s7 = smov 26  }
  0x20   :  { %s7783_s14 = sld [smem:[%s9031_s0 + %s7619_s15]]   ;;  %s7623_s15 = smov 27  }
  0x21   :  { %9049 = sst [smem:[#allocation16_spill]] %s7773_s4 }
  0x22   :  { %s7788_s25 = sld [smem:[%s9031_s0 + %s7620_s22]]   ;;  %s7624_s22 = smov 28  }
  0x23   :  { %s7793_s4 = sld [smem:[%s9031_s0 + %s7621_s28]]   ;;  %s7625_s28 = smov 29  }
  0x25   :  { %9050 = sst [smem:[#allocation17_spill]] %s7778_s6 }
  0x26   :  { %9051 = sst [smem:[#allocation18_spill]] %s7783_s14 }
  0x27   :  { %s7798_s6 = sld [smem:[%s9031_s0 + %s7622_s7]]   ;;  %s7626_s7 = smov 30  }
  0x28   :  { %9052 = sst [smem:[#allocation19_spill]] %s7788_s25 }
  0x29   :  { %9053 = sst [smem:[#allocation20_spill]] %s7793_s4 }
  0x2a   :  { %s7803_s14 = sld [smem:[%s9031_s0 + %s7623_s15]]   ;;  %s7627_s15 = smov 31  }
  0x2b   :  { %s7808_s25 = sld [smem:[%s9031_s0 + %s7624_s22]]   ;;  %s7628_s22 = smov 32  }
  0x2c   :  { %s7813_s4 = sld [smem:[%s9031_s0 + %s7625_s28]]   ;;  %s7629_s28 = smov 33  }
  0x2d   :  { %9054 = sst [smem:[#allocation21_spill]] %s7798_s6 }
  0x2e   :  { %s7818_s6 = sld [smem:[%s9031_s0 + %s7626_s7]]   ;;  %s7630_s7 = smov 34  }
  0x30   :  { %9055 = sst [smem:[#allocation22_spill]] %s7803_s14 }
  0x31   :  { %9056 = sst [smem:[#allocation23_spill]] %s7808_s25 }
  0x32   :  { %9057 = sst [smem:[#allocation24_spill]] %s7813_s4 }
  0x33   :  { %s7823_s14 = sld [smem:[%s9031_s0 + %s7627_s15]]   ;;  %s7631_s15 = smov 35  }
  0x34   :  { %9058 = sst [smem:[#allocation25_spill]] %s7818_s6 }
  0x35   :  { %s7828_s25 = sld [smem:[%s9031_s0 + %s7628_s22]]   ;;  %s7632_s22 = smov 36  }
  0x36   :  { %s7833_s4 = sld [smem:[%s9031_s0 + %s7629_s28]]   ;;  %s7633_s28 = smov 37  }
  0x37   :  { %s7838_s6 = sld [smem:[%s9031_s0 + %s7630_s7]]   ;;  %s7634_s7 = smov 38  }
  0x39   :  { %9059 = sst [smem:[#allocation26_spill]] %s7823_s14 }
  0x3a   :  { %s7843_s14 = sld [smem:[%s9031_s0 + %s7631_s15]]   ;;  %s7635_s15 = smov 39  }
  0x3b   :  { %9060 = sst [smem:[#allocation27_spill]] %s7828_s25 }
  0x3c   :  { %9061 = sst [smem:[#allocation28_spill]] %s7833_s4 }
  0x3d   :  { %9062 = sst [smem:[#allocation29_spill]] %s7838_s6 }
  0x3e   :  { %s7848_s25 = sld [smem:[%s9031_s0 + %s7632_s22]]   ;;  %s7636_s22 = smov 40  }
  0x3f   :  { %s7853_s4 = sld [smem:[%s9031_s0 + %s7633_s28]]   ;;  %s7637_s28 = smov 41  }
  0x40   :  { %9063 = sst [smem:[#allocation30_spill]] %s7843_s14 }
  0x41   :  { %s7858_s6 = sld [smem:[%s9031_s0 + %s7634_s7]]   ;;  %s7638_s7 = smov 42  }
  0x42   :  { %s7863_s14 = sld [smem:[%s9031_s0 + %s7635_s15]]  }
  0x44   :  { %9064 = sst [smem:[#allocation31_spill]] %s7848_s25 }
  0x45   :  { %9065 = sst [smem:[#allocation32_spill]] %s7853_s4 }
  0x46   :  { %s7868_s25 = sld [smem:[%s9031_s0 + %s7636_s22]]  }
  0x47   :  { %9066 = sst [smem:[#allocation33_spill]] %s7858_s6 }
  0x48   :  { %s7873_s4 = sld [smem:[%s9031_s0 + %s7637_s28]]  }
  0x49   :  { %s7878_s6 = sld [smem:[%s9031_s0 + %s7638_s7]]  }
  0x4a   :  { %91 = vsyncpa [#allocation3], 0  ;;  %v176_v0 = vld [vmem:[%s7698_s29] sm:$0xff]  ;;  %v177_v1 = vld [vmem:[%s7698_s29 + $0x8] sm:$0xff]  ;;  %vm185_vm0 = vcmask 1044480   ;;  %v269_v3 = vlaneseq  ;;  %vm187_vm1 = vcmask 130048  }
  0x4b   :  { %v7883_v2 = vld [vmem:[%s7668_s5] sm:$0x3f]  ;;  %v7179_v4 = vpack.c.bf16 %v177_v1, %v176_v0 }
  0x4c   :  { %v174_v5 = vld [vmem:[%s7673_s9] sm:$0x1f]  ;;  %v183_v6 = vrot.slane %v7883_v2, 3  ;;  %v7887_v7 = vshrl.u32 %v269_v3, 7 }
  0x4d   :  { %92 = vsyncpa [#allocation5], 0  ;;  %7180 = vmatprep.subr.bf16.mxu0 %v7179_v4  ;;  %v7891_v9 = vld [vmem:[%s7703_s3] sm:$0xf]  ;;  %s7639_s0 = smov 64   ;;  %v7640_v14 = vmov 0.0  }
  0x4e   :  { %v186_v8 = vsel %vm185_vm0, %v174_v5, %v183_v6  ;;  %7182 = vmatpush3.bf16.msra.mxu0 %v7179_v4  ;;  %v7895_v10 = vsub.s32 2, %v7887_v7  ;;  %v7898_v11 = vld [vmem:[%s7708_s8] sm:$0xf]  ;;  %6721 = vmatprep.subr.mxu1 %v7640_v14  ;;  %vm274_vm2 = vcmask 258048   ;;  %vm284_vm3 = vcmask 261125   ;;  %s7641_s5 = smov 32  }
  0x4f   :  { %6718 = vmatprep.mubr.msk.f32.mxu0 %vm187_vm1, %v186_v8  ;;  %6731 = vmatprep.subr.mxu0 %v7640_v14  ;;  %vm288_vm4 = vcmask 256000   ;;  %v294_v28 = vand.u32 127, %v269_v3  ;;  %v7930_v39 = vld [vmem:[%s7683_s17] sm:$0x3f]  ;;  %vm315_vm7 = vcmask 1042432   ;;  %vm321_vm9 = vcmask 37888  }
  0x50   :  { %v569_v12 = vrot.slane %v7891_v9, %v7895_v10  ;;  %v585_v13 = vrot.slane %v7898_v11, %v7895_v10  ;;  %vm268_vm8 = vcmp.gt.f32.partialorder %v7930_v39, 0.0  ;;  %v7938_v46 = vsub.s32 1, %v7887_v7  ;;  %s7642_s9 = smov 96   ;;  %v7956_v57 = vld [vmem:[%s7723_s24] sm:$0xf]  ;;  %v900_v0 = vld [vmem:[%s7718_s19 + $0x8] sm:$0xff] }
  0x51   :  { %6719 = vmatmul.mubr.msk.f32.vlgmr.msra.gmra.mrb[0].mxu0 %vm187_vm1, %v183_v6  ;;  %v7926_v29 = vsub.s32 %v294_v28, %v7887_v7  ;;  %v7945_v48 = vsub.s32 3, %v7887_v7  ;;  %v1287_v58 = vrot.slane %v7956_v57, %v7895_v10  ;;  %v7967_v61 = vld [vmem:[%s7728_s30] sm:$0xf]  ;;  %vm7643_vm10 = vmmov 0   ;;  %s9068_s17 = sld [smem:[#allocation13_spill]]  ;;  %s9070_s29 = sld [smem:[#allocation12_spill]] }
  0x52   :  { %571 = vrot.lane.b32.xlu0 %v569_v12, %s7639_s0  ;;  %v431_v47 = vrot.slane %v7898_v11, %v7938_v46  ;;  %v415_v59 = vrot.slane %v7891_v9, %v7938_v46  ;;  %v1303_v62 = vrot.slane %v7967_v61, %v7895_v10  ;;  %6733 = vmatprep.mubr.msk.f32.mxu0 %vm7643_vm10, %v7640_v14  ;;  %v899_v63 = vld [vmem:[%s7718_s19] sm:$0xff]  ;;  %vm907_vm11 = vcmask 1045504   ;;  %s9071_s3 = sld [smem:[#allocation11_spill]]  ;;  %s9072_s8 = sld [smem:[#allocation14_spill]] }
  0x53   :  { %v723_v49 = vrot.slane %v7891_v9, %v7945_v48  ;;  %v739_v60 = vrot.slane %v7898_v11, %v7945_v48  ;;  %v7183_v3 = vpack.c.bf16 %v900_v0, %v899_v63  ;;  %6723 = vmatprep.mubr.msk.f32.mxu1 %vm7643_vm10, %v7640_v14  ;;  %vm335_vm12 = vcmask 39936   ;;  %s9073_s19 = sld [smem:[#allocation15_spill]]  ;;  %s9074_s24 = sld [smem:[#allocation18_spill]] }
  0x54   :  { %vm995_vm13 = vcmask 259072   ;;  %vm1009_vm14 = vcmask 257024   ;;  %vm1005_vm15 = vcmask 261126   ;;  %v1133_v39 = vrot.slane %v7956_v57, %v7938_v46  ;;  %s9075_s30 = sld [smem:[#allocation21_spill]]  ;;  %s9079_s15 = sld [smem:[#allocation19_spill]] }
  0x55   :  { %s9080_s16 = sld [smem:[#allocation22_spill]]  ;;  %s7645_s18 = smov 56  }
  0x56   :  { %587 = vrot.lane.b32.xlu0 %v585_v13, %s7639_s0  ;;  %s7646_s22 = smov 112   ;;  %s7647_s23 = smov 120  }
  0x57   :  { %s7648_s26 = smov 104   ;;  %s7649_s28 = smov 48  }
  0x58   :  { %s7650_s1 = smov 40   ;;  %s7651_s2 = smov 88  }
  0x59   :  { %s7652_s7 = smov 80   ;;  %s7653_s10 = smov 24  }
  0x5a   :  { %s7654_s11 = smov 72  }
  0xc4   :  { %v572_v15 = vpop.permute.xlu0 %571 }
  0xc8   :  { %v588_v16 = vpop.permute.xlu0 %587 }
 0x124   :  { %v7909_v17 = vpop.f32.mrb[0].mxu0 }
 0x125   :  { %v7911_v18 = vpop.f32.mrb[1].mxu0  ;;  %v591_v19 = vmul.f32 %v7909_v17, %v588_v16 }
 0x126   :  { %6722 = vmatpush3.msk.msra.mxu1 %vm185_vm0, %v7911_v18  ;;  %v574_v20 = vmul.f32 %v572_v15, %v7911_v18  ;;  %v590_v21 = vmul.f32 %v588_v16, %v7911_v18 }
 0x127   :  { %596 = vrot.lane.b32.xlu0 %v591_v19, %s7639_s0  ;;  %6726 = vmatprep.subr.mxu1 %v7640_v14 }
 0x128   :  { %576 = vrot.lane.b32.xlu1 %v574_v20, %s7639_s0 }
 0x12c   :  { %594 = vrot.lane.b32.xlu1 %v590_v21, %s7639_s0  ;;  %v905_v21 = vrot.slane %v7883_v2, 2 }
 0x199   :  { %v597_v26 = vpop.permute.xlu0 %596 }
 0x19a   :  { %v577_v22 = vpop.permute.xlu1 %576  ;;  %v603_v27 = vsel %vm288_vm4, %v597_v26, 0.0 }
 0x19b   :  { %v579_v23 = vsel %vm274_vm2, %v577_v22, 0.0 }
 0x19c   :  { %580 = vadd.xlane.f32.xlu1 %v579_v23 }
 0x19e   :  { %v595_v24 = vpop.permute.xlu1 %594 }
 0x19f   :  { %v600_v25 = vsel %vm284_vm3, %v595_v24, 0.0 }
 0x1a0   :  { %601 = vadd.xlane.f32.xlu0 %v600_v25  ;;  %v908_v25 = vsel %vm907_vm11, %v7883_v2, %v905_v21 }
 0x1a4   :  { %604 = vadd.xlane.f32.xlu0 %v603_v27 }
 0x229   :  { %v581_v30 = vpop.xlane.xlu1 %580 }
 0x22a   :  { %v610_v31 = vrot.slane %v581_v30, %v7926_v29 }
 0x22d   :  { %v602_v32 = vpop.xlane.xlu0 %601 }
 0x22e   :  { %v615_v33 = vadd.f32 %v610_v31, %v602_v32 }
 0x230   :  { %v619_v34 = vmul.f32 0.2, %v615_v33  ;;  %vm617_vm5 = vcmp.gt.f32.partialorder %v615_v33, 0.0 }
 0x231   :  { %v605_v35 = vpop.xlane.xlu0 %604 }
 0x232   :  { %v616_v36 = vadd.f32 %v610_v31, %v605_v35  ;;  %v621_v37 = vsel %vm617_vm5, %v615_v33, %v619_v34 }
 0x233   :  { %v625_v41 = vrot.slane %v621_v37, 5 }
 0x234   :  { %vm618_vm6 = vcmp.gt.f32.partialorder %v616_v36, 0.0  ;;  %v620_v38 = vmul.f32 0.2, %v616_v36 }
 0x236   :  { %v622_v40 = vsel %vm618_vm6, %v616_v36, %v620_v38  ;;  %v8013_v36 = vsub.s32 0, %v7887_v7 }
 0x237   :  { %v626_v42 = vrot.slane %v622_v40, 5 }
 0x238   :  { %v272_v37 = vrot.slane %v7891_v9, %v8013_v36  ;;  %v281_v40 = vrot.slane %v7898_v11, %v8013_v36 }
 0x239   :  { %v627_v43 = vsel %vm315_vm7, %v625_v41, %v626_v42 }
 0x23a   :  { %v629_v44 = vsel %vm268_vm8, %v627_v43, -1e+30  ;;  %v273_v38 = vmul.f32 %v272_v37, %v7911_v18  ;;  %v283_v42 = vmul.f32 %v7909_v17, %v281_v40  ;;  %v282_v7 = vmul.f32 %v281_v40, %v7911_v18 }
 0x23b   :  { %v630_v45 = vsel %vm321_vm9, %v629_v44, -inf }
 0x23c   :  { %631 = vmax.xlane.f32.xlu1 %v630_v45  ;;  %v275_v41 = vsel %vm274_vm2, %v273_v38, 0.0 }
 0x24d   :  { %643 = vrot.lane.b32.xlu1 %v7911_v18, %s7639_s0 }
 0x251   :  { %433 = vrot.lane.b32.xlu1 %v431_v47, %s7641_s5 }
 0x255   :  { %725 = vrot.lane.b32.xlu1 %v723_v49, %s7642_s9  ;;  %v285_v49 = vsel %vm284_vm3, %v282_v7, 0.0 }
 0x259   :  { %1289 = vrot.lane.b32.xlu1 %v1287_v58, %s7639_s0 }
 0x2c9   :  { %v632_v50 = vpop.xlane.xlu1 %631 }
 0x2ca   :  { %v633_v51 = vsub.f32 %v629_v44, %v632_v50  ;;  %v289_v44 = vsel %vm288_vm4, %v283_v42, 0.0 }
 0x2cc   :  { %v634_v52 = vmul.f32 1.442695, %v633_v51 }
 0x2cd   :  { %v644_v53 = vpop.permute.xlu1 %643 }
 0x2ce   :  { %7411 = vpow2.f32 %v634_v52  ;;  %6732 = vmatpush3.msk.msra.mxu0 %vm185_vm0, %v644_v53 }
 0x2cf   :  { %7184 = vmatprep.subr.bf16.mxu0 %v7183_v3 }
 0x2d1   :  { %v434_v1 = vpop.permute.xlu1 %433 }
 0x2d2   :  { %v436_v4 = vmul.f32 %v434_v1, %v7911_v18  ;;  %v437_v19 = vmul.f32 %v7909_v17, %v434_v1 }
 0x2d5   :  { %v726_v5 = vpop.permute.xlu1 %725 }
 0x2d6   :  { %v728_v6 = vmul.f32 %v726_v5, %v7911_v18 }
 0x2d8   :  { %v7412_v54 = vpop.eup %7411 }
 0x2d9   :  { %v636_v55 = vsel %vm268_vm8, %v7412_v54, 0.0  ;;  %v1290_v28 = vpop.permute.xlu1 %1289 }
 0x2da   :  { %v637_v56 = vsel %vm321_vm9, %v636_v55, 0.0 }
 0x2db   :  { %638 = vadd.xlane.f32.xlu0 %v637_v56 }
 0x2f1   :  { %417 = vrot.lane.b32.xlu0 %v415_v59, %s7641_s5 }
 0x2f5   :  { %741 = vrot.lane.b32.xlu0 %v739_v60, %s7642_s9 }
 0x2f9   :  { %1305 = vrot.lane.b32.xlu0 %v1303_v62, %s7639_s0 }
 0x2fd   :  { %440 = vrot.lane.b32.xlu0 %v436_v4, %s7642_s9 }
 0x301   :  { %730 = vrot.lane.b32.xlu0 %v728_v6, %s7641_s5 }
 0x368   :  { %v639_v8 = vpop.xlane.xlu0 %638 }
 0x369   :  { %v640_v12 = vmax.f32 %v639_v8, 1e-16 }
 0x36b   :  { %7413 = vrcp.f32 %v640_v12 }
 0x36c   :  { %v418_v13 = vpop.permute.xlu0 %417 }
 0x36d   :  { %v420_v15 = vmul.f32 %v418_v13, %v7911_v18 }
 0x36f   :  { %422 = vrot.lane.b32.xlu1 %v420_v15, %s7642_s9 }
 0x370   :  { %v742_v16 = vpop.permute.xlu0 %741 }
 0x371   :  { %v745_v20 = vmul.f32 %v7909_v17, %v742_v16  ;;  %v744_v23 = vmul.f32 %v742_v16, %v7911_v18  ;;  %v993_v17 = vrot.slane %v7956_v57, %v8013_v36 }
 0x373   :  { %442 = vrot.lane.b32.xlu1 %v437_v19, %s7642_s9  ;;  %750 = vrot.lane.b32.xlu0 %v745_v20, %s7641_s5 }
 0x374   :  { %v1306_v31 = vpop.permute.xlu0 %1305 }
 0x375   :  { %v7414_v22 = vpop.eup %7413 }
 0x376   :  { %v642_v24 = vmul.f32 %v7414_v22, %v636_v55  ;;  %v1002_v55 = vrot.slane %v7967_v61, %v8013_v36 }
 0x377   :  { %748 = vrot.lane.b32.xlu1 %v744_v23, %s7641_s5 }
 0x378   :  { %6734 = vmatmul.mubr.msk.f32.vlgmr.msra.gmra.mrb[2].mxu0 %vm335_vm12, %v642_v24  ;;  %v441_v47 = vpop.permute.xlu0 %440 }
 0x379   :  { %7186 = vmatpush3.bf16.msra.mxu0 %v7183_v3  ;;  %6745 = vmatprep.mubr.msk.f32.mxu0 %vm187_vm1, %v908_v25  ;;  %v446_v51 = vsel %vm284_vm3, %v441_v47, 0.0 }
 0x37a   :  { %6753 = vmatprep.subr.mxu0 %v7640_v14 }
 0x37c   :  { %6746 = vmatmul.mubr.msk.f32.vlgmr.msra.gmra.mrb[4].mxu0 %vm187_vm1, %v905_v21  ;;  %v731_v52 = vpop.permute.xlu0 %730 }
 0x37d   :  { %6755 = vmatprep.mubr.msk.f32.mxu0 %vm7643_vm10, %v7640_v14  ;;  %v733_v56 = vsel %vm274_vm2, %v731_v52, 0.0 }
 0x3e1   :  { %v423_v43 = vpop.permute.xlu1 %422 }
 0x3e2   :  { %v425_v9 = vsel %vm274_vm2, %v423_v43, 0.0 }
 0x3e5   :  { %v443_v45 = vpop.permute.xlu1 %442  ;;  %v751_v58 = vpop.permute.xlu0 %750 }
 0x3e6   :  { %v449_v11 = vsel %vm288_vm4, %v443_v45, 0.0  ;;  %v757_v62 = vsel %vm288_vm4, %v751_v58, 0.0 }
 0x3e9   :  { %v749_v50 = vpop.permute.xlu1 %748 }
 0x3ea   :  { %v754_v53 = vsel %vm284_vm3, %v749_v50, 0.0 }
 0x44b   :  { %v8000_v26 = vpop.f32.mrb[2].mxu0 }
 0x44c   :  { %v6735_v27 = vpop.f32.mrb[3].mxu0 }
 0x44f   :  { %v8002_v30 = vpop.f32.mrb[4].mxu0 }
 0x450   :  { %v8004_v32 = vpop.f32.mrb[5].mxu0  ;;  %v1309_v35 = vmul.f32 %v8002_v30, %v1306_v31  ;;  %v1004_v60 = vmul.f32 %v8002_v30, %v1002_v55 }
 0x451   :  { %v1308_v33 = vmul.f32 %v1306_v31, %v8004_v32  ;;  %v1292_v34 = vmul.f32 %v1290_v28, %v8004_v32  ;;  %v994_v54 = vmul.f32 %v993_v17, %v8004_v32  ;;  %v1003_v63 = vmul.f32 %v1002_v55, %v8004_v32 }
 0x452   :  { %v1010_v0 = vsel %vm1009_vm14, %v1004_v60, 0.0 }
 0x453   :  { %1312 = vrot.lane.b32.xlu0 %v1308_v33, %s7639_s0  ;;  %1294 = vrot.lane.b32.xlu1 %v1292_v34, %s7639_s0  ;;  %v996_v59 = vsel %vm995_vm13, %v994_v54, 0.0  ;;  %v1006_v1 = vsel %vm1005_vm15, %v1003_v63, 0.0 }
 0x457   :  { %1314 = vrot.lane.b32.xlu1 %v1309_v35, %s7639_s0 }
 0x472   :  { %276 = vadd.xlane.f32.xlu0 %v275_v41 }
 0x476   :  { %290 = vadd.xlane.f32.xlu0 %v289_v44 }
 0x47a   :  { %426 = vadd.xlane.f32.xlu0 %v425_v9 }
 0x47b   :  { %286 = vadd.xlane.f32.xlu1 %v285_v49 }
 0x47e   :  { %450 = vadd.xlane.f32.xlu0 %v449_v11 }
 0x47f   :  { %447 = vadd.xlane.f32.xlu1 %v446_v51 }
 0x482   :  { %755 = vadd.xlane.f32.xlu0 %v754_v53 }
 0x483   :  { %734 = vadd.xlane.f32.xlu1 %v733_v56 }
 0x486   :  { %997 = vadd.xlane.f32.xlu0 %v996_v59 }
 0x487   :  { %758 = vadd.xlane.f32.xlu1 %v757_v62 }
 0x48a   :  { %1011 = vadd.xlane.f32.xlu0 %v1010_v0 }
 0x48b   :  { %1007 = vadd.xlane.f32.xlu1 %v1006_v1 }
 0x4c5   :  { %v1313_v3 = vpop.permute.xlu0 %1312  ;;  %v1295_v4 = vpop.permute.xlu1 %1294 }
 0x4c6   :  { %v1297_v5 = vsel %vm995_vm13, %v1295_v4, 0.0  ;;  %v1318_v6 = vsel %vm1005_vm15, %v1313_v3, 0.0 }
 0x4c7   :  { %1298 = vadd.xlane.f32.xlu1 %v1297_v5  ;;  %1319 = vadd.xlane.f32.xlu0 %v1318_v6 }
 0x4c9   :  { %v1315_v8 = vpop.permute.xlu1 %1314 }
 0x4ca   :  { %v1321_v12 = vsel %vm1009_vm14, %v1315_v8, 0.0 }
 0x4cb   :  { %1322 = vadd.xlane.f32.xlu1 %v1321_v12 }
 0x4ff   :  { %v277_v13 = vpop.xlane.xlu0 %276 }
 0x500   :  { %v298_v15 = vrot.slane %v277_v13, %v7926_v29  ;;  %v8060_v13 = vld [vmem:[%s7688_s21] sm:$0x3f]  ;;  %s9069_s21 = sld [smem:[#allocation10_spill]] }
 0x503   :  { %v291_v16 = vpop.xlane.xlu0 %290 }
 0x504   :  { %v306_v19 = vadd.f32 %v298_v15, %v291_v16 }
 0x506   :  { %v310_v20 = vmul.f32 0.2, %v306_v19  ;;  %vm308_vm2 = vcmp.gt.f32.partialorder %v306_v19, 0.0 }
 0x507   :  { %v427_v21 = vpop.xlane.xlu0 %426 }
 0x508   :  { %v287_v22 = vpop.xlane.xlu1 %286  ;;  %v456_v24 = vrot.slane %v427_v21, %v7926_v29  ;;  %v312_v25 = vsel %vm308_vm2, %v306_v19, %v310_v20 }
 0x509   :  { %v305_v23 = vadd.f32 %v298_v15, %v287_v22  ;;  %v317_v37 = vrot.slane %v312_v25, 5 }
 0x50b   :  { %vm307_vm3 = vcmp.gt.f32.partialorder %v305_v23, 0.0  ;;  %v309_v27 = vmul.f32 0.2, %v305_v23  ;;  %v451_v28 = vpop.xlane.xlu0 %450 }
 0x50c   :  { %v462_v31 = vadd.f32 %v456_v24, %v451_v28  ;;  %v448_v33 = vpop.xlane.xlu1 %447 }
 0x50d   :  { %v311_v34 = vsel %vm307_vm3, %v305_v23, %v309_v27  ;;  %v461_v35 = vadd.f32 %v456_v24, %v448_v33 }
 0x50e   :  { %v316_v38 = vrot.slane %v311_v34, 5  ;;  %vm464_vm4 = vcmp.gt.f32.partialorder %v462_v31, 0.0  ;;  %v466_v40 = vmul.f32 0.2, %v462_v31 }
 0x50f   :  { %vm463_vm5 = vcmp.gt.f32.partialorder %v461_v35, 0.0  ;;  %v465_v41 = vmul.f32 0.2, %v461_v35  ;;  %v756_v42 = vpop.xlane.xlu0 %755 }
 0x510   :  { %v468_v43 = vsel %vm464_vm4, %v462_v31, %v466_v40  ;;  %v735_v44 = vpop.xlane.xlu1 %734  ;;  %v318_v7 = vsel %vm315_vm7, %v316_v38, %v317_v37 }
 0x511   :  { %v472_v45 = vrot.slane %v468_v43, 5  ;;  %v467_v47 = vsel %vm463_vm5, %v461_v35, %v465_v41  ;;  %v764_v9 = vrot.slane %v735_v44, %v7926_v29  ;;  %v8050_v49 = vsel %vm268_vm8, %v318_v7, -1e+30 }
 0x512   :  { %v471_v11 = vrot.slane %v467_v47, 5  ;;  %v322_v17 = vsel %vm321_vm9, %v8050_v49, -inf  ;;  %vm1033_vm5 = vcmask 1041408  }
 0x513   :  { %v769_v50 = vadd.f32 %v764_v9, %v756_v42  ;;  %323 = vmax.xlane.f32.xlu0 %v322_v17  ;;  %v998_v51 = vpop.xlane.xlu0 %997 }
 0x514   :  { %v759_v52 = vpop.xlane.xlu1 %758  ;;  %v473_v53 = vsel %vm315_vm7, %v471_v11, %v472_v45  ;;  %v1017_v58 = vrot.slane %v998_v51, %v7926_v29 }
 0x515   :  { %vm771_vm6 = vcmp.gt.f32.partialorder %v769_v50, 0.0  ;;  %v773_v54 = vmul.f32 0.2, %v769_v50  ;;  %v770_v55 = vadd.f32 %v764_v9, %v759_v52  ;;  %v475_v56 = vsel %vm268_vm8, %v473_v53, -1e+30 }
 0x516   :  { %v476_v59 = vsel %vm321_vm9, %v475_v56, -inf }
 0x517   :  { %vm772_vm2 = vcmp.gt.f32.partialorder %v770_v55, 0.0  ;;  %v774_v60 = vmul.f32 0.2, %v770_v55  ;;  %477 = vmax.xlane.f32.xlu1 %v476_v59  ;;  %v1012_v62 = vpop.xlane.xlu0 %1011  ;;  %v775_v63 = vsel %vm771_vm6, %v769_v50, %v773_v54  ;;  %vm989_vm6 = vcmp.gt.f32.partialorder %v8060_v13, 0.0 }
 0x518   :  { %v1024_v0 = vadd.f32 %v1017_v58, %v1012_v62  ;;  %v1008_v1 = vpop.xlane.xlu1 %1007  ;;  %v779_v8 = vrot.slane %v775_v63, 5 }
 0x519   :  { %v776_v3 = vsel %vm772_vm2, %v770_v55, %v774_v60  ;;  %v1023_v4 = vadd.f32 %v1017_v58, %v1008_v1  ;;  %vm1039_vm2 = vcmask 46080  }
 0x51a   :  { %v780_v5 = vrot.slane %v776_v3, 5  ;;  %vm1026_vm3 = vcmp.gt.f32.partialorder %v1024_v0, 0.0  ;;  %v1028_v6 = vmul.f32 0.2, %v1024_v0 }
 0x51b   :  { %vm1025_vm4 = vcmp.gt.f32.partialorder %v1023_v4, 0.0  ;;  %v1027_v12 = vmul.f32 0.2, %v1023_v4 }
 0x51c   :  { %v1030_v15 = vsel %vm1026_vm3, %v1024_v0, %v1028_v6  ;;  %v781_v16 = vsel %vm315_vm7, %v779_v8, %v780_v5 }
 0x51d   :  { %v1035_v19 = vrot.slane %v1030_v15, 6  ;;  %v1029_v20 = vsel %vm1025_vm4, %v1023_v4, %v1027_v12  ;;  %v783_v21 = vsel %vm268_vm8, %v781_v16, -1e+30  ;;  %v1441_v15 = vrot.slane %v7956_v57, %v7945_v48  ;;  %v8108_v16 = vld [vmem:[%s7743_s20] sm:$0xf]  ;;  %s9077_s20 = sld [smem:[#allocation20_spill]] }
 0x51e   :  { %v1034_v22 = vrot.slane %v1029_v20, 6  ;;  %v784_v23 = vsel %vm321_vm9, %v783_v21, -inf  ;;  %v8117_v20 = vld [vmem:[%s7748_s27] sm:$0xf]  ;;  %s9078_s27 = sld [smem:[#allocation16_spill]] }
 0x51f   :  { %785 = vmax.xlane.f32.xlu0 %v784_v23 }
 0x520   :  { %v1036_v24 = vsel %vm1033_vm5, %v1034_v22, %v1035_v19  ;;  %v1822_v19 = vrot.slane %v8108_v16, %v7938_v46 }
 0x521   :  { %v1038_v25 = vsel %vm989_vm6, %v1036_v24, -1e+30 }
 0x522   :  { %v1040_v27 = vsel %vm1039_vm2, %v1038_v25, -inf }
 0x523   :  { %1041 = vmax.xlane.f32.xlu1 %v1040_v27 }
 0x554   :  { %v1299_v28 = vpop.xlane.xlu1 %1298  ;;  %v1320_v33 = vpop.xlane.xlu0 %1319 }
 0x555   :  { %v1328_v31 = vrot.slane %v1299_v28, %v7926_v29  ;;  %v1457_v28 = vrot.slane %v7967_v61, %v7945_v48 }
 0x557   :  { %v1333_v34 = vadd.f32 %v1328_v31, %v1320_v33  ;;  %v2094_v33 = vrot.slane %v8108_v16, %v7945_v48 }
 0x558   :  { %v1323_v35 = vpop.xlane.xlu1 %1322 }
 0x559   :  { %vm1335_vm7 = vcmp.gt.f32.partialorder %v1333_v34, 0.0  ;;  %v1337_v37 = vmul.f32 0.2, %v1333_v34  ;;  %v1334_v38 = vadd.f32 %v1328_v31, %v1323_v35  ;;  %v1838_v31 = vrot.slane %v8117_v20, %v7938_v46 }
 0x55b   :  { %v1339_v40 = vsel %vm1335_vm7, %v1333_v34, %v1337_v37  ;;  %vm1336_vm3 = vcmp.gt.f32.partialorder %v1334_v38, 0.0  ;;  %v1338_v41 = vmul.f32 0.2, %v1334_v38  ;;  %v2110_v34 = vrot.slane %v8117_v20, %v7945_v48 }
 0x55c   :  { %v1343_v43 = vrot.slane %v1339_v40, 6 }
 0x55d   :  { %v1340_v42 = vsel %vm1336_vm3, %v1334_v38, %v1338_v41  ;;  %vm1729_vm3 = vcmask 41984  }
 0x55e   :  { %v1344_v44 = vrot.slane %v1340_v42, 6 }
 0x560   :  { %v1345_v7 = vsel %vm1033_vm5, %v1343_v43, %v1344_v44 }
 0x561   :  { %v1347_v45 = vsel %vm989_vm6, %v1345_v7, -1e+30 }
 0x562   :  { %v1348_v47 = vsel %vm1039_vm2, %v1347_v45, -inf }
 0x563   :  { %1349 = vmax.xlane.f32.xlu0 %v1348_v47 }
 0x5a0   :  { %v324_v9 = vpop.xlane.xlu0 %323 }
 0x5a1   :  { %v325_v11 = vsub.f32 %v8050_v49, %v324_v9 }
 0x5a3   :  { %v326_v17 = vmul.f32 1.442695, %v325_v11 }
 0x5a4   :  { %v478_v50 = vpop.xlane.xlu1 %477 }
 0x5a5   :  { %7415 = vpow2.f32 %v326_v17  ;;  %v479_v51 = vsub.f32 %v475_v56, %v478_v50 }
 0x5a7   :  { %v480_v52 = vmul.f32 1.442695, %v479_v51 }
 0x5a9   :  { %7417 = vpow2.f32 %v480_v52 }
 0x5ac   :  { %v786_v53 = vpop.xlane.xlu0 %785 }
 0x5ad   :  { %v787_v54 = vsub.f32 %v783_v21, %v786_v53  ;;  %v1974_v21 = vrot.slane %v8117_v20, %v7895_v10 }
 0x5af   :  { %v7416_v55 = vpop.eup %7415  ;;  %v788_v58 = vmul.f32 1.442695, %v787_v54 }
 0x5b0   :  { %v1042_v59 = vpop.xlane.xlu1 %1041  ;;  %v328_v60 = vsel %vm268_vm8, %v7416_v55, 0.0 }
 0x5b1   :  { %7419 = vpow2.f32 %v788_v58  ;;  %v1043_v62 = vsub.f32 %v1038_v25, %v1042_v59  ;;  %v329_v63 = vsel %vm321_vm9, %v328_v60, 0.0  ;;  %v7644_v59 = vmov 0.0|0.0  }
 0x5b2   :  { %330 = vadd.xlane.f32.xlu1 %v329_v63 }
 0x5b3   :  { %v7418_v49 = vpop.eup %7417  ;;  %v1044_v0 = vmul.f32 1.442695, %v1043_v62 }
 0x5b4   :  { %v8082_v56 = vsel %vm268_vm8, %v7418_v49, 0.0 }
 0x5b5   :  { %7421 = vpow2.f32 %v1044_v0  ;;  %v483_v1 = vsel %vm321_vm9, %v8082_v56, 0.0  ;;  %v1615_v0 = vld [vmem:[%s7738_s12] sm:$0xff] }
 0x5b6   :  { %484 = vadd.xlane.f32.xlu0 %v483_v1  ;;  %v175_v1 = vld [vmem:[%s7678_s13] sm:$0x3]  ;;  %s9067_s13 = sld [smem:[#allocation9_spill]] }
 0x5bb   :  { %v7420_v3 = vpop.eup %7419 }
 0x5bc   :  { %v8088_v4 = vsel %vm268_vm8, %v7420_v3, 0.0 }
 0x5bd   :  { %v791_v5 = vsel %vm321_vm9, %v8088_v4, 0.0 }
 0x5be   :  { %792 = vadd.xlane.f32.xlu1 %v791_v5 }
 0x5bf   :  { %v7422_v6 = vpop.eup %7421 }
 0x5c0   :  { %v8094_v8 = vsel %vm989_vm6, %v7422_v6, 0.0 }
 0x5c1   :  { %v1047_v12 = vsel %vm1039_vm2, %v8094_v8, 0.0 }
 0x5c2   :  { %1048 = vadd.xlane.f32.xlu0 %v1047_v12  ;;  %v1622_v12 = vrot.slane %v175_v1, 2 }
 0x5cf   :  { %797 = vrot.lane.b32.xlu1 %v7911_v18, %s7641_s5 }
 0x5d8   :  { %489 = vrot.lane.b32.xlu0 %v7911_v18, %s7642_s9  ;;  %v1958_v18 = vrot.slane %v8108_v16, %v7895_v10  ;;  %v1149_v10 = vrot.slane %v7967_v61, %v7938_v46 }
 0x5dc   :  { %1135 = vrot.lane.b32.xlu0 %v1133_v39, %s7641_s5 }
 0x5e0   :  { %1443 = vrot.lane.b32.xlu0 %v1441_v15, %s7642_s9 }
 0x5e4   :  { %1824 = vrot.lane.b32.xlu0 %v1822_v19, %s7641_s5  ;;  %v1624_v19 = vsel %vm907_vm11, %v7883_v2, %v1622_v12 }
 0x5e8   :  { %1960 = vrot.lane.b32.xlu0 %v1958_v18, %s7639_s0 }
 0x5ec   :  { %1976 = vrot.lane.b32.xlu0 %v1974_v21, %s7639_s0 }
 0x5f0   :  { %v1350_v57 = vpop.xlane.xlu0 %1349 }
 0x5f1   :  { %v1351_v22 = vsub.f32 %v1347_v45, %v1350_v57 }
 0x5f3   :  { %v1352_v23 = vmul.f32 1.442695, %v1351_v22 }
 0x5f5   :  { %7423 = vpow2.f32 %v1352_v23 }
 0x5ff   :  { %v7424_v24 = vpop.eup %7423 }
 0x600   :  { %v8125_v25 = vsel %vm989_vm6, %v7424_v24, 0.0 }
 0x601   :  { %v1355_v27 = vsel %vm1039_vm2, %v8125_v25, 0.0 }
 0x602   :  { %1356 = vadd.xlane.f32.xlu1 %v1355_v27 }
 0x613   :  { %1361 = vrot.lane.b32.xlu1 %v8004_v32, %s7639_s0 }
 0x617   :  { %1151 = vrot.lane.b32.xlu1 %v1149_v10, %s7641_s5 }
 0x61b   :  { %1459 = vrot.lane.b32.xlu1 %v1457_v28, %s7642_s9 }
 0x61f   :  { %1840 = vrot.lane.b32.xlu1 %v1838_v31, %s7641_s5 }
 0x623   :  { %2096 = vrot.lane.b32.xlu1 %v2094_v33, %s7642_s9 }
 0x627   :  { %2112 = vrot.lane.b32.xlu1 %v2110_v34, %s7642_s9 }
 0x63f   :  { %v331_v35 = vpop.xlane.xlu1 %330 }
 0x640   :  { %v332_v37 = vmax.f32 %v331_v35, 1e-16 }
 0x642   :  { %7425 = vrcp.f32 %v332_v37 }
 0x643   :  { %v485_v61 = vpop.xlane.xlu0 %484 }
 0x644   :  { %v486_v38 = vmax.f32 %v485_v61, 1e-16 }
 0x646   :  { %7427 = vrcp.f32 %v486_v38 }
 0x64b   :  { %v793_v40 = vpop.xlane.xlu1 %792 }
 0x64c   :  { %v7426_v41 = vpop.eup %7425  ;;  %v794_v42 = vmax.f32 %v793_v40, 1e-16 }
 0x64d   :  { %v334_v43 = vmul.f32 %v7426_v41, %v328_v60 }
 0x64e   :  { %7429 = vrcp.f32 %v794_v42 }
 0x64f   :  { %6724 = vmatmul.mubr.msk.f32.vlgmr.msra.gmra.mrb[0].mxu1 %vm335_vm12, %v334_v43  ;;  %v1049_v44 = vpop.xlane.xlu0 %1048  ;;  %v798_v9 = vpop.permute.xlu1 %797 }
 0x650   :  { %v7428_v7 = vpop.eup %7427  ;;  %v1050_v45 = vmax.f32 %v1049_v44, 1e-16  ;;  %6728 = vmatprep.mubr.msk.f32.mxu1 %vm7643_vm10, %v7640_v14 }
 0x651   :  { %v488_v47 = vmul.f32 %v7428_v7, %v8082_v56  ;;  %v1616_v56 = vld [vmem:[%s7738_s12 + $0x8] sm:$0xff]  ;;  %s9076_s12 = sld [smem:[#allocation17_spill]] }
 0x652   :  { %7431 = vrcp.f32 %v1050_v45 }
 0x653   :  { %v490_v48 = vpop.permute.xlu0 %489 }
 0x654   :  { %6727 = vmatpush3.msk.msra.mxu1 %vm185_vm0, %v490_v48 }
 0x655   :  { %6729 = vmatmul.mubr.msk.f32.vlgmr.msra.gmra.mrb[2].mxu1 %vm335_vm12, %v488_v47  ;;  %6736 = vmatprep.subr.mxu1 %v7640_v14 }
 0x656   :  { %6737 = vmatpush3.msk.msra.mxu1 %vm185_vm0, %v798_v9  ;;  %6738 = vmatprep.mubr.msk.f32.mxu1 %vm7643_vm10, %v7640_v14  ;;  %vm1053_vm0 = vcmask 48128  }
 0x657   :  { %v1136_v11 = vpop.permute.xlu0 %1135  ;;  %6748 = vmatprep.subr.mxu1 %v7640_v14 }
 0x658   :  { %v7430_v17 = vpop.eup %7429  ;;  %v1138_v50 = vmul.f32 %v1136_v11, %v8004_v32 }
 0x659   :  { %v796_v51 = vmul.f32 %v7430_v17, %v8088_v4 }
 0x65a   :  { %1140 = vrot.lane.b32.xlu0 %v1138_v50, %s7642_s9  ;;  %v1702_v50 = vrot.slane %v8108_v16, %v8013_v36 }
 0x65b   :  { %6739 = vmatmul.mubr.msk.f32.vlgmr.msra.gmra.mrb[4].mxu1 %vm335_vm12, %v796_v51  ;;  %v1444_v49 = vpop.permute.xlu0 %1443 }
 0x65c   :  { %v7432_v52 = vpop.eup %7431  ;;  %6749 = vmatpush3.msk.msra.mxu1 %vm907_vm11, %v8004_v32  ;;  %6750 = vmatprep.mubr.msk.f32.mxu1 %vm7643_vm10, %v7640_v14  ;;  %v1446_v5 = vmul.f32 %v1444_v49, %v8004_v32 }
 0x65d   :  { %v1052_v53 = vmul.f32 %v7432_v52, %v8094_v8  ;;  %6758 = vmatprep.subr.mxu1 %v7640_v14  ;;  %v7188_v8 = vpack.c.bf16 %v1616_v56, %v1615_v0 }
 0x65f   :  { %6751 = vmatmul.mubr.msk.f32.vlgmr.msra.gmra.mrb[6].mxu1 %vm1053_vm0, %v1052_v53 }
 0x660   :  { %6760 = vmatprep.mubr.msk.f32.mxu1 %vm7643_vm10, %v7640_v14 }
 0x68f   :  { %v1357_v54 = vpop.xlane.xlu1 %1356 }
 0x690   :  { %v1358_v55 = vmax.f32 %v1357_v54, 1e-16 }
 0x692   :  { %7433 = vrcp.f32 %v1358_v55 }
 0x693   :  { %v1362_v58 = vpop.permute.xlu1 %1361 }
 0x694   :  { %6759 = vmatpush3.msk.msra.mxu1 %vm907_vm11, %v1362_v58  ;;  %v1710_v58 = vrot.slane %v8117_v20, %v8013_v36 }
 0x695   :  { %7187 = vmatprep.subr.bf16.mxu1 %v7644_v59 }
 0x697   :  { %v1152_v60 = vpop.permute.xlu1 %1151 }
 0x698   :  { %v1154_v62 = vmul.f32 %v1152_v60, %v8004_v32  ;;  %v1155_v63 = vmul.f32 %v8002_v30, %v1152_v60 }
 0x69a   :  { %1158 = vrot.lane.b32.xlu1 %v1154_v62, %s7642_s9  ;;  %1160 = vrot.lane.b32.xlu0 %v1155_v63, %s7642_s9 }
 0x69b   :  { %v1460_v3 = vpop.permute.xlu1 %1459 }
 0x69c   :  { %v7434_v4 = vpop.eup %7433  ;;  %v1462_v6 = vmul.f32 %v1460_v3, %v8004_v32  ;;  %v1463_v15 = vmul.f32 %v8002_v30, %v1460_v3 }
 0x69d   :  { %v1360_v39 = vmul.f32 %v7434_v4, %v8125_v25  ;;  %v1825_v25 = vpop.permute.xlu0 %1824 }
 0x69e   :  { %1466 = vrot.lane.b32.xlu0 %v1462_v6, %s7641_s5  ;;  %1448 = vrot.lane.b32.xlu1 %v1446_v5, %s7641_s5 }
 0x69f   :  { %6761 = vmatmul.mubr.msk.f32.vlgmr.msra.gmra.mrb[8].mxu1 %vm1053_vm0, %v1360_v39  ;;  %v1841_v27 = vpop.permute.xlu1 %1840 }
 0x6a0   :  { %7189 = vmatpush3.bf16.msra.mxu1 %v7188_v8  ;;  %6772 = vmatprep.mubr.msk.f32.mxu1 %vm7643_vm10, %v7640_v14 }
 0x6a1   :  { %6780 = vmatprep.subr.mxu1 %v7640_v14  ;;  %v1961_v37 = vpop.permute.xlu0 %1960 }
 0x6a2   :  { %1468 = vrot.lane.b32.xlu1 %v1463_v15, %s7641_s5 }
 0x6a3   :  { %6773 = vmatmul.mubr.msk.f32.vlgmr.msra.gmra.mrb[10].mxu1 %vm187_vm1, %v1624_v19  ;;  %v2097_v61 = vpop.permute.xlu1 %2096 }
 0x6a4   :  { %6782 = vmatprep.mubr.msk.f32.mxu1 %vm7643_vm10, %v7640_v14 }
 0x6a5   :  { %v1977_v41 = vpop.permute.xlu0 %1976 }
 0x6a7   :  { %v2113_v42 = vpop.permute.xlu1 %2112 }
 0x6cc   :  { %v1141_v7 = vpop.permute.xlu0 %1140 }
 0x6cd   :  { %v1143_v47 = vsel %vm995_vm13, %v1141_v7, 0.0 }
 0x70c   :  { %v1159_v45 = vpop.permute.xlu1 %1158  ;;  %v1161_v48 = vpop.permute.xlu0 %1160 }
 0x70d   :  { %v1167_v11 = vsel %vm1009_vm14, %v1161_v48, 0.0  ;;  %v1164_v17 = vsel %vm1005_vm15, %v1159_v45, 0.0 }
 0x710   :  { %v1449_v9 = vpop.permute.xlu1 %1448  ;;  %v1467_v51 = vpop.permute.xlu0 %1466 }
 0x711   :  { %v1451_v52 = vsel %vm995_vm13, %v1449_v9, 0.0  ;;  %v1472_v54 = vsel %vm1005_vm15, %v1467_v51, 0.0 }
 0x714   :  { %v1469_v53 = vpop.permute.xlu1 %1468 }
 0x715   :  { %v1475_v60 = vsel %vm1009_vm14, %v1469_v53, 0.0 }
 0x722   :  { %v8195_v18 = vpop.f32.mrb[0].mxu1 }
 0x723   :  { %v6725_v21 = vpop.f32.mrb[1].mxu1 }
 0x728   :  { %v8197_v30 = vpop.f32.mrb[2].mxu1 }
 0x729   :  { %v6730_v57 = vpop.f32.mrb[3].mxu1 }
 0x72e   :  { %v8199_v22 = vpop.f32.mrb[4].mxu1 }
 0x72f   :  { %v6740_v23 = vpop.f32.mrb[5].mxu1 }
 0x732   :  { %v8201_v24 = vpop.f32.mrb[6].mxu1 }
 0x733   :  { %v6752_v2 = vpop.f32.mrb[7].mxu1 }
 0x772   :  { %v8203_v10 = vpop.f32.mrb[8].mxu1 }
 0x773   :  { %v6762_v28 = vpop.f32.mrb[9].mxu1 }
 0x776   :  { %v8205_v31 = vpop.f32.mrb[10].mxu1 }
 0x777   :  { %v6774_v33 = vpop.f32.mrb[11].mxu1  ;;  %v1843_v34 = vmul.f32 %v1841_v27, %v8205_v31  ;;  %v1827_v35 = vmul.f32 %v1825_v25, %v8205_v31  ;;  %v2099_v38 = vmul.f32 %v2097_v61, %v8205_v31  ;;  %v1963_v40 = vmul.f32 %v1961_v37, %v8205_v31 }
 0x778   :  { %v2115_v43 = vmul.f32 %v2113_v42, %v8205_v31  ;;  %v1979_v44 = vmul.f32 %v1977_v41, %v8205_v31  ;;  %v1703_v55 = vmul.f32 %v1702_v50, %v8205_v31  ;;  %v1711_v16 = vmul.f32 %v1710_v58, %v8205_v31 }
 0x779   :  { %1845 = vrot.lane.b32.xlu1 %v1843_v34, %s7642_s9  ;;  %1829 = vrot.lane.b32.xlu0 %v1827_v35, %s7642_s9 }
 0x77a   :  { %v1704_v62 = vsel %vm995_vm13, %v1703_v55, 0.0  ;;  %v1712_v63 = vsel %vm1005_vm15, %v1711_v16, 0.0 }
 0x77d   :  { %2101 = vrot.lane.b32.xlu1 %v2099_v38, %s7641_s5  ;;  %1965 = vrot.lane.b32.xlu0 %v1963_v40, %s7639_s0 }
 0x781   :  { %2117 = vrot.lane.b32.xlu1 %v2115_v43, %s7641_s5  ;;  %1981 = vrot.lane.b32.xlu0 %v1979_v44, %s7639_s0 }
 0x7a0   :  { %1144 = vadd.xlane.f32.xlu0 %v1143_v47 }
 0x7a4   :  { %1168 = vadd.xlane.f32.xlu0 %v1167_v11 }
 0x7a5   :  { %1165 = vadd.xlane.f32.xlu1 %v1164_v17 }
 0x7a8   :  { %1452 = vadd.xlane.f32.xlu0 %v1451_v52 }
 0x7a9   :  { %1473 = vadd.xlane.f32.xlu1 %v1472_v54  ;;  %v8247_v54 = vld [vmem:[%s9067_s13] sm:$0x3]  ;;  %s7655_s13 = smov 16  }
 0x7aa   :  { %vm1698_vm7 = vcmp.gt.f32.partialorder %v8247_v54, 0.0  ;;  %v2561_v54 = vld [vmem:[%s9075_s30 + $0x8] sm:$0xff] }
 0x7ac   :  { %1476 = vadd.xlane.f32.xlu0 %v1475_v60 }
 0x7ad   :  { %1705 = vadd.xlane.f32.xlu1 %v1704_v62 }
 0x7b1   :  { %1713 = vadd.xlane.f32.xlu1 %v1712_v63 }
 0x7eb   :  { %v1846_v49 = vpop.permute.xlu1 %1845  ;;  %v1830_v0 = vpop.permute.xlu0 %1829 }
 0x7ec   :  { %v1832_v56 = vsel %vm995_vm13, %v1830_v0, 0.0  ;;  %v1848_v20 = vsel %vm1005_vm15, %v1846_v49, 0.0 }
 0x7ed   :  { %1833 = vadd.xlane.f32.xlu0 %v1832_v56 }
 0x7ef   :  { %v2102_v1 = vpop.permute.xlu1 %2101  ;;  %v1966_v3 = vpop.permute.xlu0 %1965 }
 0x7f0   :  { %v1968_v4 = vsel %vm995_vm13, %v1966_v3, 0.0  ;;  %v2104_v6 = vsel %vm995_vm13, %v2102_v1, 0.0 }
 0x7f1   :  { %1849 = vadd.xlane.f32.xlu0 %v1848_v20  ;;  %1969 = vadd.xlane.f32.xlu1 %v1968_v4 }
 0x7f3   :  { %v1982_v5 = vpop.permute.xlu0 %1981  ;;  %v2118_v12 = vpop.permute.xlu1 %2117 }
 0x7f4   :  { %v1984_v8 = vsel %vm1005_vm15, %v1982_v5, 0.0  ;;  %v2120_v39 = vsel %vm1005_vm15, %v2118_v12, 0.0 }
 0x7f5   :  { %2105 = vadd.xlane.f32.xlu0 %v2104_v6  ;;  %1985 = vadd.xlane.f32.xlu1 %v1984_v8 }
 0x7f9   :  { %2121 = vadd.xlane.f32.xlu0 %v2120_v39 }
 0x82d   :  { %v1145_v15 = vpop.xlane.xlu0 %1144 }
 0x82e   :  { %v1174_v19 = vrot.slane %v1145_v15, %v7926_v29 }
 0x831   :  { %v1169_v21 = vpop.xlane.xlu0 %1168 }
 0x832   :  { %v1180_v57 = vadd.f32 %v1174_v19, %v1169_v21  ;;  %v1166_v23 = vpop.xlane.xlu1 %1165 }
 0x833   :  { %v1179_v2 = vadd.f32 %v1174_v19, %v1166_v23 }
 0x834   :  { %vm1182_vm8 = vcmp.gt.f32.partialorder %v1180_v57, 0.0  ;;  %v1184_v25 = vmul.f32 0.2, %v1180_v57 }
 0x835   :  { %vm1181_vm9 = vcmp.gt.f32.partialorder %v1179_v2, 0.0  ;;  %v1183_v27 = vmul.f32 0.2, %v1179_v2  ;;  %v1453_v28 = vpop.xlane.xlu0 %1452 }
 0x836   :  { %v1186_v33 = vsel %vm1182_vm8, %v1180_v57, %v1184_v25  ;;  %v1482_v34 = vrot.slane %v1453_v28, %v7926_v29  ;;  %v1474_v35 = vpop.xlane.xlu1 %1473 }
 0x837   :  { %v1190_v37 = vrot.slane %v1186_v33, 6  ;;  %v1185_v61 = vsel %vm1181_vm9, %v1179_v2, %v1183_v27 }
 0x838   :  { %v1189_v38 = vrot.slane %v1185_v61, 6  ;;  %v1487_v40 = vadd.f32 %v1482_v34, %v1474_v35 }
 0x839   :  { %v1477_v41 = vpop.xlane.xlu0 %1476 }
 0x83a   :  { %vm1489_vm12 = vcmp.gt.f32.partialorder %v1487_v40, 0.0  ;;  %v1491_v42 = vmul.f32 0.2, %v1487_v40  ;;  %v1488_v43 = vadd.f32 %v1482_v34, %v1477_v41  ;;  %v1706_v44 = vpop.xlane.xlu1 %1705  ;;  %v1191_v7 = vsel %vm1033_vm5, %v1189_v38, %v1190_v37 }
 0x83b   :  { %v1193_v45 = vsel %vm989_vm6, %v1191_v7, -1e+30  ;;  %v1719_v11 = vrot.slane %v1706_v44, %v7926_v29 }
 0x83c   :  { %v1493_v48 = vsel %vm1489_vm12, %v1487_v40, %v1491_v42  ;;  %vm1490_vm14 = vcmp.gt.f32.partialorder %v1488_v43, 0.0  ;;  %v1492_v47 = vmul.f32 0.2, %v1488_v43  ;;  %v1194_v9 = vsel %vm1039_vm2, %v1193_v45, -inf }
 0x83d   :  { %1195 = vmax.xlane.f32.xlu1 %v1194_v9  ;;  %v1497_v51 = vrot.slane %v1493_v48, 6  ;;  %vm890_vm12 = vcmask 785408  }
 0x83e   :  { %v1494_v17 = vsel %vm1490_vm14, %v1488_v43, %v1492_v47  ;;  %v1714_v50 = vpop.xlane.xlu1 %1713 }
 0x83f   :  { %v1498_v52 = vrot.slane %v1494_v17, 6  ;;  %v1721_v53 = vadd.f32 %v1719_v11, %v1714_v50 }
 0x841   :  { %v1723_v55 = vmul.f32 0.2, %v1721_v53  ;;  %v1499_v58 = vsel %vm1033_vm5, %v1497_v51, %v1498_v52  ;;  %vm1722_vm4 = vcmp.gt.f32.partialorder %v1721_v53, 0.0 }
 0x842   :  { %v1501_v60 = vsel %vm989_vm6, %v1499_v58, -1e+30 }
 0x843   :  { %v1502_v62 = vsel %vm1039_vm2, %v1501_v60, -inf  ;;  %v1724_v16 = vsel %vm1722_vm4, %v1721_v53, %v1723_v55  ;;  %vm2753_vm4 = vcmask 31744  }
 0x844   :  { %1503 = vmax.xlane.f32.xlu0 %v1502_v62  ;;  %v1726_v63 = vrot.slane %v1724_v16, 6 }
 0x846   :  { %v1728_v49 = vsel %vm1698_vm7, %v1726_v63, -1e+30 }
 0x847   :  { %v1730_v0 = vsel %vm1729_vm3, %v1728_v49, -inf }
 0x848   :  { %1731 = vmax.xlane.f32.xlu1 %v1730_v0 }
 0x87a   :  { %v1834_v56 = vpop.xlane.xlu0 %1833 }
 0x87b   :  { %v1855_v1 = vrot.slane %v1834_v56, %v7926_v29 }
 0x87e   :  { %v1970_v3 = vpop.xlane.xlu1 %1969  ;;  %v1850_v20 = vpop.xlane.xlu0 %1849 }
 0x87f   :  { %v1857_v4 = vadd.f32 %v1855_v1, %v1850_v20  ;;  %v1991_v5 = vrot.slane %v1970_v3, %v7926_v29 }
 0x881   :  { %v1859_v6 = vmul.f32 0.2, %v1857_v4  ;;  %vm1858_vm5 = vcmp.gt.f32.partialorder %v1857_v4, 0.0 }
 0x882   :  { %v1986_v8 = vpop.xlane.xlu1 %1985  ;;  %v2106_v12 = vpop.xlane.xlu0 %2105 }
 0x883   :  { %v1993_v39 = vadd.f32 %v1991_v5, %v1986_v8  ;;  %v1860_v15 = vsel %vm1858_vm5, %v1857_v4, %v1859_v6  ;;  %v2127_v57 = vrot.slane %v2106_v12, %v7926_v29  ;;  %vm4037_vm5 = vcmask 457728  }
 0x884   :  { %v1862_v19 = vrot.slane %v1860_v15, 6 }
 0x885   :  { %v1995_v21 = vmul.f32 0.2, %v1993_v39  ;;  %vm1994_vm8 = vcmp.gt.f32.partialorder %v1993_v39, 0.0 }
 0x886   :  { %v2122_v23 = vpop.xlane.xlu0 %2121  ;;  %v1864_v2 = vsel %vm1698_vm7, %v1862_v19, -1e+30 }
 0x887   :  { %v2129_v25 = vadd.f32 %v2127_v57, %v2122_v23  ;;  %v1865_v27 = vsel %vm1729_vm3, %v1864_v2, -inf  ;;  %v1996_v28 = vsel %vm1994_vm8, %v1993_v39, %v1995_v21  ;;  %vm4035_vm8 = vcmask 392192  }
 0x888   :  { %1866 = vmax.xlane.f32.xlu0 %v1865_v27  ;;  %v1998_v33 = vrot.slane %v1996_v28, 6 }
 0x889   :  { %v2131_v34 = vmul.f32 0.2, %v2129_v25  ;;  %vm2130_vm9 = vcmp.gt.f32.partialorder %v2129_v25, 0.0 }
 0x88a   :  { %v2000_v35 = vsel %vm1698_vm7, %v1998_v33, -1e+30 }
 0x88b   :  { %v2001_v37 = vsel %vm1729_vm3, %v2000_v35, -inf  ;;  %v2132_v61 = vsel %vm2130_vm9, %v2129_v25, %v2131_v34  ;;  %vm6229_vm9 = vcmask 293888  }
 0x88c   :  { %2002 = vmax.xlane.f32.xlu1 %v2001_v37  ;;  %v2134_v38 = vrot.slane %v2132_v61, 6 }
 0x88e   :  { %v2136_v40 = vsel %vm1698_vm7, %v2134_v38, -1e+30 }
 0x88f   :  { %v2137_v41 = vsel %vm1729_vm3, %v2136_v40, -inf }
 0x890   :  { %2138 = vmax.xlane.f32.xlu0 %v2137_v41 }
 0x8ca   :  { %v1196_v42 = vpop.xlane.xlu1 %1195 }
 0x8cb   :  { %v1197_v43 = vsub.f32 %v1193_v45, %v1196_v42 }
 0x8cd   :  { %v1198_v44 = vmul.f32 1.442695, %v1197_v43 }
 0x8cf   :  { %7435 = vpow2.f32 %v1198_v44 }
 0x8d1   :  { %v1504_v7 = vpop.xlane.xlu0 %1503 }
 0x8d2   :  { %v1505_v48 = vsub.f32 %v1501_v60, %v1504_v7 }
 0x8d4   :  { %v1506_v47 = vmul.f32 1.442695, %v1505_v48 }
 0x8d5   :  { %v1732_v52 = vpop.xlane.xlu1 %1731 }
 0x8d6   :  { %7437 = vpow2.f32 %v1506_v47  ;;  %v1733_v53 = vsub.f32 %v1728_v49, %v1732_v52  ;;  %v2251_v52 = vld [vmem:[%s9068_s17 + $0x10] sm:$0xff] }
 0x8d8   :  { %v1734_v55 = vmul.f32 1.442695, %v1733_v53 }
 0x8d9   :  { %v7436_v9 = vpop.eup %7435 }
 0x8da   :  { %v1200_v11 = vsel %vm989_vm6, %v7436_v9, 0.0  ;;  %7439 = vpow2.f32 %v1734_v55  ;;  %v2252_v55 = vld [vmem:[%s9068_s17 + $0x18] sm:$0xff] }
 0x8db   :  { %v1201_v17 = vsel %vm1039_vm2, %v1200_v11, 0.0 }
 0x8dc   :  { %1202 = vadd.xlane.f32.xlu1 %v1201_v17 }
 0x8e0   :  { %v7438_v50 = vpop.eup %7437 }
 0x8e1   :  { %v8274_v51 = vsel %vm989_vm6, %v7438_v50, 0.0  ;;  %vm886_vm6 = vcmask 261120  }
 0x8e2   :  { %v1509_v45 = vsel %vm1039_vm2, %v8274_v51, 0.0  ;;  %vm888_vm2 = vcmask 523264  }
 0x8e3   :  { %1510 = vadd.xlane.f32.xlu0 %v1509_v45  ;;  %v2250_v45 = vld [vmem:[%s9068_s17 + $0x8] sm:$0xff] }
 0x8e4   :  { %v7440_v13 = vpop.eup %7439 }
 0x8e5   :  { %v1736_v58 = vsel %vm1698_vm7, %v7440_v13, 0.0  ;;  %v7194_v13 = vpack.c.bf16 %v2252_v55, %v2251_v52 }
 0x8e6   :  { %v1737_v60 = vsel %vm1729_vm3, %v1736_v58, 0.0 }
 0x8ed   :  { %1207 = vrot.lane.b32.xlu1 %v8004_v32, %s7642_s9 }
 0x8f1   :  { %1878 = vrot.lane.b32.xlu1 %v8205_v31, %s7642_s9 }
 0x8f9   :  { %1515 = vrot.lane.b32.xlu0 %v8004_v32, %s7641_s5 }
 0x915   :  { %1738 = vadd.xlane.f32.xlu1 %v1737_v60  ;;  %v1867_v62 = vpop.xlane.xlu0 %1866  ;;  %v2254_v60 = vld [vmem:[%s9068_s17 + $0x28] sm:$0xff] }
 0x916   :  { %v1868_v16 = vsub.f32 %v1864_v2, %v1867_v62 }
 0x918   :  { %v1869_v63 = vmul.f32 1.442695, %v1868_v16 }
 0x919   :  { %v2003_v0 = vpop.xlane.xlu1 %2002 }
 0x91a   :  { %7441 = vpow2.f32 %v1869_v63  ;;  %v2004_v56 = vsub.f32 %v2000_v35, %v2003_v0  ;;  %v2255_v0 = vld [vmem:[%s9068_s17 + $0x30] sm:$0xff] }
 0x91c   :  { %v2005_v1 = vmul.f32 1.442695, %v2004_v56  ;;  %v2256_v56 = vld [vmem:[%s9068_s17 + $0x38] sm:$0xff] }
 0x91d   :  { %v2139_v3 = vpop.xlane.xlu0 %2138 }
 0x91e   :  { %7443 = vpow2.f32 %v2005_v1  ;;  %v2140_v32 = vsub.f32 %v2136_v40, %v2139_v3  ;;  %v7200_v1 = vpack.c.bf16 %v2256_v56, %v2255_v0  ;;  %v2257_v3 = vld [vmem:[%s9068_s17 + $0x40] sm:$0xff] }
 0x920   :  { %v2141_v49 = vmul.f32 1.442695, %v2140_v32  ;;  %v2258_v32 = vld [vmem:[%s9068_s17 + $0x48] sm:$0xff] }
 0x922   :  { %7445 = vpow2.f32 %v2141_v49 }
 0x924   :  { %v7442_v20 = vpop.eup %7441 }
 0x925   :  { %v1871_v4 = vsel %vm1698_vm7, %v7442_v20, 0.0 }
 0x926   :  { %v1872_v5 = vsel %vm1729_vm3, %v1871_v4, 0.0 }
 0x927   :  { %1873 = vadd.xlane.f32.xlu0 %v1872_v5 }
 0x928   :  { %v7444_v6 = vpop.eup %7443 }
 0x929   :  { %v8292_v8 = vsel %vm1698_vm7, %v7444_v6, 0.0  ;;  %v2259_v6 = vld [vmem:[%s9068_s17 + $0x50] sm:$0xff] }
 0x92a   :  { %v2008_v12 = vsel %vm1729_vm3, %v8292_v8, 0.0 }
 0x92b   :  { %2009 = vadd.xlane.f32.xlu1 %v2008_v12 }
 0x92c   :  { %v7446_v39 = vpop.eup %7445 }
 0x92d   :  { %v8298_v15 = vsel %vm1698_vm7, %v7446_v39, 0.0  ;;  %v2261_v39 = vld [vmem:[%s9068_s17 + $0x60] sm:$0xff] }
 0x92e   :  { %v2144_v19 = vsel %vm1729_vm3, %v8298_v15, 0.0 }
 0x92f   :  { %2145 = vadd.xlane.f32.xlu0 %v2144_v19 }
 0x93c   :  { %2014 = vrot.lane.b32.xlu1 %v8205_v31, %s7639_s0 }
 0x940   :  { %875 = vrot.lane.b32.xlu1 %v8197_v30, %s7641_s5 }
 0x944   :  { %1597 = vrot.lane.b32.xlu1 %v8203_v10, %s7639_s0 }
 0x945   :  { %2150 = vrot.lane.b32.xlu0 %v8205_v31, %s7641_s5 }
 0x948   :  { %883 = vrot.lane.b32.xlu1 %v8199_v22, %s7642_s9 }
 0x969   :  { %v1203_v21 = vpop.xlane.xlu1 %1202 }
 0x96a   :  { %v1204_v57 = vmax.f32 %v1203_v21, 1e-16  ;;  %v2263_v21 = vld [vmem:[%s9068_s17 + $0x70] sm:$0xff] }
 0x96c   :  { %7447 = vrcp.f32 %v1204_v57  ;;  %v2264_v57 = vld [vmem:[%s9068_s17 + $0x78] sm:$0xff] }
 0x96d   :  { %v1208_v23 = vpop.permute.xlu1 %1207 }
 0x96e   :  { %6754 = vmatpush3.msk.msra.mxu0 %vm907_vm11, %v1208_v23  ;;  %v7212_v23 = vpack.c.bf16 %v2264_v57, %v2263_v21 }
 0x96f   :  { %6763 = vmatprep.subr.mxu0 %v7640_v14 }
 0x970   :  { %v1511_v2 = vpop.xlane.xlu0 %1510 }
 0x971   :  { %v1512_v25 = vmax.f32 %v1511_v2, 1e-16  ;;  %v1879_v30 = vpop.permute.xlu1 %1878 }
 0x972   :  { %6781 = vmatpush3.msk.msra.mxu1 %vm907_vm11, %v1879_v30 }
 0x973   :  { %7449 = vrcp.f32 %v1512_v25  ;;  %6790 = vmatprep.subr.mxu1 %v7640_v14 }
 0x974   :  { %v1516_v28 = vpop.permute.xlu0 %1515 }
 0x976   :  { %v7448_v10 = vpop.eup %7447 }
 0x977   :  { %v1206_v27 = vmul.f32 %v7448_v10, %v1200_v11 }
 0x979   :  { %6756 = vmatmul.mubr.msk.f32.vlgmr.msra.gmra.mrb[6].mxu0 %vm1053_vm0, %v1206_v27 }
 0x97a   :  { %6764 = vmatpush3.msk.msra.mxu0 %vm907_vm11, %v1516_v28  ;;  %6765 = vmatprep.mubr.msk.f32.mxu0 %vm7643_vm10, %v7640_v14 }
 0x97b   :  { %6775 = vmatprep.subr.mxu0 %v7640_v14 }
 0x97d   :  { %v7450_v22 = vpop.eup %7449 }
 0x97e   :  { %v1514_v33 = vmul.f32 %v7450_v22, %v8274_v51  ;;  %v2249_v51 = vld [vmem:[%s9068_s17] sm:$0xff] }
 0x97f   :  { %v7191_v53 = vpack.c.bf16 %v2250_v45, %v2249_v51 }
 0x980   :  { %6766 = vmatmul.mubr.msk.f32.vlgmr.msra.gmra.mrb[8].mxu0 %vm1053_vm0, %v1514_v33 }
 0x981   :  { %6776 = vmatpush3.msk.msra.mxu0 %vm907_vm11, %v8205_v31  ;;  %6777 = vmatprep.mubr.msk.f32.mxu0 %vm7643_vm10, %v7640_v14 }
 0x982   :  { %6785 = vmatprep.subr.mxu0 %v7640_v14 }
 0x9a2   :  { %v1739_v34 = vpop.xlane.xlu1 %1738 }
 0x9a3   :  { %v1740_v35 = vmax.f32 %v1739_v34, 1e-16 }
 0x9a5   :  { %7451 = vrcp.f32 %v1740_v35 }
 0x9af   :  { %v7452_v37 = vpop.eup %7451 }
 0x9b0   :  { %v1742_v61 = vmul.f32 %v7452_v37, %v1736_v58  ;;  %v2253_v58 = vld [vmem:[%s9068_s17 + $0x20] sm:$0xff] }
 0x9b1   :  { %v7197_v63 = vpack.c.bf16 %v2254_v60, %v2253_v58  ;;  %v6424_v58 = vld [vmem:[%s9073_s19] ss:$0 sm:$0xff]  ;;  %s9088_s19 = sld [smem:[#allocation28_spill]] }
 0x9b2   :  { %6778 = vmatmul.mubr.msk.f32.vlgmr.msra.gmra.mrb[10].mxu0 %vm1053_vm0, %v1742_v61 }
 0x9b3   :  { %6787 = vmatprep.mubr.msk.f32.mxu0 %vm7643_vm10, %v7640_v14 }
 0x9b4   :  { %v1874_v38 = vpop.xlane.xlu0 %1873 }
 0x9b5   :  { %v1875_v40 = vmax.f32 %v1874_v38, 1e-16 }
 0x9b7   :  { %7453 = vrcp.f32 %v1875_v40 }
 0x9b8   :  { %v2010_v41 = vpop.xlane.xlu1 %2009 }
 0x9b9   :  { %v2011_v31 = vmax.f32 %v2010_v41, 1e-16 }
 0x9bb   :  { %7455 = vrcp.f32 %v2011_v31 }
 0x9bc   :  { %v2015_v42 = vpop.permute.xlu1 %2014  ;;  %v2146_v43 = vpop.xlane.xlu0 %2145 }
 0x9bd   :  { %v2147_v44 = vmax.f32 %v2146_v43, 1e-16  ;;  %6786 = vmatpush3.msk.msra.mxu0 %vm907_vm11, %v2015_v42  ;;  %v6401_v42 = vld [vmem:[%s9069_s21] ss:$0 sm:$0xff]  ;;  %s9084_s21 = sld [smem:[#allocation24_spill]] }
 0x9be   :  { %7190 = vmatprep.subr.bf16.mxu0 %v7644_v59 }
 0x9bf   :  { %7457 = vrcp.f32 %v2147_v44 }
 0x9c0   :  { %v2151_v47 = vpop.permute.xlu0 %2150  ;;  %v876_v22 = vpop.permute.xlu1 %875 }
 0x9c1   :  { %v7454_v7 = vpop.eup %7453  ;;  %v887_v61 = vsel %vm886_vm6, %v8195_v18, %v876_v22  ;;  %v2563_v22 = vld [vmem:[%s9075_s30 + $0x18] sm:$0xff] }
 0x9c2   :  { %v1877_v48 = vmul.f32 %v7454_v7, %v1871_v4  ;;  %v7203_v4 = vpack.c.bf16 %v2258_v32, %v2257_v3  ;;  %v6422_v7 = vld [vmem:[%s9070_s29] ss:$0 sm:$0xff]  ;;  %s9085_s29 = sld [smem:[#allocation27_spill]] }
 0x9c4   :  { %6783 = vmatmul.mubr.msk.f32.vlgmr.msra.gmra.mrb[12].mxu1 %vm1053_vm0, %v1877_v48  ;;  %v1598_v33 = vpop.permute.xlu1 %1597  ;;  %v6412_v48 = vld [vmem:[%s9071_s3] ss:$0 sm:$0xff]  ;;  %s9086_s3 = sld [smem:[#allocation30_spill]] }
 0x9c5   :  { %v7456_v9 = vpop.eup %7455  ;;  %6791 = vmatpush3.msk.msra.mxu1 %vm907_vm11, %v2151_v47  ;;  %6792 = vmatprep.mubr.msk.f32.mxu1 %vm7643_vm10, %v7640_v14 }
 0x9c6   :  { %v2013_v11 = vmul.f32 %v7456_v9, %v8292_v8  ;;  %6830 = vmatprep.subr.mxu1 %v7640_v14  ;;  %v2260_v8 = vld [vmem:[%s9068_s17 + $0x58] sm:$0xff] }
 0x9c7   :  { %v7206_v12 = vpack.c.bf16 %v2260_v8, %v2259_v6 }
 0x9c8   :  { %6788 = vmatmul.mubr.msk.f32.vlgmr.msra.gmra.mrb[12].mxu0 %vm1053_vm0, %v2013_v11  ;;  %v884_v35 = vpop.permute.xlu1 %883 }
 0x9c9   :  { %v7458_v17 = vpop.eup %7457  ;;  %6827 = vmatprep.mubr.msk.f32.mxu0 %vm7643_vm10, %v7640_v14  ;;  %7192 = vmatpush3.bf16.msra.mxu0 %v7191_v53 }
 0x9ca   :  { %v2149_v50 = vmul.f32 %v7458_v17, %v8298_v15  ;;  %7193 = vmatprep.subr.bf16.mxu0 %v7644_v59  ;;  %v2262_v15 = vld [vmem:[%s9068_s17 + $0x68] sm:$0xff]  ;;  %s7656_s17 = smov 8  }
 0x9cb   :  { %v7209_v19 = vpack.c.bf16 %v2262_v15, %v2261_v39 }
 0x9cc   :  { %6793 = vmatmul.mubr.msk.f32.vlgmr.msra.gmra.mrb[14].mxu1 %vm1053_vm0, %v2149_v50 }
 0x9cd   :  { %6832 = vmatprep.mubr.msk.f32.mxu1 %vm7643_vm10, %v7640_v14  ;;  %7195 = vmatpush3.bf16.msra.mxu0 %v7194_v13  ;;  %v6423_v13 = vld [vmem:[%s9072_s8] ss:$0 sm:$0xff]  ;;  %s9087_s8 = sld [smem:[#allocation29_spill]] }
 0x9ce   :  { %7196 = vmatprep.subr.bf16.mxu0 %v7644_v59 }
 0x9d1   :  { %7198 = vmatpush3.bf16.msra.mxu0 %v7197_v63 }
 0x9d2   :  { %7199 = vmatprep.subr.bf16.mxu0 %v7644_v59 }
 0x9d5   :  { %7201 = vmatpush3.bf16.msra.mxu0 %v7200_v1 }
 0x9d6   :  { %7202 = vmatprep.subr.bf16.mxu0 %v7644_v59 }
 0x9d9   :  { %7204 = vmatpush3.bf16.msra.mxu0 %v7203_v4 }
 0x9da   :  { %7205 = vmatprep.subr.bf16.mxu0 %v7644_v59 }
 0x9dd   :  { %7207 = vmatpush3.bf16.msra.mxu0 %v7206_v12 }
 0x9de   :  { %7208 = vmatprep.subr.bf16.mxu0 %v7644_v59 }
 0x9e1   :  { %7210 = vmatpush3.bf16.msra.mxu0 %v7209_v19 }
 0x9e2   :  { %7211 = vmatprep.subr.bf16.mxu0 %v7644_v59 }
 0x9e5   :  { %7213 = vmatpush3.bf16.msra.mxu0 %v7212_v23  ;;  %v2474_v23 = vld [vmem:[%s9074_s24] sm:$0xff] }
 0x9e6   :  { %6851 = vmatprep.subr.mxu0 %v7640_v14 }
 0xa4c   :  { %v1280_v62 = vpop.f32.mrb[6].mxu0 }
 0xa4d   :  { %v6757_v16 = vpop.f32.mrb[7].mxu0  ;;  %1593 = vrot.lane.b32.xlu0 %v1280_v62, %s7641_s5 }
 0xa51   :  { %879 = vrot.lane.b32.xlu0 %v8000_v26, %s7639_s0 }
 0xa53   :  { %v1588_v49 = vpop.f32.mrb[8].mxu0 }
 0xa54   :  { %v6767_v20 = vpop.f32.mrb[9].mxu0 }
 0xa85   :  { %v1815_v26 = vpop.f32.mrb[10].mxu0 }
 0xa86   :  { %v6779_v5 = vpop.f32.mrb[11].mxu0 }
 0xa97   :  { %v1951_v2 = vpop.f32.mrb[12].mxu1 }
 0xa98   :  { %2228 = vrot.lane.b32.xlu1 %v1951_v2, %s7641_s5  ;;  %v6784_v25 = vpop.f32.mrb[13].mxu1  ;;  %v2475_v2 = vld [vmem:[%s9074_s24 + $0x8] sm:$0xff] }
 0xa9b   :  { %v2087_v30 = vpop.f32.mrb[12].mxu0 }
 0xa9c   :  { %2232 = vrot.lane.b32.xlu0 %v2087_v30, %s7639_s0  ;;  %v6789_v10 = vpop.f32.mrb[13].mxu0  ;;  %v7215_v30 = vpack.c.bf16 %v2475_v2, %v2474_v23 }
 0xa9f   :  { %v2223_v27 = vpop.f32.mrb[14].mxu1 }
 0xaa0   :  { %1601 = vrot.lane.b32.xlu0 %v1588_v49, %s7642_s9  ;;  %2236 = vrot.lane.b32.xlu1 %v2223_v27, %s7642_s9  ;;  %v6794_v28 = vpop.f32.mrb[15].mxu1  ;;  %v2476_v27 = vld [vmem:[%s9074_s24 + $0x10] sm:$0xff] }
 0xaa1   :  { %v2477_v28 = vld [vmem:[%s9074_s24 + $0x18] sm:$0xff]  ;;  %s9089_s24 = sld [smem:[#allocation31_spill]] }
 0xabf   :  { %v1594_v34 = vpop.permute.xlu0 %1593 }
 0xac0   :  { %v1604_v31 = vsel %vm886_vm6, %v8201_v24, %v1594_v34  ;;  %v7220_v34 = vpack.c.bf16 %v2563_v22, %v2561_v54 }
 0xac1   :  { %v1605_v9 = vsel %vm888_vm2, %v1604_v31, %v1598_v33  ;;  %v7218_v33 = vpack.c.bf16 %v2477_v28, %v2476_v27 }
 0xac3   :  { %v880_v37 = vpop.permute.xlu0 %879 }
 0xac4   :  { %v889_v38 = vsel %vm888_vm2, %v887_v61, %v880_v37  ;;  %v2562_v37 = vld [vmem:[%s9075_s30 + $0x10] sm:$0xff]  ;;  %v2565_v61 = vld [vmem:[%s9075_s30 + $0x28] sm:$0xff] }
 0xac5   :  { %v891_v43 = vsel %vm890_vm12, %v889_v38, %v884_v35  ;;  %v2560_v35 = vld [vmem:[%s9075_s30] sm:$0xff]  ;;  %v2567_v38 = vld [vmem:[%s9075_s30 + $0x38] sm:$0xff] }
 0xac6   :  { %v898_v51 = vadd.f32 %v6401_v42, %v891_v43  ;;  %v7224_v31 = vpack.c.bf16 %v2567_v38, %v2565_v61  ;;  %v2564_v42 = vld [vmem:[%s9075_s30 + $0x20] sm:$0xff]  ;;  %v2566_v43 = vld [vmem:[%s9075_s30 + $0x30] sm:$0xff] }
 0xb0a   :  { %v2229_v40 = vpop.permute.xlu1 %2228 }
 0xb0b   :  { %v2239_v44 = vsel %vm886_vm6, %v1815_v26, %v2229_v40  ;;  %v2473_v40 = vld [vmem:[%s9076_s12] sm:$0x3]  ;;  %s9091_s12 = sld [smem:[#allocation32_spill]] }
 0xb0e   :  { %v2233_v41 = vpop.permute.xlu0 %2232 }
 0xb0f   :  { %v2240_v47 = vsel %vm888_vm2, %v2239_v44, %v2233_v41  ;;  %v7222_v41 = vpack.c.bf16 %v2562_v37, %v2560_v35  ;;  %v2569_v44 = vld [vmem:[%s9075_s30 + $0x48] sm:$0xff] }
 0xb12   :  { %v2237_v18 = vpop.permute.xlu1 %2236  ;;  %v1602_v11 = vpop.permute.xlu0 %1601 }
 0xb13   :  { %v2241_v17 = vsel %vm890_vm12, %v2240_v47, %v2237_v18  ;;  %v1606_v50 = vsel %vm890_vm12, %v1605_v9, %v1602_v11  ;;  %v2568_v18 = vld [vmem:[%s9075_s30 + $0x40] sm:$0xff]  ;;  %v2570_v9 = vld [vmem:[%s9075_s30 + $0x50] sm:$0xff]  ;;  %v2573_v11 = vld [vmem:[%s9075_s30 + $0x68] sm:$0xff] }
 0xb14   :  { %v2248_v45 = vadd.f32 %v6422_v7, %v2241_v17  ;;  %v1613_v52 = vadd.f32 %v6412_v48, %v1606_v50  ;;  %v2571_v7 = vld [vmem:[%s9075_s30 + $0x58] sm:$0xff]  ;;  %v7226_v48 = vpack.c.bf16 %v2566_v43, %v2564_v42  ;;  %v7230_v50 = vpack.c.bf16 %v2570_v9, %v2568_v18 }
 0xb15   :  { %v7228_v47 = vpack.c.bf16 %v2571_v7, %v2569_v44  ;;  %v2575_v17 = vld [vmem:[%s9075_s30 + $0x78] sm:$0xff] }
 0xb16   :  { %v2269_v24 = vrot.slane %v2248_v45, 2  ;;  %v1614_v53 = vadd.f32 %v1613_v52, %v898_v51  ;;  %v7232_v51 = vpack.c.bf16 %v2575_v17, %v2573_v11  ;;  %v2572_v45 = vld [vmem:[%s9075_s30 + $0x60] sm:$0xff]  ;;  %v2574_v52 = vld [vmem:[%s9075_s30 + $0x70] sm:$0xff]  ;;  %s9090_s30 = sld [smem:[#allocation33_spill]] }
 0xb18   :  { %v2271_v55 = vsel %vm907_vm11, %v1614_v53, %v2269_v24  ;;  %v7234_v24 = vpack.c.bf16 %v2574_v52, %v2572_v45  ;;  %v2559_v53 = vld [vmem:[%s9077_s20] sm:$0xff]  ;;  %s7657_s20 = smov [#allocation4]  }
 0xb19   :  { %6828 = vmatmul.mubr.f32.vlgmr.msra.gmra.mrb[14].mxu0 %v2271_v55  ;;  %v6425_v55 = vld [vmem:[%s9078_s27] ss:$0 sm:$0xff]  ;;  %s6324_s27 = sshll.u32 %s7657_s20, 4  ;;  %s6325_s27 = int_to_ptr.vmem [resolvable:$true] %s6324_s27 }
 0xb1a   :  { %6853 = vmatprep.mubr.msk.f32.mxu0 %vm7643_vm10, %v7640_v14  ;;  %p7532_p1 = scmp.lt.s32.totalorder %s6325_s27, %s6325_s27 }
 0xbec   :  { %v2338_v60 = vpop.f32.mrb[14].mxu0 }
 0xbed   :  { %v2348_v62 = vmul.f32 %v6423_v13, %v2338_v60  ;;  %v2358_v16 = vmul.f32 %v6424_v58, %v2338_v60  ;;  %v6829_v63 = vpop.f32.mrb[15].mxu0  ;;  %6831 = vmatpush3.msk.msra.mxu1 %vm907_vm11, %v2338_v60  ;;  %vm2471_vm11 = vcmask 254976  }
 0xbee   :  { %7214 = vmatprep.subr.bf16.mxu1 %v7644_v59 }
 0xbef   :  { %v2359_v0 = vsel %vm1005_vm15, %v2358_v16, 0.0  ;;  %v2349_v56 = vsel %vm995_vm13, %v2348_v62, 0.0  ;;  %v6428_v62 = vld [vmem:[%s9079_s15] ss:$0 sm:$0xff]  ;;  %vm2757_vm13 = vcmask 1043456   ;;  %vm2665_vm15 = vcmask 64512  }
 0xbf0   :  { %2360 = vadd.xlane.f32.xlu1 %v2359_v0  ;;  %2350 = vadd.xlane.f32.xlu0 %v2349_v56  ;;  %v2576_v56 = vld [vmem:[%s9080_s16] sm:$0x3]  ;;  %s7527_s15 = scalar_lea.vmem %s6325_s27, 32 }
 0xbf1   :  { %p7528_p0 = scmp.ne.s32.totalorder %s6325_s27, %s7527_s15  ;;  %p7533_p2 = scmp.lt.s32.totalorder %s7527_s15, %s7527_s15 }
 0xbf3   :  { %p7534_p3 = por %p7533_p2, %p7532_p1 }
 0xbf5   :  { %p7535_p4 = pnand %p7534_p3, %p7528_p0 }
 0xc7d   :  { %v2351_v1 = vpop.xlane.xlu0 %2350  ;;  %v2361_v32 = vpop.xlane.xlu1 %2360 }
 0xc7e   :  { %v2366_v3 = vrot.slane %v2351_v1, %v7926_v29  ;;  %v2581_v1 = vrot.slane %v2576_v56, %v8013_v36 }
 0xc80   :  { %v2368_v49 = vadd.f32 %v2366_v3, %v2361_v32  ;;  %v2585_v3 = vrot.slane %v2576_v56, %v7938_v46 }
 0xc82   :  { %v2370_v20 = vmul.f32 0.2, %v2368_v49  ;;  %vm2369_vm14 = vcmp.gt.f32.partialorder %v2368_v49, 0.0 }
 0xc84   :  { %v2371_v4 = vsel %vm2369_vm14, %v2368_v49, %v2370_v20 }
 0xc85   :  { %v2373_v26 = vrot.slane %v2371_v4, 6 }
 0xc87   :  { %v2375_v5 = vsel %vm1698_vm7, %v2373_v26, -1e+30 }
 0xc88   :  { %v2376_v6 = vsel %vm1729_vm3, %v2375_v5, -inf }
 0xc89   :  { %2377 = vmax.xlane.f32.xlu0 %v2376_v6 }
 0xd16   :  { %v2378_v8 = vpop.xlane.xlu0 %2377 }
 0xd17   :  { %v2379_v12 = vsub.f32 %v2375_v5, %v2378_v8 }
 0xd19   :  { %v2380_v39 = vmul.f32 1.442695, %v2379_v12 }
 0xd1b   :  { %7459 = vpow2.f32 %v2380_v39 }
 0xd25   :  { %v7460_v29 = vpop.eup %7459 }
 0xd26   :  { %v2382_v15 = vsel %vm1698_vm7, %v7460_v29, 0.0  ;;  %vm4030_vm7 = vcmask 195584  }
 0xd27   :  { %v2383_v19 = vsel %vm1729_vm3, %v2382_v15, 0.0  ;;  %vm4033_vm3 = vcmask 326656  }
 0xd28   :  { %2384 = vadd.xlane.f32.xlu0 %v2383_v19 }
 0xdb5   :  { %v2385_v21 = vpop.xlane.xlu0 %2384 }
 0xdb6   :  { %v2386_v57 = vmax.f32 %v2385_v21, 1e-16 }
 0xdb8   :  { %7461 = vrcp.f32 %v2386_v57 }
 0xdc2   :  { %v7462_v25 = vpop.eup %7461 }
 0xdc3   :  { %v2388_v10 = vmul.f32 %v7462_v25, %v2382_v15 }
 0xdc5   :  { %6833 = vmatmul.mubr.msk.f32.vlgmr.msra.gmra.mrb[16].mxu1 %vm1053_vm0, %v2388_v10  ;;  %vm2741_vm0 = vcmask 27648  }
 0xdc6   :  { %7216 = vmatpush3.bf16.msra.mxu1 %v7215_v30  ;;  %6843 = vmatprep.mubr.msk.f32.mxu1 %vm7643_vm10, %v7640_v14 }
 0xdc7   :  { %7217 = vmatprep.subr.bf16.mxu1 %v7644_v59 }
 0xdca   :  { %7219 = vmatpush3.bf16.msra.mxu1 %v7218_v33 }
 0xdcb   :  { %7221 = vmatprep.subr.bf16.mxu1 %v7220_v34 }
 0xdcd   :  { %6844 = vmatmul.mubr.msk.f32.vlgmr.msra.gmra.mrb[18].mxu1 %vm886_vm6, %v2473_v40 }
 0xdce   :  { %7223 = vmatpush1.bf16.msra.mxu1 %v7222_v41  ;;  %2655 = vmatprep.mubr.f32.mxu1 %v7640_v14 }
 0xdcf   :  { %7225 = vmatprep.subr.bf16.mxu1 %v7224_v31 }
 0xdd2   :  { %7227 = vmatpush1.bf16.msra.mxu1 %v7226_v48 }
 0xdd3   :  { %7229 = vmatprep.subr.bf16.mxu1 %v7228_v47 }
 0xdd6   :  { %7231 = vmatpush1.bf16.msra.mxu1 %v7230_v50 }
 0xdd7   :  { %7233 = vmatprep.subr.bf16.mxu1 %v7232_v51 }
 0xdda   :  { %7235 = vmatpush1.bf16.msra.mxu1 %v7234_v24 }
 0xddb   :  { %6846 = vmatprep.subr.mxu1 %v7640_v14 }
 0xddd   :  { %6430 = vmatmul.mubr.msk.f32.vlgmr.msra.gmra.mrb[20].mxu1 %vm888_vm2, %v2559_v53 }
 0xdde   :  { %6848 = vmatprep.mubr.msk.f32.mxu1 %vm7643_vm10, %v7640_v14 }
 0xe98   :  { %v2467_v13 = vpop.f32.mrb[16].mxu1 }
 0xe99   :  { %v8437_v58 = vadd.f32 %v6425_v55, %v2467_v13  ;;  %v6834_v60 = vpop.f32.mrb[17].mxu1 }
 0xe9b   :  { %2472 = vst.msk [vmem:[#allocation4] sm:$0x3] %vm2471_vm11, %v8437_v58 }
 0xea0   :  { %v2554_v16 = vpop.f32.mrb[18].mxu1 }
 0xea1   :  { %v8441_v63 = vadd.f32 %v6428_v62, %v2554_v16  ;;  %v6845_v0 = vpop.f32.mrb[19].mxu1 }
 0xea3   :  { %2558 = vst.msk [vmem:[#allocation6] sm:$0x3] %vm2471_vm11, %v8441_v63 }
 0xeb0   :  { %v2657_v32 = vpop.f32.mrb[20].mxu1 }
 0xeb1   :  { %v2658_v49 = vadd.f32 %v2657_v32, %v2581_v1  ;;  %v2659_v20 = vpop.f32.mrb[21].mxu1 }
 0xeb2   :  { %v8447_v4 = vadd.f32 %v2659_v20, %v2585_v3 }
 0xeb3   :  { %2833 = vrot.lane.b32.xlu0 %v2658_v49, %s7645_s18  ;;  %2663 = vrot.lane.b32.xlu1 %v2658_v49, %s7639_s0  ;;  %v8466_v46 = vrot.slane %v2658_v49, 4 }
 0xeb4   :  { %6852 = vmatpush3.msk.msra.mxu0 %vm2757_vm13, %v8447_v4 }
 0xeb5   :  { %6861 = vmatprep.subr.mxu0 %v7640_v14 }
 0xeb7   :  { %2998 = vrot.lane.b32.xlu0 %v2658_v49, %s7646_s22  ;;  %2831 = vrot.lane.b32.xlu1 %v2658_v49, %s7647_s23 }
 0xebb   :  { %3165 = vrot.lane.b32.xlu0 %v2658_v49, %s7648_s26  ;;  %3000 = vrot.lane.b32.xlu1 %v2658_v49, %s7649_s28 }
 0xebf   :  { %3332 = vrot.lane.b32.xlu0 %v2658_v49, %s7642_s9  ;;  %3167 = vrot.lane.b32.xlu1 %v2658_v49, %s7650_s1 }
 0xec3   :  { %3499 = vrot.lane.b32.xlu0 %v2658_v49, %s7651_s2  ;;  %3334 = vrot.lane.b32.xlu1 %v2658_v49, %s7641_s5 }
 0xec7   :  { %3666 = vrot.lane.b32.xlu0 %v2658_v49, %s7652_s7  ;;  %3501 = vrot.lane.b32.xlu1 %v2658_v49, %s7653_s10 }
 0xecb   :  { %3833 = vrot.lane.b32.xlu0 %v2658_v49, %s7654_s11  ;;  %3668 = vrot.lane.b32.xlu1 %v2658_v49, %s7655_s13 }
 0xecf   :  { %3835 = vrot.lane.b32.xlu1 %v2658_v49, %s7656_s17  ;;  %4206 = vrot.lane.b32.xlu0 %v8466_v46, %s7645_s18 }
 0xed3   :  { %4373 = vrot.lane.b32.xlu0 %v8466_v46, %s7649_s28  ;;  %4040 = vrot.lane.b32.xlu1 %v8466_v46, %s7639_s0  ;;  %s9081_s0 = sld [smem:[#allocation23_spill]] }
 0xed7   :  { %4540 = vrot.lane.b32.xlu0 %v8466_v46, %s7650_s1  ;;  %4204 = vrot.lane.b32.xlu1 %v8466_v46, %s7647_s23 }
 0xedb   :  { %4707 = vrot.lane.b32.xlu0 %v8466_v46, %s7641_s5  ;;  %4371 = vrot.lane.b32.xlu1 %v8466_v46, %s7646_s22 }
 0xedf   :  { %4874 = vrot.lane.b32.xlu0 %v8466_v46, %s7653_s10  ;;  %4538 = vrot.lane.b32.xlu1 %v8466_v46, %s7648_s26 }
 0xee3   :  { %5041 = vrot.lane.b32.xlu0 %v8466_v46, %s7655_s13  ;;  %4705 = vrot.lane.b32.xlu1 %v8466_v46, %s7642_s9 }
 0xee7   :  { %5208 = vrot.lane.b32.xlu0 %v8466_v46, %s7656_s17  ;;  %4872 = vrot.lane.b32.xlu1 %v8466_v46, %s7651_s2 }
 0xeeb   :  { %3088 = vrot.lane.b32.xlu0 %v8447_v4, %s7646_s22  ;;  %5039 = vrot.lane.b32.xlu1 %v8466_v46, %s7652_s7 }
 0xeef   :  { %3255 = vrot.lane.b32.xlu0 %v8447_v4, %s7648_s26  ;;  %5206 = vrot.lane.b32.xlu1 %v8466_v46, %s7654_s11 }
 0xef3   :  { %2921 = vrot.lane.b32.xlu1 %v8447_v4, %s7647_s23 }
 0xf25   :  { %v2834_v26 = vpop.permute.xlu0 %2833  ;;  %v2664_v5 = vpop.permute.xlu1 %2663 }
 0xf26   :  { %6847 = vmatpush3.xpose.msk.msra.mxu1 %vm2665_vm15, %v2664_v5 }
 0xf27   :  { %6856 = vmatprep.subr.mxu1 %v7640_v14 }
 0xf29   :  { %v2999_v6 = vpop.permute.xlu0 %2998  ;;  %6849 = vmatmul.mubr.msk.f32.vlgmr.msra.gmra.mrb[22].mxu1 %vm2665_vm15, %v2658_v49  ;;  %v2832_v8 = vpop.permute.xlu1 %2831 }
 0xf2a   :  { %6857 = vmatpush3.xpose.msk.msra.mxu1 %vm2665_vm15, %v2834_v26  ;;  %6858 = vmatprep.mubr.msk.f32.mxu1 %vm7643_vm10, %v7640_v14 }
 0xf2b   :  { %6866 = vmatprep.subr.mxu1 %v7640_v14 }
 0xf2d   :  { %v3166_v12 = vpop.permute.xlu0 %3165  ;;  %6859 = vmatmul.mubr.msk.f32.vlgmr.msra.gmra.mrb[24].mxu1 %vm2665_vm15, %v2832_v8  ;;  %v3001_v39 = vpop.permute.xlu1 %3000 }
 0xf2e   :  { %6867 = vmatpush3.xpose.msk.msra.mxu1 %vm2665_vm15, %v3001_v39  ;;  %6868 = vmatprep.mubr.msk.f32.mxu1 %vm7643_vm10, %v7640_v14 }
 0xf2f   :  { %6876 = vmatprep.subr.mxu1 %v7640_v14 }
 0xf31   :  { %v3333_v29 = vpop.permute.xlu0 %3332  ;;  %6869 = vmatmul.mubr.msk.f32.vlgmr.msra.gmra.mrb[26].mxu1 %vm2665_vm15, %v2999_v6  ;;  %v3168_v15 = vpop.permute.xlu1 %3167 }
 0xf32   :  { %6877 = vmatpush3.xpose.msk.msra.mxu1 %vm2665_vm15, %v3168_v15  ;;  %6878 = vmatprep.mubr.msk.f32.mxu1 %vm7643_vm10, %v7640_v14 }
 0xf33   :  { %6886 = vmatprep.subr.mxu1 %v7640_v14 }
 0xf35   :  { %v3500_v19 = vpop.permute.xlu0 %3499  ;;  %6879 = vmatmul.mubr.msk.f32.vlgmr.msra.gmra.mrb[28].mxu1 %vm2665_vm15, %v3166_v12  ;;  %v3335_v21 = vpop.permute.xlu1 %3334 }
 0xf36   :  { %6887 = vmatpush3.xpose.msk.msra.mxu1 %vm2665_vm15, %v3335_v21  ;;  %6888 = vmatprep.mubr.msk.f32.mxu1 %vm7643_vm10, %v7640_v14 }
 0xf37   :  { %6896 = vmatprep.subr.mxu1 %v7640_v14 }
 0xf39   :  { %v3667_v57 = vpop.permute.xlu0 %3666  ;;  %6889 = vmatmul.mubr.msk.f32.vlgmr.msra.gmra.mrb[30].mxu1 %vm2665_vm15, %v3333_v29  ;;  %v3502_v23 = vpop.permute.xlu1 %3501 }
 0xf3a   :  { %6897 = vmatpush3.xpose.msk.msra.mxu1 %vm2665_vm15, %v3502_v23  ;;  %6898 = vmatprep.mubr.msk.f32.mxu1 %vm7643_vm10, %v7640_v14 }
 0xf3b   :  { %6906 = vmatprep.subr.mxu1 %v7640_v14 }
 0xf3d   :  { %v3834_v2 = vpop.permute.xlu0 %3833  ;;  %6899 = vmatmul.mubr.msk.f32.vlgmr.msra.gmra.mrb[32].mxu1 %vm2665_vm15, %v3500_v19  ;;  %v3669_v25 = vpop.permute.xlu1 %3668 }
 0xf3e   :  { %6907 = vmatpush3.xpose.msk.msra.mxu1 %vm2665_vm15, %v3669_v25  ;;  %6908 = vmatprep.mubr.msk.f32.mxu1 %vm7643_vm10, %v7640_v14 }
 0xf3f   :  { %6916 = vmatprep.subr.mxu1 %v7640_v14 }
 0xf41   :  { %6909 = vmatmul.mubr.msk.f32.vlgmr.msra.gmra.mrb[34].mxu1 %vm2665_vm15, %v3667_v57  ;;  %v3836_v30 = vpop.permute.xlu1 %3835  ;;  %v4207_v10 = vpop.permute.xlu0 %4206 }
 0xf42   :  { %6917 = vmatpush3.xpose.msk.msra.mxu1 %vm2665_vm15, %v3836_v30  ;;  %6918 = vmatprep.mubr.msk.f32.mxu1 %vm7643_vm10, %v7640_v14 }
 0xf43   :  { %6926 = vmatprep.subr.mxu1 %v7640_v14 }
 0xf45   :  { %6919 = vmatmul.mubr.msk.f32.vlgmr.msra.gmra.mrb[36].mxu1 %vm2665_vm15, %v3834_v2  ;;  %v4374_v27 = vpop.permute.xlu0 %4373  ;;  %v4041_v28 = vpop.permute.xlu1 %4040 }
 0xf46   :  { %6927 = vmatpush3.xpose.msk.msra.mxu1 %vm2665_vm15, %v4041_v28  ;;  %6928 = vmatprep.mubr.msk.f32.mxu1 %vm7643_vm10, %v7640_v14 }
 0xf47   :  { %6936 = vmatprep.subr.mxu1 %v7640_v14 }
 0xf49   :  { %v4541_v54 = vpop.permute.xlu0 %4540  ;;  %6929 = vmatmul.mubr.msk.f32.vlgmr.msra.gmra.mrb[38].mxu1 %vm2665_vm15, %v8466_v46  ;;  %v4205_v22 = vpop.permute.xlu1 %4204 }
 0xf4a   :  { %6937 = vmatpush3.xpose.msk.msra.mxu1 %vm2665_vm15, %v4207_v10  ;;  %6938 = vmatprep.mubr.msk.f32.mxu1 %vm7643_vm10, %v7640_v14 }
 0xf4b   :  { %6946 = vmatprep.subr.mxu1 %v7640_v14 }
 0xf4d   :  { %6939 = vmatmul.mubr.msk.f32.vlgmr.msra.gmra.mrb[40].mxu1 %vm2665_vm15, %v4205_v22  ;;  %v4372_v33 = vpop.permute.xlu1 %4371  ;;  %v4708_v34 = vpop.permute.xlu0 %4707 }
 0xf4e   :  { %6947 = vmatpush3.xpose.msk.msra.mxu1 %vm2665_vm15, %v4374_v27  ;;  %6948 = vmatprep.mubr.msk.f32.mxu1 %vm7643_vm10, %v7640_v14 }
 0xf4f   :  { %6956 = vmatprep.subr.mxu1 %v7640_v14 }
 0xf51   :  { %6949 = vmatmul.mubr.msk.f32.vlgmr.msra.gmra.mrb[42].mxu1 %vm2665_vm15, %v4372_v33  ;;  %v4539_v35 = vpop.permute.xlu1 %4538  ;;  %v4875_v37 = vpop.permute.xlu0 %4874 }
 0xf52   :  { %6957 = vmatpush3.xpose.msk.msra.mxu1 %vm2665_vm15, %v4541_v54  ;;  %6958 = vmatprep.mubr.msk.f32.mxu1 %vm7643_vm10, %v7640_v14 }
 0xf53   :  { %6966 = vmatprep.subr.mxu1 %v7640_v14 }
 0xf55   :  { %6959 = vmatmul.mubr.msk.f32.vlgmr.msra.gmra.mrb[44].mxu1 %vm2665_vm15, %v4539_v35  ;;  %v4706_v61 = vpop.permute.xlu1 %4705  ;;  %v5042_v40 = vpop.permute.xlu0 %5041 }
 0xf56   :  { %6967 = vmatpush3.xpose.msk.msra.mxu1 %vm2665_vm15, %v4708_v34  ;;  %6968 = vmatprep.mubr.msk.f32.mxu1 %vm7643_vm10, %v7640_v14 }
 0xf57   :  { %6976 = vmatprep.subr.mxu1 %v7640_v14 }
 0xf59   :  { %6969 = vmatmul.mubr.msk.f32.vlgmr.msra.gmra.mrb[46].mxu1 %vm2665_vm15, %v4706_v61  ;;  %v4873_v38 = vpop.permute.xlu1 %4872  ;;  %v5209_v31 = vpop.permute.xlu0 %5208 }
 0xf5a   :  { %6977 = vmatpush3.xpose.msk.msra.mxu1 %vm2665_vm15, %v4875_v37  ;;  %6978 = vmatprep.mubr.msk.f32.mxu1 %vm7643_vm10, %v7640_v14 }
 0xf5b   :  { %6986 = vmatprep.subr.mxu1 %v7640_v14 }
 0xf5d   :  { %6979 = vmatmul.mubr.msk.f32.vlgmr.msra.gmra.mrb[48].mxu1 %vm2665_vm15, %v4873_v38  ;;  %v5040_v41 = vpop.permute.xlu1 %5039 }
 0xf5e   :  { %6987 = vmatpush3.xpose.msk.msra.mxu1 %vm2665_vm15, %v5042_v40  ;;  %6988 = vmatprep.mubr.msk.f32.mxu1 %vm7643_vm10, %v7640_v14 }
 0xf5f   :  { %6996 = vmatprep.subr.mxu1 %v7640_v14 }
 0xf61   :  { %6989 = vmatmul.mubr.msk.f32.vlgmr.msra.gmra.mrb[50].mxu1 %vm2665_vm15, %v5040_v41  ;;  %v5207_v42 = vpop.permute.xlu1 %5206 }
 0xf62   :  { %6997 = vmatpush3.xpose.msk.msra.mxu1 %vm2665_vm15, %v5209_v31  ;;  %6998 = vmatprep.mubr.msk.f32.mxu1 %vm7643_vm10, %v7640_v14 }
 0xf63   :  { %7236 = vmatprep.subr.bf16.mxu1 %v7644_v59 }
 0xf65   :  { %6999 = vmatmul.mubr.msk.f32.vlgmr.msra.gmra.mrb[52].mxu1 %vm2665_vm15, %v5207_v42 }
 0xf66   :  { %7022 = vmatprep.mubr.msk.f32.mxu1 %vm7643_vm10, %v7640_v14 }
 0xffc   :  { %v2736_v43 = vpop.f32.mrb[22].mxu1 }
 0xffd   :  { %v8586_v44 = vmul.f32 0.35355338, %v2736_v43  ;;  %v6850_v7 = vpop.f32.mrb[23].mxu1 }
 0xfff   :  { %v2742_v48 = vsel %vm2741_vm0, %v8586_v44, -inf }
0x1000   :  { %v2905_v47 = vpop.f32.mrb[24].mxu1  ;;  %2743 = vmax.xlane.f32.xlu0 %v2742_v48 }
0x1001   :  { %v8590_v18 = vmul.f32 0.35355338, %v2905_v47  ;;  %v6860_v9 = vpop.f32.mrb[25].mxu1 }
0x1003   :  { %v2910_v11 = vsel %vm2741_vm0, %v8590_v18, -inf }
0x1004   :  { %v3072_v17 = vpop.f32.mrb[26].mxu1  ;;  %2911 = vmax.xlane.f32.xlu1 %v2910_v11 }
0x1005   :  { %v8594_v50 = vmul.f32 0.35355338, %v3072_v17  ;;  %v6870_v51 = vpop.f32.mrb[27].mxu1  ;;  %v8656_v17 = vpop.permute.xlu0 %3088 }
0x1007   :  { %v3077_v45 = vsel %vm2741_vm0, %v8594_v50, -inf }
0x1008   :  { %v3239_v52 = vpop.f32.mrb[28].mxu1  ;;  %3078 = vmax.xlane.f32.xlu0 %v3077_v45  ;;  %v8660_v45 = vpop.permute.xlu1 %2921 }
0x1009   :  { %v8598_v24 = vmul.f32 0.35355338, %v3239_v52  ;;  %v6880_v53 = vpop.f32.mrb[29].mxu1  ;;  %v8658_v51 = vpop.permute.xlu0 %3255 }
0x100b   :  { %v3244_v55 = vsel %vm2741_vm0, %v8598_v24, -inf }
0x100c   :  { %v3406_v13 = vpop.f32.mrb[30].mxu1  ;;  %3245 = vmax.xlane.f32.xlu0 %v3244_v55 }
0x100d   :  { %v8602_v60 = vmul.f32 0.35355338, %v3406_v13  ;;  %v6890_v62 = vpop.f32.mrb[31].mxu1 }
0x100f   :  { %v3411_v16 = vsel %vm2741_vm0, %v8602_v60, -inf }
0x1010   :  { %v3573_v0 = vpop.f32.mrb[32].mxu1  ;;  %3412 = vmax.xlane.f32.xlu1 %v3411_v16 }
0x1011   :  { %v8606_v56 = vmul.f32 0.35355338, %v3573_v0  ;;  %v6900_v1 = vpop.f32.mrb[33].mxu1 }
0x1013   :  { %v3578_v3 = vsel %vm2741_vm0, %v8606_v56, -inf }
0x1014   :  { %v3740_v32 = vpop.f32.mrb[34].mxu1  ;;  %3579 = vmax.xlane.f32.xlu0 %v3578_v3 }
0x1015   :  { %v8610_v49 = vmul.f32 0.35355338, %v3740_v32  ;;  %v6910_v20 = vpop.f32.mrb[35].mxu1 }
0x1017   :  { %v3745_v46 = vsel %vm2741_vm0, %v8610_v49, -inf }
0x1018   :  { %v3907_v26 = vpop.f32.mrb[36].mxu1  ;;  %3746 = vmax.xlane.f32.xlu1 %v3745_v46 }
0x1019   :  { %v8614_v5 = vmul.f32 0.35355338, %v3907_v26  ;;  %v6920_v6 = vpop.f32.mrb[37].mxu1 }
0x101b   :  { %v3912_v8 = vsel %vm2741_vm0, %v8614_v5, -inf }
0x101c   :  { %3913 = vmax.xlane.f32.xlu0 %v3912_v8  ;;  %v4112_v12 = vpop.f32.mrb[38].mxu1 }
0x101d   :  { %v8618_v39 = vmul.f32 0.35355338, %v4112_v12  ;;  %v6930_v29 = vpop.f32.mrb[39].mxu1 }
0x101f   :  { %v4117_v15 = vsel %vm2741_vm0, %v8618_v39, -inf }
0x1020   :  { %4118 = vmax.xlane.f32.xlu1 %v4117_v15  ;;  %v4278_v19 = vpop.f32.mrb[40].mxu1 }
0x1021   :  { %v8622_v21 = vmul.f32 0.35355338, %v4278_v19  ;;  %v6940_v57 = vpop.f32.mrb[41].mxu1 }
0x1023   :  { %v4283_v23 = vsel %vm2741_vm0, %v8622_v21, -inf }
0x1024   :  { %4284 = vmax.xlane.f32.xlu0 %v4283_v23  ;;  %v4445_v2 = vpop.f32.mrb[42].mxu1 }
0x1025   :  { %v8626_v25 = vmul.f32 0.35355338, %v4445_v2  ;;  %v6950_v30 = vpop.f32.mrb[43].mxu1 }
0x1027   :  { %v4450_v10 = vsel %vm2741_vm0, %v8626_v25, -inf }
0x1028   :  { %4451 = vmax.xlane.f32.xlu1 %v4450_v10  ;;  %v4612_v27 = vpop.f32.mrb[44].mxu1 }
0x1029   :  { %v8630_v28 = vmul.f32 0.35355338, %v4612_v27  ;;  %v6960_v54 = vpop.f32.mrb[45].mxu1 }
0x102b   :  { %v4617_v22 = vsel %vm2741_vm0, %v8630_v28, -inf }
0x102c   :  { %4618 = vmax.xlane.f32.xlu0 %v4617_v22  ;;  %v4779_v33 = vpop.f32.mrb[46].mxu1 }
0x102d   :  { %v8634_v34 = vmul.f32 0.35355338, %v4779_v33  ;;  %v6970_v35 = vpop.f32.mrb[47].mxu1 }
0x102e   :  { %v8698_v35 = vrot.slane %v8447_v4, 4 }
0x102f   :  { %v4784_v37 = vsel %vm2741_vm0, %v8634_v34, -inf }
0x1030   :  { %4785 = vmax.xlane.f32.xlu1 %v4784_v37  ;;  %v4946_v61 = vpop.f32.mrb[48].mxu1 }
0x1031   :  { %v6980_v38 = vpop.f32.mrb[49].mxu1  ;;  %v8644_v43 = vmul.f32 0.35355338, %v4946_v61 }
0x1033   :  { %v4951_v47 = vsel %vm2741_vm0, %v8644_v43, -inf }
0x1034   :  { %v5113_v40 = vpop.f32.mrb[50].mxu1 }
0x1035   :  { %v6990_v41 = vpop.f32.mrb[51].mxu1  ;;  %v8646_v7 = vmul.f32 0.35355338, %v5113_v40 }
0x1037   :  { %v5118_v9 = vsel %vm2741_vm0, %v8646_v7, -inf }
0x1038   :  { %v5280_v31 = vpop.f32.mrb[52].mxu1 }
0x1039   :  { %v7000_v42 = vpop.f32.mrb[53].mxu1  ;;  %v8648_v48 = vmul.f32 0.35355338, %v5280_v31 }
0x103b   :  { %v5285_v11 = vsel %vm2741_vm0, %v8648_v48, -inf }
0x1041   :  { %3422 = vrot.lane.b32.xlu1 %v8447_v4, %s7642_s9 }
0x1042   :  { %3589 = vrot.lane.b32.xlu0 %v8447_v4, %s7651_s2 }
0x1046   :  { %3756 = vrot.lane.b32.xlu0 %v8447_v4, %s7652_s7 }
0x1065   :  { %4952 = vmax.xlane.f32.xlu0 %v4951_v47  ;;  %5119 = vmax.xlane.f32.xlu1 %v5118_v9 }
0x1069   :  { %5286 = vmax.xlane.f32.xlu0 %v5285_v11 }
0x108d   :  { %v2744_v52 = vpop.xlane.xlu0 %2743 }
0x108e   :  { %v2745_v53 = vsub.f32 %v8586_v44, %v2744_v52 }
0x1090   :  { %v2746_v55 = vmul.f32 1.442695, %v2745_v53 }
0x1091   :  { %v2912_v13 = vpop.xlane.xlu1 %2911 }
0x1092   :  { %7463 = vpow2.f32 %v2746_v55  ;;  %v2913_v62 = vsub.f32 %v8590_v18, %v2912_v13 }
0x1094   :  { %v2914_v16 = vmul.f32 1.442695, %v2913_v62 }
0x1095   :  { %v3079_v0 = vpop.xlane.xlu0 %3078 }
0x1096   :  { %7465 = vpow2.f32 %v2914_v16  ;;  %v3080_v1 = vsub.f32 %v8594_v50, %v3079_v0 }
0x1098   :  { %v3081_v3 = vmul.f32 1.442695, %v3080_v1 }
0x1099   :  { %v3246_v32 = vpop.xlane.xlu0 %3245 }
0x109a   :  { %7467 = vpow2.f32 %v3081_v3  ;;  %v3247_v20 = vsub.f32 %v8598_v24, %v3246_v32 }
0x109c   :  { %v8666_v46 = vpop.eup %7463  ;;  %v3248_v26 = vmul.f32 1.442695, %v3247_v20 }
0x109d   :  { %v3413_v6 = vpop.xlane.xlu1 %3412  ;;  %v2748_v44 = vsel %vm2741_vm0, %v8666_v46, 0.0 }
0x109e   :  { %7469 = vpow2.f32 %v3248_v26  ;;  %v3414_v18 = vsub.f32 %v8602_v60, %v3413_v6  ;;  %2749 = vadd.xlane.f32.xlu1 %v2748_v44 }
0x10a0   :  { %v8671_v8 = vpop.eup %7465  ;;  %v3415_v12 = vmul.f32 1.442695, %v3414_v18 }
0x10a1   :  { %v3580_v50 = vpop.xlane.xlu0 %3579  ;;  %v2916_v29 = vsel %vm2741_vm0, %v8671_v8, 0.0 }
0x10a2   :  { %7471 = vpow2.f32 %v3415_v12  ;;  %v3581_v24 = vsub.f32 %v8606_v56, %v3580_v50  ;;  %2917 = vadd.xlane.f32.xlu0 %v2916_v29 }
0x10a4   :  { %v8676_v15 = vpop.eup %7467  ;;  %v3582_v19 = vmul.f32 1.442695, %v3581_v24 }
0x10a5   :  { %v3747_v57 = vpop.xlane.xlu1 %3746  ;;  %v3083_v23 = vsel %vm2741_vm0, %v8676_v15, 0.0 }
0x10a6   :  { %7473 = vpow2.f32 %v3582_v19  ;;  %v3748_v60 = vsub.f32 %v8610_v49, %v3747_v57  ;;  %3084 = vadd.xlane.f32.xlu1 %v3083_v23 }
0x10a8   :  { %v8681_v2 = vpop.eup %7469  ;;  %v3749_v30 = vmul.f32 1.442695, %v3748_v60 }
0x10a9   :  { %v3250_v10 = vsel %vm2741_vm0, %v8681_v2, 0.0  ;;  %v3914_v37 = vpop.xlane.xlu0 %3913 }
0x10aa   :  { %7475 = vpow2.f32 %v3749_v30  ;;  %3251 = vadd.xlane.f32.xlu0 %v3250_v10  ;;  %v3915_v47 = vsub.f32 %v8614_v5, %v3914_v37 }
0x10ac   :  { %v8685_v56 = vpop.eup %7471  ;;  %v3916_v11 = vmul.f32 1.442695, %v3915_v47 }
0x10ad   :  { %v3417_v27 = vsel %vm2741_vm0, %v8685_v56, 0.0  ;;  %v4119_v61 = vpop.xlane.xlu1 %4118 }
0x10ae   :  { %3418 = vadd.xlane.f32.xlu1 %v3417_v27  ;;  %v4120_v52 = vsub.f32 %v8618_v39, %v4119_v61 }
0x10b0   :  { %v8689_v54 = vpop.eup %7473  ;;  %v4121_v55 = vmul.f32 1.442695, %v4120_v52 }
0x10b1   :  { %v3584_v49 = vsel %vm2741_vm0, %v8689_v54, 0.0  ;;  %v4285_v38 = vpop.xlane.xlu0 %4284 }
0x10b2   :  { %3585 = vadd.xlane.f32.xlu0 %v3584_v49  ;;  %v4286_v41 = vsub.f32 %v8622_v21, %v4285_v38 }
0x10b4   :  { %v8693_v22 = vpop.eup %7475 }
0x10b5   :  { %v3751_v33 = vsel %vm2741_vm0, %v8693_v22, 0.0  ;;  %v4452_v40 = vpop.xlane.xlu1 %4451 }
0x10b6   :  { %3752 = vadd.xlane.f32.xlu1 %v3751_v33  ;;  %v4453_v13 = vsub.f32 %v8626_v25, %v4452_v40 }
0x10b8   :  { %v4454_v16 = vmul.f32 1.442695, %v4453_v13 }
0x10b9   :  { %v4619_v53 = vpop.xlane.xlu0 %4618 }
0x10bd   :  { %v4786_v31 = vpop.xlane.xlu1 %4785  ;;  %v8717_v21 = vpop.permute.xlu0 %3589 }
0x10be   :  { %v4787_v42 = vsub.f32 %v8634_v34, %v4786_v31  ;;  %v4620_v34 = vsub.f32 %v8630_v28, %v4619_v53 }
0x10c0   :  { %v4788_v9 = vmul.f32 1.442695, %v4787_v42  ;;  %v4621_v39 = vmul.f32 1.442695, %v4620_v34 }
0x10c1   :  { %v8724_v1 = vpop.permute.xlu0 %3756  ;;  %v8726_v3 = vpop.permute.xlu1 %3422 }
0x10c7   :  { %3923 = vrot.lane.b32.xlu1 %v8447_v4, %s7654_s11  ;;  %v4287_v4 = vmul.f32 1.442695, %v4286_v41 }
0x10c8   :  { %4294 = vrot.lane.b32.xlu0 %v8698_v35, %s7647_s23 }
0x10c9   :  { %7477 = vpow2.f32 %v4287_v4 }
0x10ca   :  { %7479 = vpow2.f32 %v4788_v9 }
0x10cb   :  { %7481 = vpow2.f32 %v3916_v11 }
0x10cc   :  { %4461 = vrot.lane.b32.xlu0 %v8698_v35, %s7646_s22  ;;  %7483 = vpow2.f32 %v4121_v55 }
0x10cd   :  { %7485 = vpow2.f32 %v4454_v16 }
0x10ce   :  { %7487 = vpow2.f32 %v4621_v39 }
0x10d0   :  { %4628 = vrot.lane.b32.xlu0 %v8698_v35, %s7648_s26 }
0x10d3   :  { %v8715_v62 = vpop.eup %7477 }
0x10d4   :  { %4795 = vrot.lane.b32.xlu0 %v8698_v35, %s7642_s9  ;;  %v4289_v5 = vsel %vm2741_vm0, %v8715_v62, 0.0  ;;  %v8722_v0 = vpop.eup %7479  ;;  %s9082_s9 = sld [smem:[#allocation25_spill]] }
0x10d5   :  { %v4790_v25 = vsel %vm2741_vm0, %v8722_v0, 0.0  ;;  %v8730_v32 = vpop.eup %7481 }
0x10d6   :  { %v3918_v26 = vsel %vm2741_vm0, %v8730_v32, 0.0  ;;  %v8734_v6 = vpop.eup %7483 }
0x10d7   :  { %v4123_v29 = vsel %vm2741_vm0, %v8734_v6, 0.0  ;;  %v8740_v24 = vpop.eup %7485 }
0x10d8   :  { %v4456_v19 = vsel %vm2741_vm0, %v8740_v24, 0.0  ;;  %v8744_v57 = vpop.eup %7487 }
0x10eb   :  { %4290 = vadd.xlane.f32.xlu1 %v4289_v5 }
0x10ef   :  { %4791 = vadd.xlane.f32.xlu1 %v4790_v25 }
0x10f2   :  { %v4953_v28 = vpop.xlane.xlu0 %4952  ;;  %v5120_v20 = vpop.xlane.xlu1 %5119 }
0x10f3   :  { %v4954_v44 = vsub.f32 %v8644_v43, %v4953_v28  ;;  %v5121_v18 = vsub.f32 %v8646_v7, %v5120_v20  ;;  %3919 = vadd.xlane.f32.xlu0 %v3918_v26  ;;  %v4623_v43 = vsel %vm2741_vm0, %v8744_v57, 0.0 }
0x10f5   :  { %v4955_v12 = vmul.f32 1.442695, %v4954_v44  ;;  %v5122_v50 = vmul.f32 1.442695, %v5121_v18 }
0x10f6   :  { %v5287_v10 = vpop.xlane.xlu0 %5286 }
0x10f7   :  { %7489 = vpow2.f32 %v4955_v12  ;;  %4124 = vadd.xlane.f32.xlu0 %v4123_v29  ;;  %v5288_v27 = vsub.f32 %v8648_v48, %v5287_v10 }
0x10f8   :  { %7491 = vpow2.f32 %v5122_v50 }
0x10f9   :  { %v5289_v49 = vmul.f32 1.442695, %v5288_v27 }
0x10fb   :  { %4457 = vadd.xlane.f32.xlu0 %v4456_v19  ;;  %7493 = vpow2.f32 %v5289_v49 }
0x10ff   :  { %4624 = vadd.xlane.f32.xlu0 %v4623_v43 }
0x1101   :  { %v8748_v7 = vpop.eup %7489 }
0x1102   :  { %v8750_v23 = vpop.eup %7491  ;;  %v4957_v60 = vsel %vm2741_vm0, %v8748_v7, 0.0 }
0x1103   :  { %4958 = vadd.xlane.f32.xlu0 %v4957_v60  ;;  %v5124_v30 = vsel %vm2741_vm0, %v8750_v23, 0.0 }
0x1104   :  { %5125 = vadd.xlane.f32.xlu1 %v5124_v30 }
0x1105   :  { %v8761_v38 = vpop.eup %7493 }
0x1106   :  { %v5291_v4 = vsel %vm2741_vm0, %v8761_v38, 0.0 }
0x1115   :  { %4962 = vrot.lane.b32.xlu1 %v8698_v35, %s7651_s2 }
0x1119   :  { %5129 = vrot.lane.b32.xlu0 %v8698_v35, %s7652_s7 }
0x112b   :  { %v2750_v33 = vpop.xlane.xlu1 %2749 }
0x112c   :  { %7495 = vrcp.f32 %v2750_v33 }
0x112f   :  { %v2918_v37 = vpop.xlane.xlu0 %2917 }
0x1130   :  { %7497 = vrcp.f32 %v2918_v37 }
0x1133   :  { %v3085_v61 = vpop.xlane.xlu1 %3084 }
0x1134   :  { %7499 = vrcp.f32 %v3085_v61 }
0x1136   :  { %v7496_v40 = vpop.eup %7495 }
0x1137   :  { %v2752_v41 = vmul.f32 %v7496_v40, %v8666_v46  ;;  %v3252_v31 = vpop.xlane.xlu0 %3251 }
0x1138   :  { %7501 = vrcp.f32 %v3252_v31  ;;  %5292 = vadd.xlane.f32.xlu0 %v5291_v4 }
0x1139   :  { %6854 = vmatmul.mubr.msk.f32.vlgmr.msra.gmra.mrb[16].mxu0 %vm2753_vm4, %v2752_v41 }
0x113a   :  { %v7498_v48 = vpop.eup %7497  ;;  %6862 = vmatpush3.msk.msra.mxu0 %vm2757_vm13, %v8660_v45  ;;  %6863 = vmatprep.mubr.msk.f32.mxu0 %vm7643_vm10, %v7640_v14 }
0x113b   :  { %v2920_v42 = vmul.f32 %v7498_v48, %v8671_v8  ;;  %v3419_v47 = vpop.xlane.xlu1 %3418  ;;  %6871 = vmatprep.subr.mxu0 %v7640_v14 }
0x113c   :  { %7503 = vrcp.f32 %v3419_v47 }
0x113d   :  { %6864 = vmatmul.mubr.msk.f32.vlgmr.msra.gmra.mrb[18].mxu0 %vm2753_vm4, %v2920_v42 }
0x113e   :  { %v7500_v46 = vpop.eup %7499  ;;  %6872 = vmatpush3.msk.msra.mxu0 %vm2757_vm13, %v8656_v17  ;;  %6873 = vmatprep.mubr.msk.f32.mxu0 %vm7643_vm10, %v7640_v14 }
0x113f   :  { %v3087_v45 = vmul.f32 %v7500_v46, %v8676_v15  ;;  %v3586_v9 = vpop.xlane.xlu0 %3585  ;;  %6881 = vmatprep.subr.mxu0 %v7640_v14 }
0x1140   :  { %7505 = vrcp.f32 %v3586_v9 }
0x1141   :  { %6874 = vmatmul.mubr.msk.f32.vlgmr.msra.gmra.mrb[20].mxu0 %vm2753_vm4, %v3087_v45 }
0x1142   :  { %v7502_v8 = vpop.eup %7501  ;;  %6882 = vmatpush3.msk.msra.mxu0 %vm2757_vm13, %v8658_v51  ;;  %6883 = vmatprep.mubr.msk.f32.mxu0 %vm7643_vm10, %v7640_v14 }
0x1143   :  { %v3254_v17 = vmul.f32 %v7502_v8, %v8681_v2  ;;  %v3753_v11 = vpop.xlane.xlu1 %3752  ;;  %6891 = vmatprep.subr.mxu0 %v7640_v14 }
0x1144   :  { %7507 = vrcp.f32 %v3753_v11 }
0x1145   :  { %6884 = vmatmul.mubr.msk.f32.vlgmr.msra.gmra.mrb[22].mxu0 %vm2753_vm4, %v3254_v17 }
0x1146   :  { %v7504_v15 = vpop.eup %7503  ;;  %6892 = vmatpush3.msk.msra.mxu0 %vm2757_vm13, %v8726_v3  ;;  %6893 = vmatprep.mubr.msk.f32.mxu0 %vm7643_vm10, %v7640_v14 }
0x1147   :  { %v3421_v51 = vmul.f32 %v7504_v15, %v8685_v56  ;;  %6901 = vmatprep.subr.mxu0 %v7640_v14  ;;  %v3924_v55 = vpop.permute.xlu1 %3923 }
0x1149   :  { %6894 = vmatmul.mubr.msk.f32.vlgmr.msra.gmra.mrb[24].mxu0 %vm2753_vm4, %v3421_v51 }
0x114a   :  { %v7506_v2 = vpop.eup %7505  ;;  %6902 = vmatpush3.msk.msra.mxu0 %vm2757_vm13, %v8717_v21  ;;  %6903 = vmatprep.mubr.msk.f32.mxu0 %vm7643_vm10, %v7640_v14 }
0x114b   :  { %v3588_v52 = vmul.f32 %v7506_v2, %v8689_v54  ;;  %6911 = vmatprep.subr.mxu0 %v7640_v14  ;;  %v4295_v54 = vpop.permute.xlu0 %4294 }
0x114d   :  { %6904 = vmatmul.mubr.msk.f32.vlgmr.msra.gmra.mrb[26].mxu0 %vm2753_vm4, %v3588_v52 }
0x114e   :  { %v7508_v53 = vpop.eup %7507  ;;  %6912 = vmatpush3.msk.msra.mxu0 %vm2757_vm13, %v8724_v1  ;;  %5296 = vrot.lane.b32.xlu0 %v8698_v35, %s7654_s11 }
0x114f   :  { %v3755_v56 = vmul.f32 %v7508_v53, %v8693_v22  ;;  %6913 = vmatprep.mubr.msk.f32.mxu0 %vm7643_vm10, %v7640_v14  ;;  %6921 = vmatprep.subr.mxu0 %v7640_v14  ;;  %v4462_v13 = vpop.permute.xlu0 %4461 }
0x1151   :  { %6914 = vmatmul.mubr.msk.f32.vlgmr.msra.gmra.mrb[28].mxu0 %vm2753_vm4, %v3755_v56  ;;  %v5412_v56 = vld [vmem:[%s9081_s0] sm:$0xff] }
0x1152   :  { %6922 = vmatpush3.msk.msra.mxu0 %vm2757_vm13, %v3924_v55  ;;  %6923 = vmatprep.mubr.msk.f32.mxu0 %vm7643_vm10, %v7640_v14  ;;  %v5413_v55 = vld [vmem:[%s9081_s0 + $0x8] sm:$0xff] }
0x1153   :  { %6931 = vmatprep.subr.mxu0 %v7640_v14  ;;  %v4629_v21 = vpop.permute.xlu0 %4628 }
0x1157   :  { %v4796_v16 = vpop.permute.xlu0 %4795 }
0x1178   :  { %v4291_v34 = vpop.xlane.xlu1 %4290 }
0x117c   :  { %v4792_v20 = vpop.xlane.xlu1 %4791 }
0x1180   :  { %v3920_v22 = vpop.xlane.xlu0 %3919 }
0x1181   :  { %7509 = vrcp.f32 %v3920_v22 }
0x1184   :  { %v4125_v5 = vpop.xlane.xlu0 %4124 }
0x1185   :  { %7511 = vrcp.f32 %v4125_v5  ;;  %v5416_v5 = vld [vmem:[%s9081_s0 + $0x20] sm:$0xff] }
0x1186   :  { %7513 = vrcp.f32 %v4291_v34 }
0x1188   :  { %v4458_v39 = vpop.xlane.xlu0 %4457 }
0x1189   :  { %7515 = vrcp.f32 %v4458_v39  ;;  %v5417_v39 = vld [vmem:[%s9081_s0 + $0x28] sm:$0xff] }
0x118b   :  { %v7510_v1 = vpop.eup %7509 }
0x118c   :  { %v3922_v3 = vmul.f32 %v7510_v1, %v8730_v32  ;;  %v4625_v25 = vpop.xlane.xlu0 %4624 }
0x118d   :  { %7517 = vrcp.f32 %v4625_v25 }
0x118e   :  { %6924 = vmatmul.mubr.msk.f32.vlgmr.msra.gmra.mrb[30].mxu0 %vm2753_vm4, %v3922_v3  ;;  %7519 = vrcp.f32 %v4792_v20  ;;  %v7243_v3 = vpack.c.bf16 %v5417_v39, %v5416_v5 }
0x118f   :  { %v7512_v28 = vpop.eup %7511  ;;  %6932 = vmatpush3.msk.msra.mxu0 %vm2757_vm13, %v8698_v35  ;;  %6933 = vmatprep.mubr.msk.f32.mxu0 %vm7643_vm10, %v7640_v14 }
0x1190   :  { %v4127_v26 = vmul.f32 %v7512_v28, %v8734_v6  ;;  %6941 = vmatprep.subr.mxu0 %v7640_v14  ;;  %v7514_v44 = vpop.eup %7513  ;;  %v4959_v35 = vpop.xlane.xlu0 %4958 }
0x1191   :  { %v4293_v32 = vmul.f32 %v7514_v44, %v8715_v62  ;;  %7521 = vrcp.f32 %v4959_v35  ;;  %v5126_v12 = vpop.xlane.xlu1 %5125  ;;  %v5418_v44 = vld [vmem:[%s9081_s0 + $0x30] sm:$0xff] }
0x1192   :  { %6934 = vmatmul.mubr.msk.f32.vlgmr.msra.gmra.mrb[32].mxu0 %vm2753_vm4, %v4127_v26  ;;  %7523 = vrcp.f32 %v5126_v12 }
0x1193   :  { %6942 = vmatpush3.msk.msra.mxu0 %vm2757_vm13, %v4295_v54  ;;  %6943 = vmatprep.mubr.msk.f32.mxu0 %vm7643_vm10, %v7640_v14  ;;  %v7516_v18 = vpop.eup %7515  ;;  %v5414_v54 = vld [vmem:[%s9081_s0 + $0x10] sm:$0xff] }
0x1194   :  { %6951 = vmatprep.subr.mxu0 %v7640_v14  ;;  %v4460_v6 = vmul.f32 %v7516_v18, %v8740_v24  ;;  %v5130_v30 = vpop.permute.xlu0 %5129  ;;  %v5500_v18 = vld [vmem:[%s9082_s9] sm:$0xff] }
0x1195   :  { %v4963_v43 = vpop.permute.xlu1 %4962 }
0x1196   :  { %6944 = vmatmul.mubr.msk.f32.vlgmr.msra.gmra.mrb[34].mxu0 %vm2753_vm4, %v4293_v32  ;;  %v5419_v32 = vld [vmem:[%s9081_s0 + $0x38] sm:$0xff] }
0x1197   :  { %6952 = vmatpush3.msk.msra.mxu0 %vm2757_vm13, %v4462_v13  ;;  %6953 = vmatprep.mubr.msk.f32.mxu0 %vm7643_vm10, %v7640_v14  ;;  %v7518_v50 = vpop.eup %7517  ;;  %v7246_v35 = vpack.c.bf16 %v5419_v32, %v5418_v44 }
0x1198   :  { %6961 = vmatprep.subr.mxu0 %v7640_v14  ;;  %v4627_v62 = vmul.f32 %v7518_v50, %v8744_v57  ;;  %v7520_v29 = vpop.eup %7519  ;;  %v5502_v50 = vld [vmem:[%s9082_s9 + $0x10] sm:$0xff] }
0x1199   :  { %v4794_v24 = vmul.f32 %v7520_v29, %v8722_v0 }
0x119a   :  { %6954 = vmatmul.mubr.msk.f32.vlgmr.msra.gmra.mrb[36].mxu0 %vm2753_vm4, %v4460_v6  ;;  %v5501_v6 = vld [vmem:[%s9082_s9 + $0x8] sm:$0xff] }
0x119b   :  { %6962 = vmatpush3.msk.msra.mxu0 %vm2757_vm13, %v4629_v21  ;;  %6963 = vmatprep.mubr.msk.f32.mxu0 %vm7643_vm10, %v7640_v14  ;;  %v7522_v19 = vpop.eup %7521  ;;  %v7237_v21 = vpack.c.bf16 %v5413_v55, %v5412_v56  ;;  %v7249_v12 = vpack.c.bf16 %v5501_v6, %v5500_v18 }
0x119c   :  { %6971 = vmatprep.subr.mxu0 %v7640_v14  ;;  %v4961_v57 = vmul.f32 %v7522_v19, %v8748_v7  ;;  %v7524_v60 = vpop.eup %7523  ;;  %v5505_v19 = vld [vmem:[%s9082_s9 + $0x28] sm:$0xff] }
0x119d   :  { %v5128_v0 = vmul.f32 %v7524_v60, %v8750_v23  ;;  %7238 = vmatpush3.bf16.msra.mxu1 %v7237_v21 }
0x119e   :  { %6964 = vmatmul.mubr.msk.f32.vlgmr.msra.gmra.mrb[38].mxu0 %vm2753_vm4, %v4627_v62  ;;  %7239 = vmatprep.subr.bf16.mxu1 %v7644_v59  ;;  %v5503_v62 = vld [vmem:[%s9082_s9 + $0x18] sm:$0xff] }
0x119f   :  { %6972 = vmatpush3.msk.msra.mxu0 %vm2757_vm13, %v4796_v16  ;;  %6973 = vmatprep.mubr.msk.f32.mxu0 %vm7643_vm10, %v7640_v14  ;;  %v5415_v16 = vld [vmem:[%s9081_s0 + $0x18] sm:$0xff]  ;;  %v7252_v29 = vpack.c.bf16 %v5503_v62, %v5502_v50  ;;  %v5517_v50 = vld [vmem:[%s9085_s29 + $0x8] sm:$0xff] }
0x11a0   :  { %6981 = vmatprep.subr.mxu0 %v7640_v14  ;;  %v7240_v22 = vpack.c.bf16 %v5415_v16, %v5414_v54 }
0x11a2   :  { %6974 = vmatmul.mubr.msk.f32.vlgmr.msra.gmra.mrb[40].mxu0 %vm2753_vm4, %v4794_v24  ;;  %7241 = vmatpush3.bf16.msra.mxu1 %v7240_v22  ;;  %v5504_v24 = vld [vmem:[%s9082_s9 + $0x20] sm:$0xff] }
0x11a3   :  { %6982 = vmatpush3.msk.msra.mxu0 %vm2757_vm13, %v4963_v43  ;;  %6983 = vmatprep.mubr.msk.f32.mxu0 %vm7643_vm10, %v7640_v14  ;;  %v7255_v60 = vpack.c.bf16 %v5505_v19, %v5504_v24  ;;  %v6495_v22 = vld [vmem:[%s9084_s21] ss:$0 sm:$0xff]  ;;  %v5518_v24 = vld [vmem:[%s9085_s29 + $0x10] sm:$0xff]  ;;  %v5519_v19 = vld [vmem:[%s9085_s29 + $0x18] sm:$0xff] }
0x11a4   :  { %6991 = vmatprep.subr.mxu0 %v7640_v14  ;;  %7242 = vmatprep.subr.bf16.mxu1 %v7644_v59 }
0x11a6   :  { %6984 = vmatmul.mubr.msk.f32.vlgmr.msra.gmra.mrb[42].mxu0 %vm2753_vm4, %v4961_v57  ;;  %7244 = vmatpush3.bf16.msra.mxu1 %v7243_v3 }
0x11a7   :  { %6992 = vmatpush3.msk.msra.mxu0 %vm2757_vm13, %v5130_v30  ;;  %6993 = vmatprep.mubr.msk.f32.mxu0 %vm7643_vm10, %v7640_v14  ;;  %v5506_v30 = vld [vmem:[%s9082_s9 + $0x30] sm:$0xff] }
0x11a8   :  { %7001 = vmatprep.subr.mxu0 %v7640_v14  ;;  %7245 = vmatprep.subr.bf16.mxu1 %v7644_v59 }
0x11aa   :  { %6994 = vmatmul.mubr.msk.f32.vlgmr.msra.gmra.mrb[44].mxu0 %vm2753_vm4, %v5128_v0  ;;  %7247 = vmatpush3.bf16.msra.mxu1 %v7246_v35  ;;  %v5507_v0 = vld [vmem:[%s9082_s9 + $0x38] sm:$0xff] }
0x11ab   :  { %7003 = vmatprep.mubr.msk.f32.mxu0 %vm7643_vm10, %v7640_v14  ;;  %7284 = vmatprep.subr.bf16.mxu1 %v7644_v59 }
0x11c5   :  { %v5293_v7 = vpop.xlane.xlu0 %5292 }
0x11c6   :  { %7525 = vrcp.f32 %v5293_v7  ;;  %v7258_v7 = vpack.c.bf16 %v5507_v0, %v5506_v30  ;;  %v5521_v30 = vld [vmem:[%s9085_s29 + $0x28] sm:$0xff] }
0x11c9   :  { %v5297_v10 = vpop.permute.xlu0 %5296 }
0x11ca   :  { %7002 = vmatpush3.msk.msra.mxu0 %vm2757_vm13, %v5297_v10 }
0x11cb   :  { %7248 = vmatprep.subr.bf16.mxu0 %v7644_v59 }
0x11d0   :  { %v7526_v27 = vpop.eup %7525 }
0x11d1   :  { %v5295_v49 = vmul.f32 %v7526_v27, %v8761_v38 }
0x11d3   :  { %7004 = vmatmul.mubr.msk.f32.vlgmr.msra.gmra.mrb[46].mxu0 %vm2753_vm4, %v5295_v49 }
0x11d4   :  { %7041 = vmatprep.mubr.msk.f32.mxu0 %vm7643_vm10, %v7640_v14  ;;  %7250 = vmatpush3.bf16.msra.mxu0 %v7249_v12 }
0x11d5   :  { %7251 = vmatprep.subr.bf16.mxu0 %v7644_v59 }
0x11d8   :  { %7253 = vmatpush3.bf16.msra.mxu0 %v7252_v29 }
0x11d9   :  { %7254 = vmatprep.subr.bf16.mxu0 %v7644_v59 }
0x11dc   :  { %7256 = vmatpush3.bf16.msra.mxu0 %v7255_v60 }
0x11dd   :  { %7257 = vmatprep.subr.bf16.mxu0 %v7644_v59 }
0x11e0   :  { %7259 = vmatpush3.bf16.msra.mxu0 %v7258_v7 }
0x11e1   :  { %7260 = vmatprep.subr.bf16.mxu0 %v7644_v59 }
0x120c   :  { %v8868_v23 = vpop.f32.mrb[16].mxu0 }
0x120d   :  { %v6855_v33 = vpop.f32.mrb[17].mxu0 }
0x1210   :  { %v2994_v37 = vpop.f32.mrb[18].mxu0 }
0x1211   :  { %4001 = vrot.lane.b32.xlu1 %v2994_v37, %s7656_s17  ;;  %v6865_v61 = vpop.f32.mrb[19].mxu0 }
0x1214   :  { %v3161_v40 = vpop.f32.mrb[20].mxu0 }
0x1215   :  { %4005 = vrot.lane.b32.xlu1 %v3161_v40, %s7655_s13  ;;  %v6875_v41 = vpop.f32.mrb[21].mxu0 }
0x1218   :  { %v3328_v31 = vpop.f32.mrb[22].mxu0 }
0x1219   :  { %4009 = vrot.lane.b32.xlu1 %v3328_v31, %s7653_s10  ;;  %v6885_v38 = vpop.f32.mrb[23].mxu0 }
0x121c   :  { %v3495_v4 = vpop.f32.mrb[24].mxu0 }
0x121d   :  { %4013 = vrot.lane.b32.xlu1 %v3495_v4, %s7641_s5  ;;  %v6895_v48 = vpop.f32.mrb[25].mxu0 }
0x1220   :  { %v3662_v42 = vpop.f32.mrb[26].mxu0 }
0x1221   :  { %4017 = vrot.lane.b32.xlu1 %v3662_v42, %s7650_s1  ;;  %v6905_v47 = vpop.f32.mrb[27].mxu0 }
0x1224   :  { %v3829_v46 = vpop.f32.mrb[28].mxu0 }
0x1225   :  { %4021 = vrot.lane.b32.xlu1 %v3829_v46, %s7649_s28  ;;  %v6915_v45 = vpop.f32.mrb[29].mxu0 }
0x1261   :  { %v3996_v9 = vpop.f32.mrb[30].mxu0 }
0x1262   :  { %v6925_v8 = vpop.f32.mrb[31].mxu0 }
0x1265   :  { %v8876_v17 = vpop.f32.mrb[32].mxu0 }
0x1266   :  { %v6935_v11 = vpop.f32.mrb[33].mxu0 }
0x1269   :  { %v4367_v15 = vpop.f32.mrb[34].mxu0 }
0x126a   :  { %5374 = vrot.lane.b32.xlu0 %v4367_v15, %s7656_s17  ;;  %v6945_v51 = vpop.f32.mrb[35].mxu0 }
0x126d   :  { %v4534_v2 = vpop.f32.mrb[36].mxu0 }
0x126e   :  { %5378 = vrot.lane.b32.xlu0 %v4534_v2, %s7655_s13  ;;  %v6955_v52 = vpop.f32.mrb[37].mxu0 }
0x1271   :  { %v4701_v53 = vpop.f32.mrb[38].mxu0 }
0x1272   :  { %5382 = vrot.lane.b32.xlu0 %v4701_v53, %s7653_s10  ;;  %v6965_v13 = vpop.f32.mrb[39].mxu0 }
0x1275   :  { %v4868_v34 = vpop.f32.mrb[40].mxu0 }
0x1276   :  { %5386 = vrot.lane.b32.xlu0 %v4868_v34, %s7641_s5  ;;  %v6975_v1 = vpop.f32.mrb[41].mxu0  ;;  %s9083_s5 = sld [smem:[#allocation26_spill]] }
0x1279   :  { %v5035_v25 = vpop.f32.mrb[42].mxu0 }
0x127a   :  { %5390 = vrot.lane.b32.xlu0 %v5035_v25, %s7650_s1  ;;  %v6985_v28 = vpop.f32.mrb[43].mxu0 }
0x127c   :  { %v5508_v21 = vld [vmem:[%s9083_s5] sm:$0xff]  ;;  %v5509_v16 = vld [vmem:[%s9083_s5 + $0x8] sm:$0xff]  ;;  %v5510_v3 = vld [vmem:[%s9083_s5 + $0x10] sm:$0xff] }
0x127d   :  { %v5202_v20 = vpop.f32.mrb[44].mxu0  ;;  %v7261_v5 = vpack.c.bf16 %v5509_v16, %v5508_v21  ;;  %v5511_v25 = vld [vmem:[%s9083_s5 + $0x18] sm:$0xff]  ;;  %v5513_v44 = vld [vmem:[%s9083_s5 + $0x28] sm:$0xff]  ;;  %v5514_v35 = vld [vmem:[%s9083_s5 + $0x30] sm:$0xff] }
0x127e   :  { %5394 = vrot.lane.b32.xlu0 %v5202_v20, %s7649_s28  ;;  %v6995_v26 = vpop.f32.mrb[45].mxu0  ;;  %v7264_v20 = vpack.c.bf16 %v5511_v25, %v5510_v3  ;;  %v5515_v18 = vld [vmem:[%s9083_s5 + $0x38] sm:$0xff] }
0x127f   :  { %v5512_v26 = vld [vmem:[%s9083_s5 + $0x20] sm:$0xff]  ;;  %v7270_v6 = vpack.c.bf16 %v5515_v18, %v5514_v35  ;;  %v6220_v21 = vld [vmem:[%s9090_s30 + $0x18] sm:$0xff] }
0x1280   :  { %v7267_v32 = vpack.c.bf16 %v5513_v44, %v5512_v26 }
0x1283   :  { %v4002_v27 = vpop.permute.xlu1 %4001 }
0x1284   :  { %v4028_v45 = vsel %vm2665_vm15, %v8868_v23, %v4002_v27 }
0x1287   :  { %v4006_v33 = vpop.permute.xlu1 %4005 }
0x1288   :  { %v4029_v8 = vsel %vm187_vm1, %v4028_v45, %v4006_v33  ;;  %v5979_v33 = vld [vmem:[%s9086_s3 + $0x8] sm:$0xff]  ;;  %v6128_v45 = vld [vmem:[%s9089_s24] sm:$0xff] }
0x128b   :  { %v4010_v61 = vpop.permute.xlu1 %4009 }
0x128c   :  { %v4031_v51 = vsel %vm4030_vm7, %v4029_v8, %v4010_v61 }
0x128f   :  { %v4014_v41 = vpop.permute.xlu1 %4013 }
0x1290   :  { %v4032_v52 = vsel %vm886_vm6, %v4031_v51, %v4014_v41  ;;  %v5981_v41 = vld [vmem:[%s9086_s3 + $0x18] sm:$0xff] }
0x1293   :  { %v4018_v38 = vpop.permute.xlu1 %4017 }
0x1294   :  { %v4034_v53 = vsel %vm4033_vm3, %v4032_v52, %v4018_v38 }
0x12a6   :  { %v5369_v43 = vpop.f32.mrb[46].mxu0 }
0x12a7   :  { %5398 = vrot.lane.b32.xlu0 %v5369_v43, %s7645_s18  ;;  %v7005_v57 = vpop.f32.mrb[47].mxu0 }
0x12a8   :  { %v7276_v57 = vpack.c.bf16 %v5519_v19, %v5518_v24 }
0x12ab   :  { %4025 = vrot.lane.b32.xlu0 %v3996_v9, %s7645_s18 }
0x12dc   :  { %v5375_v10 = vpop.permute.xlu0 %5374 }
0x12dd   :  { %v5401_v4 = vsel %vm2665_vm15, %v8876_v17, %v5375_v10  ;;  %v4022_v17 = vpop.permute.xlu1 %4021  ;;  %v5523_v10 = vld [vmem:[%s9085_s29 + $0x38] sm:$0xff] }
0x12de   :  { %v4036_v56 = vsel %vm4035_vm8, %v4034_v53, %v4022_v17  ;;  %v6130_v17 = vld [vmem:[%s9089_s24 + $0x10] sm:$0xff] }
0x12e0   :  { %v5379_v49 = vpop.permute.xlu0 %5378 }
0x12e1   :  { %v5402_v48 = vsel %vm187_vm1, %v5401_v4, %v5379_v49  ;;  %v5978_v49 = vld [vmem:[%s9086_s3] sm:$0xff]  ;;  %vm5975_vm1 = vcmask 1040384  }
0x12e2   :  { %v5977_v4 = vld [vmem:[%s9087_s8] sm:$0xff] }
0x12e4   :  { %v5383_v37 = vpop.permute.xlu0 %5382 }
0x12e5   :  { %v5403_v47 = vsel %vm4030_vm7, %v5402_v48, %v5383_v37  ;;  %v7321_v37 = vpack.c.bf16 %v5979_v33, %v5978_v49 }
0x12e8   :  { %v5387_v40 = vpop.permute.xlu0 %5386 }
0x12e9   :  { %v5404_v46 = vsel %vm886_vm6, %v5403_v47, %v5387_v40  ;;  %v5980_v40 = vld [vmem:[%s9086_s3 + $0x10] sm:$0xff]  ;;  %v5524_v47 = vld [vmem:[%s9088_s19] sm:$0x1] }
0x12ea   :  { %v7324_v38 = vpack.c.bf16 %v5981_v41, %v5980_v40 }
0x12ec   :  { %v5391_v31 = vpop.permute.xlu0 %5390 }
0x12ed   :  { %v5405_v9 = vsel %vm4033_vm3, %v5404_v46, %v5391_v31 }
0x12f0   :  { %v5395_v42 = vpop.permute.xlu0 %5394 }
0x12f1   :  { %v5406_v11 = vsel %vm4035_vm8, %v5405_v9, %v5395_v42  ;;  %v6129_v9 = vld [vmem:[%s9089_s24 + $0x8] sm:$0xff] }
0x12f2   :  { %v7327_v51 = vpack.c.bf16 %v6129_v9, %v6128_v45 }
0x1319   :  { %v5399_v15 = vpop.permute.xlu0 %5398 }
0x131a   :  { %v5407_v2 = vsel %vm4037_vm5, %v5406_v11, %v5399_v15 }
0x131b   :  { %v5409_v55 = vrot.slane %v5407_v2, 4  ;;  %v6131_v2 = vld [vmem:[%s9089_s24 + $0x18] sm:$0xff] }
0x131d   :  { %v4026_v54 = vpop.permute.xlu0 %4025 }
0x131e   :  { %v4038_v13 = vsel %vm4037_vm5, %v4036_v56, %v4026_v54  ;;  %v6218_v54 = vld [vmem:[%s9090_s30 + $0x8] sm:$0xff] }
0x131f   :  { %v5411_v23 = vsel %vm2757_vm13, %v4038_v13, %v5409_v55  ;;  %v7330_v55 = vpack.c.bf16 %v6131_v2, %v6130_v17 }
0x1320   :  { %7023 = vmatmul.mubr.msk.f32.vlgmr.msra.gmra.mrb[54].mxu1 %vm888_vm2, %v5411_v23  ;;  %v6219_v23 = vld [vmem:[%s9090_s30 + $0x10] sm:$0xff] }
0x1321   :  { %7286 = vmatpush3.bf16.msra.mxu1 %v7249_v12  ;;  %7098 = vmatprep.mubr.msk.f32.mxu1 %vm7643_vm10, %v7640_v14  ;;  %v5516_v12 = vld [vmem:[%s9085_s29] sm:$0xff]  ;;  %v7336_v16 = vpack.c.bf16 %v6220_v21, %v6219_v23 }
0x1322   :  { %7287 = vmatprep.subr.bf16.mxu1 %v7644_v59  ;;  %v7273_v62 = vpack.c.bf16 %v5517_v50, %v5516_v12 }
0x1325   :  { %7289 = vmatpush3.bf16.msra.mxu1 %v7252_v29 }
0x1326   :  { %7290 = vmatprep.subr.bf16.mxu1 %v7644_v59 }
0x1329   :  { %7292 = vmatpush3.bf16.msra.mxu1 %v7255_v60  ;;  %v5520_v60 = vld [vmem:[%s9085_s29 + $0x20] sm:$0xff] }
0x132a   :  { %7293 = vmatprep.subr.bf16.mxu1 %v7644_v59  ;;  %v7279_v0 = vpack.c.bf16 %v5521_v30, %v5520_v60 }
0x132d   :  { %7295 = vmatpush3.bf16.msra.mxu1 %v7258_v7  ;;  %v5522_v7 = vld [vmem:[%s9085_s29 + $0x30] sm:$0xff] }
0x132e   :  { %7296 = vmatprep.subr.bf16.mxu1 %v7644_v59  ;;  %v7282_v27 = vpack.c.bf16 %v5523_v10, %v5522_v7 }
0x13f3   :  { %v5496_v34 = vpop.f32.mrb[54].mxu1 }
0x13f4   :  { %v8929_v39 = vadd.f32 %v6495_v22, %v5496_v34  ;;  %v7024_v1 = vpop.f32.mrb[55].mxu1  ;;  %v6221_v22 = vld [vmem:[%s9090_s30 + $0x20] sm:$0xf] }
0x13f5   :  { %v6506_v1 = vld [vmem:[%s9091_s12] ss:$0 sm:$0xff] }
0x13f6   :  { %7042 = vmatmul.mubr.msk.f32.vlgmr.msra.gmra.mrb[48].mxu0 %vm888_vm2, %v8929_v39  ;;  %v5747_v28 = vrot.slane %v8929_v39, 4  ;;  %v5599_v29 = vrot.slane %v8929_v39, 1  ;;  %v5821_v43 = vrot.slane %v8929_v39, 5  ;;  %v5673_v61 = vrot.slane %v8929_v39, 2 }
0x13f7   :  { %7262 = vmatpush3.bf16.msra.mxu0 %v7261_v5  ;;  %7060 = vmatprep.mubr.msk.f32.mxu0 %vm7643_vm10, %v7640_v14  ;;  %v5895_v31 = vrot.slane %v8929_v39, 6 }
0x13f8   :  { %7099 = vmatmul.mubr.msk.f32.vlgmr.msra.gmra.mrb[56].mxu1 %vm888_vm2, %v5747_v28  ;;  %7263 = vmatprep.subr.bf16.mxu0 %v7644_v59 }
0x13f9   :  { %7298 = vmatpush3.bf16.msra.mxu1 %v7261_v5  ;;  %7117 = vmatprep.mubr.msk.f32.mxu1 %vm7643_vm10, %v7640_v14 }
0x13fa   :  { %7299 = vmatprep.subr.bf16.mxu1 %v7644_v59 }
0x13fb   :  { %7265 = vmatpush3.bf16.msra.mxu0 %v7264_v20 }
0x13fc   :  { %7266 = vmatprep.subr.bf16.mxu0 %v7644_v59 }
0x13fd   :  { %7301 = vmatpush3.bf16.msra.mxu1 %v7264_v20 }
0x13fe   :  { %7302 = vmatprep.subr.bf16.mxu1 %v7644_v59 }
0x13ff   :  { %7268 = vmatpush3.bf16.msra.mxu0 %v7267_v32 }
0x1400   :  { %7269 = vmatprep.subr.bf16.mxu0 %v7644_v59 }
0x1401   :  { %7304 = vmatpush3.bf16.msra.mxu1 %v7267_v32 }
0x1402   :  { %7305 = vmatprep.subr.bf16.mxu1 %v7644_v59 }
0x1403   :  { %7271 = vmatpush3.bf16.msra.mxu0 %v7270_v6 }
0x1404   :  { %7272 = vmatprep.subr.bf16.mxu0 %v7644_v59 }
0x1405   :  { %7307 = vmatpush3.bf16.msra.mxu1 %v7270_v6 }
0x1406   :  { %7061 = vmatmul.mubr.msk.f32.vlgmr.msra.gmra.mrb[48].mxu0 %vm888_vm2, %v5599_v29  ;;  %7308 = vmatprep.subr.bf16.mxu1 %v7644_v59 }
0x1407   :  { %7274 = vmatpush3.bf16.msra.mxu0 %v7273_v62  ;;  %7079 = vmatprep.mubr.msk.f32.mxu0 %vm7643_vm10, %v7640_v14 }
0x1408   :  { %7118 = vmatmul.mubr.msk.f32.vlgmr.msra.gmra.mrb[56].mxu1 %vm888_vm2, %v5821_v43  ;;  %7275 = vmatprep.subr.bf16.mxu0 %v7644_v59 }
0x1409   :  { %7310 = vmatpush3.bf16.msra.mxu1 %v7273_v62  ;;  %7136 = vmatprep.mubr.msk.f32.mxu1 %vm7643_vm10, %v7640_v14 }
0x140a   :  { %7311 = vmatprep.subr.bf16.mxu1 %v7644_v59 }
0x140b   :  { %7277 = vmatpush3.bf16.msra.mxu0 %v7276_v57 }
0x140c   :  { %7278 = vmatprep.subr.bf16.mxu0 %v7644_v59 }
0x140d   :  { %7313 = vmatpush3.bf16.msra.mxu1 %v7276_v57 }
0x140e   :  { %7314 = vmatprep.subr.bf16.mxu1 %v7644_v59 }
0x140f   :  { %7280 = vmatpush3.bf16.msra.mxu0 %v7279_v0 }
0x1410   :  { %7281 = vmatprep.subr.bf16.mxu0 %v7644_v59 }
0x1411   :  { %7316 = vmatpush3.bf16.msra.mxu1 %v7279_v0 }
0x1412   :  { %7317 = vmatprep.subr.bf16.mxu1 %v7644_v59 }
0x1413   :  { %7283 = vmatpush3.bf16.msra.mxu0 %v7282_v27 }
0x1414   :  { %7320 = vmatprep.subr.bf16.mxu0 %v7644_v59 }
0x1415   :  { %7319 = vmatpush3.bf16.msra.mxu1 %v7282_v27 }
0x1416   :  { %7080 = vmatmul.mubr.msk.f32.vlgmr.msra.gmra.mrb[48].mxu0 %vm888_vm2, %v5673_v61  ;;  %7332 = vmatprep.subr.bf16.mxu1 %v7644_v59 }
0x1417   :  { %7322 = vmatpush3.bf16.msra.mxu0 %v7321_v37  ;;  %7147 = vmatprep.mubr.msk.f32.mxu0 %vm7643_vm10, %v7640_v14 }
0x1418   :  { %7137 = vmatmul.mubr.msk.f32.vlgmr.msra.gmra.mrb[56].mxu1 %vm888_vm2, %v5895_v31  ;;  %7323 = vmatprep.subr.bf16.mxu0 %v7644_v59 }
0x1419   :  { %7176 = vmatprep.mubr.msk.f32.mxu1 %vm7643_vm10, %v7640_v14 }
0x141b   :  { %7325 = vmatpush3.bf16.msra.mxu0 %v7324_v38 }
0x141c   :  { %7150 = vmatprep.subr.mxu0 %v7640_v14 }
0x141e   :  { %7148 = vmatmul.mubr.msk.f32.vlgmr.msra.gmra.mrb[50].mxu0 %vm886_vm6, %v8441_v63 }
0x141f   :  { %7152 = vmatprep.mubr.msk.f32.mxu0 %vm7643_vm10, %v7640_v14  ;;  %7151 = vmatpush3.msra.mxu0 %v5977_v4 }
0x1420   :  { %7326 = vmatprep.subr.bf16.mxu0 %v7644_v59 }
0x14e9   :  { %v5742_v48 = vpop.f32.mrb[48].mxu0 }
0x14ea   :  { %v7081_v42 = vpop.f32.mrb[49].mxu0  ;;  %v7338_v63 = vadd.f32 %v5742_v48, %v5524_v47 }
0x14eb   :  { %v5964_v46 = vpop.f32.mrb[56].mxu1 }
0x14ec   :  { %v7339_v8 = vadd.f32 %v5964_v46, %v5524_v47  ;;  %v7138_v11 = vpop.f32.mrb[57].mxu1 }
0x14ee   :  { %v5973_v15 = vrot.slane %v7339_v8, %v8013_v36  ;;  %v6217_v36 = vld [vmem:[%s9090_s30] sm:$0xff] }
0x14ef   :  { %v7333_v13 = vpack.c.bf16 %v6218_v54, %v6217_v36 }
0x14f0   :  { %v5976_v52 = vsel %vm5975_vm1, %v7338_v63, %v5973_v15 }
0x14f1   :  { %v6051_v53 = vpop.f32.mrb[50].mxu0  ;;  %7153 = vmatmul.mubr.msk.f32.vlgmr.msra.gmra.mrb[52].mxu0 %vm2665_vm15, %v5976_v52  ;;  %7334 = vmatpush3.bf16.msra.mxu1 %v7333_v13 }
0x14f2   :  { %7328 = vmatpush3.bf16.msra.mxu0 %v7327_v51  ;;  %v7149_v56 = vpop.f32.mrb[51].mxu0  ;;  %7163 = vmatprep.mubr.msk.f32.mxu0 %vm7643_vm10, %v7640_v14 }
0x14f3   :  { %7329 = vmatprep.subr.bf16.mxu0 %v7644_v59  ;;  %7335 = vmatprep.subr.bf16.mxu1 %v7644_v59 }
0x14f5   :  { %7337 = vmatpush3.bf16.msra.mxu1 %v7336_v16 }
0x14f6   :  { %7331 = vmatpush3.bf16.msra.mxu0 %v7330_v55  ;;  %7174 = vmatprep.subr.mxu1 %v7640_v14 }
0x14f9   :  { %7164 = vmatmul.mubr.msk.f32.vlgmr.msra.gmra.mrb[54].mxu0 %vm886_vm6, %v8437_v58  ;;  %7175 = vmatpush3.msk.msra.mxu1 %vm2757_vm13, %v6221_v22 }
0x15c4   :  { %v6124_v34 = vpop.f32.mrb[52].mxu0 }
0x15c5   :  { %v6125_v5 = vadd.f32 %v6124_v34, %v6051_v53  ;;  %v7154_v39 = vpop.f32.mrb[53].mxu0 }
0x15cc   :  { %v6201_v58 = vpop.f32.mrb[54].mxu0 }
0x15cd   :  { %v6205_v3 = vadd.f32 %v6201_v58, %v6125_v5  ;;  %v7165_v25 = vpop.f32.mrb[55].mxu0 }
0x15cf   :  { %v6213_v28 = vadd.f32 %v6506_v1, %v6205_v3 }
0x15d1   :  { %vm6214_vm10 = vcmp.gt.f32.partialorder %v6213_v28, 0.0  ;;  %v6215_v20 = vmul.f32 0.01, %v6213_v28 }
0x15d3   :  { %v6216_v59 = vsel %vm6214_vm10, %v6213_v28, %v6215_v20 }
0x15d4   :  { %7177 = vmatmul.mubr.msk.f32.vlgmr.msra.gmra.mrb[58].mxu1 %vm6229_vm9, %v6216_v59 }
0x15d5   :  { %7538 = shalt.err (!%p7535_p4)
}
0x15d6   :  { %s7539_s16 = scalar_lea.hbm %s7873_s4, 32 }
0x15d7   :  { %p7540_p5 = scmp.ne.s32.totalorder %s7873_s4, %s7539_s16  ;;  %p7543_p6 = scmp.lt.u32.totalorder %s7539_s16, %s7873_s4 }
0x15d9   :  { %p7545_p7 = pnand %p7543_p6, %p7540_p5 }
0x15db   :  { %7548 = shalt.err (!%p7545_p7)
}
0x15dc   :  { %6327 = dma.vmem_to_hbm [thread:$0]  %s6325_s27, 32, %s7873_s4, [#allocation5]  }
0x15dd   :  { %s7658_s18 = smov [#allocation6]  }
0x15de   :  { %s6334_s22 = sshll.u32 %s7658_s18, 4  ;;  %s6335_s22 = int_to_ptr.vmem [resolvable:$true] %s6334_s22 }
0x15df   :  { %s7549_s23 = scalar_lea.vmem %s6335_s22, 32  ;;  %p7554_p9 = scmp.lt.s32.totalorder %s6335_s22, %s6335_s22 }
0x15e0   :  { %p7550_p8 = scmp.ne.s32.totalorder %s6335_s22, %s7549_s23  ;;  %p7555_p10 = scmp.lt.s32.totalorder %s7549_s23, %s7549_s23 }
0x15e2   :  { %p7556_p11 = por %p7555_p10, %p7554_p9 }
0x15e4   :  { %p7557_p12 = pnand %p7556_p11, %p7550_p8 }
0x15e6   :  { %7560 = shalt.err (!%p7557_p12)
}
0x15e7   :  { %s7561_s26 = scalar_lea.hbm %s7878_s6, 32 }
0x15e8   :  { %p7562_p13 = scmp.ne.s32.totalorder %s7878_s6, %s7561_s26  ;;  %p7565_p0 = scmp.lt.u32.totalorder %s7561_s26, %s7878_s6 }
0x15ea   :  { %p7567_p1 = pnand %p7565_p0, %p7562_p13 }
0x15ec   :  { %7570 = shalt.err (!%p7567_p1)
}
0x15ed   :  { %6337 = dma.vmem_to_hbm [thread:$0]  %s6335_s22, 32, %s7878_s6, [#allocation5]   ;;  %v6507_v14 = vld [vmem:[%s7863_s14] ss:$0 sm:$0xff]  ;;  %vm6306_vm6 = vcmask 9216  }
0x15ee   :  { %s7659_s4 = smov [#allocation2]  }
0x15ef   :  { %s6314_s28 = sshll.u32 %s7659_s4, 4  ;;  %s6315_s28 = int_to_ptr.vmem [resolvable:$true] %s6314_s28 }
0x15f0   :  { %s7571_s1 = scalar_lea.vmem %s6315_s28, 32  ;;  %p7576_p3 = scmp.lt.s32.totalorder %s6315_s28, %s6315_s28 }
0x15f1   :  { %p7572_p2 = scmp.ne.s32.totalorder %s6315_s28, %s7571_s1  ;;  %p7577_p4 = scmp.lt.s32.totalorder %s7571_s1, %s7571_s1 }
0x15f3   :  { %p7578_p5 = por %p7577_p4, %p7576_p3 }
0x15f5   :  { %p7579_p6 = pnand %p7578_p5, %p7572_p2 }
0x16a7   :  { %v6302_v26 = vpop.f32.mrb[58].mxu1 }
0x16a8   :  { %v6303_v44 = vadd.f32 %v6507_v14, %v6302_v26  ;;  %v7178_v32 = vpop.f32.mrb[59].mxu1 }
0x16aa   :  { %6307 = vst.msk [vmem:[#allocation2] sm:$0x3] %vm6306_vm6, %v6303_v44 }
0x16ab   :  { %7582 = shalt.err (!%p7579_p6)
}
0x16ac   :  { %s7583_s6 = scalar_lea.hbm %s7868_s25, 32 }
0x16ad   :  { %p7584_p7 = scmp.ne.s32.totalorder %s7868_s25, %s7583_s6  ;;  %p7587_p8 = scmp.lt.u32.totalorder %s7583_s6, %s7868_s25 }
0x16af   :  { %p7589_p9 = pnand %p7587_p8, %p7584_p7 }
0x16b1   :  { %7592 = shalt.err (!%p7589_p9)
}
0x16b2   :  { %6317 = dma.vmem_to_hbm [thread:$0]  %s6315_s28, 32, %s7868_s25, [#allocation3]  }
0x16b3   :  { %7593 = dma.done.wait [#allocation3], 32  }
0x16b4   :  { %7594 = vsyncadd [#allocation3], 4294967264 }
0x16b5   :  { %7595 = dma.done.wait [#allocation5], 64  }
0x16b6   :  { %7596 = vsyncadd [#allocation5], 4294967232 }
0x16b7   :  { %6347 = vsyncpa [#allocation3], 1 }
0x16b8   :  { %6348 = vsyncpa [#allocation5], 1 }

</bundles_post_ra>
